<compile_context>
chip_gen: v5e
topology: v5e:2x2
jax: 0.10.0
libtpu: 0.0.40
codegen_flags: <defaults>
</compile_context>

<pallas_src>
import functools
import numpy as np

import jax
import jax.numpy as jnp
from jax import lax
from jax.experimental import pallas as pl
from jax.experimental.pallas import tpu as pltpu


def _round_up(x, m):
    return ((x + m - 1) // m) * m


# ----------------------------------------------------------------------------
# Host-side parameter preparation (one time).
# ----------------------------------------------------------------------------
def _subpixel_conv3x3_weight(w_hwio):
    """Fine-grid 3x3/pad-1 conv weight (3,3,Ci,Co) -> coarse-grid sub-pixel
    weight (3,3,4*Ci,4*Co).  Channel order is (parity_h, parity_w, channel)."""
    w = np.asarray(w_hwio)
    ci, co = w.shape[2], w.shape[3]
    ws = np.zeros((3, 3, 4 * ci, 4 * co), w.dtype)
    for a in range(2):                      # output row parity
        for dh in (-1, 0, 1):               # fine-grid row tap
            p = (a + dh) % 2                # input row parity
            s = (a + dh - p) // 2           # coarse row shift
            for b in range(2):              # output col parity
                for dw in (-1, 0, 1):       # fine-grid col tap
                    q = (b + dw) % 2
                    t = (b + dw - q) // 2
                    ws[s + 1, t + 1,
                       (2 * p + q) * ci:(2 * p + q + 1) * ci,
                       (2 * a + b) * co:(2 * a + b + 1) * co] = w[dh + 1, dw + 1]
    return ws


def prepare_upconv_params(params, compute_dtype=jnp.bfloat16):
    """Convert torch-layout parameters into the kernel's layout (one time)."""
    wT, bT, w1, b1, w2, b2 = (np.asarray(p) for p in params)
    cin, cout = wT.shape[0], wT.shape[1]
    c4 = 4 * cout

    # ConvTranspose2d weight (Cin, Cout, 2, 2) -> (Cin, 4*Cout), cols (a,b,c).
    wt4 = np.transpose(wT, (0, 2, 3, 1)).reshape(cin, c4)
    bt4 = np.tile(bT, 4).reshape(1, c4)

    # torch Conv2d weights (O, I, 3, 3) -> HWIO.
    w1_hwio = np.transpose(w1, (2, 3, 1, 0))          # (3,3,2*Cout,Cout)
    w2_hwio = np.transpose(w2, (2, 3, 1, 0))          # (3,3,Cout,Cout)

    # Fold the channel concat (torch puts the upconv channels first) into ONE
    # conv1 weight whose input channels are [up(sub-pixel) | down(sub-pixel)].
    w1u = _subpixel_conv3x3_weight(w1_hwio[:, :, :cout, :])   # (3,3,c4,c4)
    w1d = _subpixel_conv3x3_weight(w1_hwio[:, :, cout:, :])   # (3,3,c4,c4)
    w1s = np.concatenate([w1u, w1d], axis=2)                  # (3,3,2*c4,c4)
    w2s = _subpixel_conv3x3_weight(w2_hwio)                   # (3,3,c4,c4)

    # Fold the kw tap into the contraction dim (im2col along width):
    # (3, 3, K, c4) -> (3, 3*K, c4), row index = kw*K + channel (kw-major).
    w1f = w1s.reshape(3, 3 * 2 * c4, c4)
    w2f = w2s.reshape(3, 3 * c4, c4)

    b1_4 = np.tile(b1, 4).reshape(1, c4)
    b2_4 = np.tile(b2, 4).reshape(1, c4)

    cdt = compute_dtype
    return (jnp.asarray(wt4, cdt), jnp.asarray(bt4, jnp.float32),
            jnp.asarray(w1f, cdt), jnp.asarray(b1_4, jnp.float32),
            jnp.asarray(w2f, cdt), jnp.asarray(b2_4, jnp.float32))


# ----------------------------------------------------------------------------
# Fused kernel: a block of batch elements per grid step, everything in VMEM.
# ----------------------------------------------------------------------------
def _upconv_fused_kernel(xu_ref, xd_ref, wt_ref, bt_ref, w1_ref, b1_ref,
                         w2_ref, b2_ref, o_ref, cat_pad, h1_pad):
    B, H, W, Cin = xu_ref.shape
    C4 = o_ref.shape[3]
    M = B * H * W
    f32 = jnp.float32
    cdt = cat_pad.dtype

    # ---- zero ONLY the 1-pixel halo of the padded scratches ----------------
    # (interior is fully overwritten every step; border-only zeroing removes
    #  full-tensor VMEM clears and stays megacore-safe).
    def zero_border(ref):
        wp, c = ref.shape[2], ref.shape[3]
        zrow = jnp.zeros((B, 1, wp, c), cdt)
        ref[:, 0:1, :, :] = zrow
        ref[:, H + 1:H + 2, :, :] = zrow
        zcol = jnp.zeros((B, H + 2, 1, c), cdt)
        ref[:, :, 0:1, :] = zcol
        ref[:, :, W + 1:W + 2, :] = zcol

    zero_border(cat_pad)
    zero_border(h1_pad)

    # ---- ConvTranspose2d(k=2, s=2): ONE matmul in sub-pixel space ----------
    xu = xu_ref[...].reshape(M, Cin)
    up = jnp.dot(xu, wt_ref[...], preferred_element_type=f32) + bt_ref[...]
    up = up.reshape(B, H, W, C4).astype(cdt)

    # concat([up, from_down], channel) folded into ONE padded operand.
    cat_pad[:, 1:H + 1, 1:W + 1, :] = jnp.concatenate(
        [up, xd_ref[...].astype(cdt)], axis=-1)

    # ---- 3x3 / pad=1 conv with the kw taps folded into the contraction -----
    def conv3x3_relu(pad_ref, w_ref, bias):
        csrc = pad_ref.shape[3]
        # im2col along width: (B, H+2, W, 3*csrc), channel order (kw, c) --
        # matches the host-side weight reshape (3, 3*csrc, C4).
        slab = jnp.concatenate(
            [pad_ref[:, :, kw:kw + W, :] for kw in range(3)], axis=-1)
        acc = jnp.zeros((M, C4), f32)
        for kh in range(3):                           # 3 fat dots, K = 3*csrc
            lhs = slab[:, kh:kh + H, :, :].reshape(M, 3 * csrc)
            acc = acc + jnp.dot(lhs, w_ref[kh], preferred_element_type=f32)
        return jnp.maximum(acc + bias, 0.0)           # f32 bias + ReLU epilogue

    h1 = conv3x3_relu(cat_pad, w1_ref, b1_ref[...])
    h1_pad[:, 1:H + 1, 1:W + 1, :] = h1.reshape(B, H, W, C4).astype(cdt)

    out = conv3x3_relu(h1_pad, w2_ref, b2_ref[...])
    o_ref[...] = out.reshape(B, H, W, C4).astype(o_ref.dtype)


def _pick_batch_block(N, H, W, Cin, C4, itemsize, budget=6 << 20):
    """Largest divisor of N whose per-step VMEM working set fits the budget
    (also capped so M = B*H*W stays around a few hundred rows)."""
    per = (H * W * (Cin + 2 * C4) * itemsize          # input blocks
           + H * W * C4 * 4                            # f32 output block
           + (H + 2) * (W + 2) * 3 * C4 * itemsize     # padded scratches
           + (H + 2) * W * 6 * C4 * itemsize           # conv1 im2col slab
           + 3 * H * W * C4 * 4)                       # f32 up/acc/h1 values
    b = max(1, min(N, max(1, budget // max(per, 1)), pl.cdiv(512, H * W)))
    while N % b:
        b -= 1
    return b


def _vmem_limit_bytes(B, H, W, Cin, C4, itemsize):
    wp = _round_up(W + 2, 8 if itemsize >= 4 else 16)
    m = B * H * W
    io = 2 * (m * Cin * itemsize + m * C4 * itemsize + m * C4 * 4)   # dbl-buffered I/O
    weights = 2 * ((Cin * C4 + 9 * 2 * C4 * C4 + 9 * C4 * C4) * itemsize
                   + 3 * C4 * 4)                                     # conservative (x2)
    scratch = B * (H + 2) * wp * 3 * C4 * itemsize                   # cat_pad + h1_pad
    temps = (B * (H + 2) * W * 6 * C4 * itemsize                     # conv1 im2col slab
             + m * 6 * C4 * itemsize                                 # kh-sliced lhs copy
             + 3 * m * C4 * 4)                                       # f32 up/acc/h1
    est = int((io + weights + scratch + temps) * 1.25) + (2 << 20)
    try:
        cap = int(pltpu.get_tpu_info().vmem_capacity_bytes)
    except Exception:
        cap = 64 << 20                                               # v7x-safe default
    return int(min(max(est, 16 << 20), cap * 9 // 10))


# ----------------------------------------------------------------------------
# UpConv forward (NCHW in / NCHW out, matching the PyTorch module).
# ----------------------------------------------------------------------------
@functools.partial(jax.jit, static_argnames=("single_buffer_weights",))
def upconv_forward(from_down, from_up, prepared, single_buffer_weights=True):
    wt4, bt4, w1f, b1_4, w2f, b2_4 = prepared
    cdt = wt4.dtype
    item = jnp.dtype(cdt).itemsize
    N, Cin, H, W = from_up.shape
    Cout = from_down.shape[1]
    C4 = 4 * Cout
    assert from_down.shape == (N, Cout, 2 * H, 2 * W)

    # NCHW -> NHWC (coarse) for from_up; NCHW -> sub-pixel NHWC for from_down.
    # TODO(synk): keep the surrounding U-Net in sub-pixel NHWC to drop these
    # wrapper-side transposes (each is a full HBM round trip of the activations).
    xu = jnp.transpose(from_up, (0, 2, 3, 1)).astype(cdt)              # (N,H,W,Cin)
    d4 = from_down.reshape(N, Cout, H, 2, W, 2)
    d4 = jnp.transpose(d4, (0, 2, 4, 3, 5, 1)).reshape(N, H, W, C4).astype(cdt)

    B = _pick_batch_block(N, H, W, Cin, C4, item)
    wp = _round_up(W + 2, 8 if item >= 4 else 16)

    def const_spec(shape):
        idx = lambda n: (0,) * len(shape)
        if single_buffer_weights and hasattr(pl, "Buffered"):
            try:   # constant-index operands: one resident copy, no double buffer
                return pl.BlockSpec(shape, idx, pipeline_mode=pl.Buffered(1))
            except TypeError:
                pass
        return pl.BlockSpec(shape, idx)

    out4 = pl.pallas_call(
        _upconv_fused_kernel,
        out_shape=jax.ShapeDtypeStruct((N, H, W, C4), jnp.float32),
        grid=(N // B,),
        in_specs=[
            pl.BlockSpec((B, H, W, Cin), lambda n: (n, 0, 0, 0)),
            pl.BlockSpec((B, H, W, C4), lambda n: (n, 0, 0, 0)),
            const_spec(wt4.shape),
            const_spec(bt4.shape),
            const_spec(w1f.shape),
            const_spec(b1_4.shape),
            const_spec(w2f.shape),
            const_spec(b2_4.shape),
        ],
        out_specs=pl.BlockSpec((B, H, W, C4), lambda n: (n, 0, 0, 0)),
        scratch_shapes=[
            pltpu.VMEM((B, H + 2, wp, 2 * C4), cdt),   # padded [up | from_down]
            pltpu.VMEM((B, H + 2, wp, C4), cdt),       # padded conv1 output
        ],
        compiler_params=pltpu.CompilerParams(
            dimension_semantics=("parallel",),
            vmem_limit_bytes=_vmem_limit_bytes(B, H, W, Cin, C4, item)),
    )(xu, d4, wt4, bt4, w1f, b1_4, w2f, b2_4)
    # TODO(synk): for production H,W add a second (parallel) grid axis over H
    # row-tiles with a 1-row halo so per-step VMEM fits v7x's 64 MiB and both
    # v7x TensorCores stay busy when N is small.

    # Sub-pixel NHWC -> fine-grid NCHW (inverse layout transform).
    out = out4.reshape(N, H, W, 2, 2, Cout)
    out = jnp.transpose(out, (0, 5, 1, 3, 2, 4)).reshape(N, Cout, 2 * H, 2 * W)
    return out


# ----------------------------------------------------------------------------
# Pure-JAX reference for verification.
# ----------------------------------------------------------------------------
def reference_forward(from_down, from_up, params):
    wT, bT, w1, b1, w2, b2 = params
    N, Cin, H, W = from_up.shape
    Cout = wT.shape[1]
    hi = lax.Precision.HIGHEST
    y = jnp.einsum('nchw,codq->nohwdq', from_up, wT, precision=hi)
    y = y.transpose(0, 1, 2, 4, 3, 5).reshape(N, Cout, 2 * H, 2 * W)
    up = y + bT[None, :, None, None]
    x = jnp.concatenate([up, from_down], axis=1)

    def c3(x, w, b):
        o = lax.conv_general_dilated(
            x, w, window_strides=(1, 1), padding=((1, 1), (1, 1)),
            dimension_numbers=('NCHW', 'OIHW', 'NCHW'), precision=hi)
        return jax.nn.relu(o + b[None, :, None, None])

    return c3(c3(x, w1, b1), w2, b2)


if __name__ == "__main__":
    key = jax.random.PRNGKey(0)
    k = jax.random.split(key, 8)

    N = 2
    in_channels = 8      # channels of from_up (decoder pathway)
    out_channels = 4     # channels after upconv / of from_down
    H = W = 8            # from_up spatial; from_down is (2H, 2W)

    from_up = jax.random.normal(k[0], (N, in_channels, H, W), jnp.float32)
    from_down = jax.random.normal(k[1], (N, out_channels, 2 * H, 2 * W), jnp.float32)

    wT = 0.1 * jax.random.normal(k[2], (in_channels, out_channels, 2, 2), jnp.float32)
    bT = 0.1 * jax.random.normal(k[3], (out_channels,), jnp.float32)
    w1 = 0.1 * jax.random.normal(k[4], (out_channels, 2 * out_channels, 3, 3), jnp.float32)
    b1 = 0.1 * jax.random.normal(k[5], (out_channels,), jnp.float32)
    w2 = 0.1 * jax.random.normal(k[6], (out_channels, out_channels, 3, 3), jnp.float32)
    b2 = 0.1 * jax.random.normal(k[7], (out_channels,), jnp.float32)
    params = (wT, bT, w1, b1, w2, b2)

    ref = reference_forward(from_down, from_up, params)

    def run(prep):
        try:
            out = upconv_forward(from_down, from_up, prep)
        except Exception:
            # Fallback if single-buffered weight specs (pl.Buffered(1)) are
            # not supported by the installed Pallas lowering.
            out = upconv_forward(from_down, from_up, prep,
                                 single_buffer_weights=False)
        return jax.block_until_ready(out)

    # Near-exact check: f32 MXU feeds vs a HIGHEST-precision XLA reference.
    out_f32 = run(prepare_upconv_params(params, compute_dtype=jnp.float32))
    assert out_f32.shape == (N, out_channels, 2 * H, 2 * W), out_f32.shape
    assert jnp.allclose(out_f32, ref, atol=1e-3, rtol=1e-3), (
        float(jnp.max(jnp.abs(out_f32 - ref))))

    # Performance path: bf16 MXU feeds, f32 accumulation + f32 epilogue.
    out_bf16 = run(prepare_upconv_params(params, compute_dtype=jnp.bfloat16))
    assert jnp.allclose(out_bf16, ref, atol=8e-2, rtol=8e-2), (
        float(jnp.max(jnp.abs(out_bf16 - ref))))

    print("KERNEL_OK")
</pallas_src>

<mosaic_0001>
module attributes {stable_mosaic.version = 11 : i64} {
  func.func @_upconv_fused_kernel(%arg0: i32, %arg1: memref<2x8x8x8xf32, #tpu.memory_space<vmem>>, %arg2: memref<2x8x8x16xf32, #tpu.memory_space<vmem>>, %arg3: memref<8x16xf32, #tpu.memory_space<vmem>>, %arg4: memref<1x16xf32, #tpu.memory_space<vmem>>, %arg5: memref<3x96x16xf32, #tpu.memory_space<vmem>>, %arg6: memref<1x16xf32, #tpu.memory_space<vmem>>, %arg7: memref<3x48x16xf32, #tpu.memory_space<vmem>>, %arg8: memref<1x16xf32, #tpu.memory_space<vmem>>, %arg9: memref<2x8x8x16xf32, #tpu.memory_space<vmem>>, %arg10: memref<2x10x16x32xf32, #tpu.memory_space<vmem>>, %arg11: memref<2x10x16x16xf32, #tpu.memory_space<vmem>>) attributes {dimension_semantics = [#tpu.dimension_semantics<parallel>], iteration_bounds = array<i64: 1>, scalar_prefetch = 0 : i64, scratch_operands = 2 : i64, tpu.core_type = #tpu.core_type<tc>, window_params = [{transform_indices = @transform_0, window_bounds = array<i64: 2, 8, 8, 8>}, {transform_indices = @transform_1, window_bounds = array<i64: 2, 8, 8, 16>}, {pipeline_mode = #tpu.pipeline_mode<synchronous>, transform_indices = @transform_2, window_bounds = array<i64: 8, 16>}, {pipeline_mode = #tpu.pipeline_mode<synchronous>, transform_indices = @transform_3, window_bounds = array<i64: 1, 16>}, {pipeline_mode = #tpu.pipeline_mode<synchronous>, transform_indices = @transform_4, window_bounds = array<i64: 3, 96, 16>}, {pipeline_mode = #tpu.pipeline_mode<synchronous>, transform_indices = @transform_5, window_bounds = array<i64: 1, 16>}, {pipeline_mode = #tpu.pipeline_mode<synchronous>, transform_indices = @transform_6, window_bounds = array<i64: 3, 48, 16>}, {pipeline_mode = #tpu.pipeline_mode<synchronous>, transform_indices = @transform_7, window_bounds = array<i64: 1, 16>}, {transform_indices = @transform_8, window_bounds = array<i64: 2, 8, 8, 16>}]} {
    %cst = arith.constant 0.000000e+00 : f32
    %0 = vector.broadcast %cst : f32 to vector<2x1x16x32xf32>
    %c0 = arith.constant 0 : index
    %c0_0 = arith.constant 0 : index
    %c0_1 = arith.constant 0 : index
    %c0_2 = arith.constant 0 : index
    %1 = vector.load %arg10[%c0, %c0_0, %c0_1, %c0_2] : memref<2x10x16x32xf32, #tpu.memory_space<vmem>>, vector<2x1x16x32xf32>
    tpu.vector_store %arg10[%c0, %c0_0, %c0_1, %c0_2], %0 {strides = array<i32>} : memref<2x10x16x32xf32, #tpu.memory_space<vmem>>, vector<2x1x16x32xf32>,
    %c0_3 = arith.constant 0 : index
    %c9 = arith.constant 9 : index
    %c0_4 = arith.constant 0 : index
    %c0_5 = arith.constant 0 : index
    %2 = vector.load %arg10[%c0_3, %c9, %c0_4, %c0_5] : memref<2x10x16x32xf32, #tpu.memory_space<vmem>>, vector<2x1x16x32xf32>
    tpu.vector_store %arg10[%c0_3, %c9, %c0_4, %c0_5], %0 {strides = array<i32>} : memref<2x10x16x32xf32, #tpu.memory_space<vmem>>, vector<2x1x16x32xf32>,
    %cst_6 = arith.constant 0.000000e+00 : f32
    %3 = vector.broadcast %cst_6 : f32 to vector<2x10x1x32xf32>
    %c0_7 = arith.constant 0 : index
    %c0_8 = arith.constant 0 : index
    %c0_9 = arith.constant 0 : index
    %c0_10 = arith.constant 0 : index
    %4 = vector.load %arg10[%c0_7, %c0_8, %c0_9, %c0_10] : memref<2x10x16x32xf32, #tpu.memory_space<vmem>>, vector<2x10x1x32xf32>
    tpu.vector_store %arg10[%c0_7, %c0_8, %c0_9, %c0_10], %3 {strides = array<i32>} : memref<2x10x16x32xf32, #tpu.memory_space<vmem>>, vector<2x10x1x32xf32>,
    %c0_11 = arith.constant 0 : index
    %c0_12 = arith.constant 0 : index
    %c9_13 = arith.constant 9 : index
    %c0_14 = arith.constant 0 : index
    %5 = vector.load %arg10[%c0_11, %c0_12, %c9_13, %c0_14] : memref<2x10x16x32xf32, #tpu.memory_space<vmem>>, vector<2x10x1x32xf32>
    tpu.vector_store %arg10[%c0_11, %c0_12, %c9_13, %c0_14], %3 {strides = array<i32>} : memref<2x10x16x32xf32, #tpu.memory_space<vmem>>, vector<2x10x1x32xf32>,
    %cst_15 = arith.constant 0.000000e+00 : f32
    %6 = vector.broadcast %cst_15 : f32 to vector<2x1x16x16xf32>
    %c0_16 = arith.constant 0 : index
    %c0_17 = arith.constant 0 : index
    %c0_18 = arith.constant 0 : index
    %c0_19 = arith.constant 0 : index
    %7 = vector.load %arg11[%c0_16, %c0_17, %c0_18, %c0_19] : memref<2x10x16x16xf32, #tpu.memory_space<vmem>>, vector<2x1x16x16xf32>
    tpu.vector_store %arg11[%c0_16, %c0_17, %c0_18, %c0_19], %6 {strides = array<i32>} : memref<2x10x16x16xf32, #tpu.memory_space<vmem>>, vector<2x1x16x16xf32>,
    %c0_20 = arith.constant 0 : index
    %c9_21 = arith.constant 9 : index
    %c0_22 = arith.constant 0 : index
    %c0_23 = arith.constant 0 : index
    %8 = vector.load %arg11[%c0_20, %c9_21, %c0_22, %c0_23] : memref<2x10x16x16xf32, #tpu.memory_space<vmem>>, vector<2x1x16x16xf32>
    tpu.vector_store %arg11[%c0_20, %c9_21, %c0_22, %c0_23], %6 {strides = array<i32>} : memref<2x10x16x16xf32, #tpu.memory_space<vmem>>, vector<2x1x16x16xf32>,
    %cst_24 = arith.constant 0.000000e+00 : f32
    %9 = vector.broadcast %cst_24 : f32 to vector<2x10x1x16xf32>
    %c0_25 = arith.constant 0 : index
    %c0_26 = arith.constant 0 : index
    %c0_27 = arith.constant 0 : index
    %c0_28 = arith.constant 0 : index
    %10 = vector.load %arg11[%c0_25, %c0_26, %c0_27, %c0_28] : memref<2x10x16x16xf32, #tpu.memory_space<vmem>>, vector<2x10x1x16xf32>
    tpu.vector_store %arg11[%c0_25, %c0_26, %c0_27, %c0_28], %9 {strides = array<i32>} : memref<2x10x16x16xf32, #tpu.memory_space<vmem>>, vector<2x10x1x16xf32>,
    %c0_29 = arith.constant 0 : index
    %c0_30 = arith.constant 0 : index
    %c9_31 = arith.constant 9 : index
    %c0_32 = arith.constant 0 : index
    %11 = vector.load %arg11[%c0_29, %c0_30, %c9_31, %c0_32] : memref<2x10x16x16xf32, #tpu.memory_space<vmem>>, vector<2x10x1x16xf32>
    tpu.vector_store %arg11[%c0_29, %c0_30, %c9_31, %c0_32], %9 {strides = array<i32>} : memref<2x10x16x16xf32, #tpu.memory_space<vmem>>, vector<2x10x1x16xf32>,
    %c0_33 = arith.constant 0 : index
    %c0_34 = arith.constant 0 : index
    %c0_35 = arith.constant 0 : index
    %c0_36 = arith.constant 0 : index
    %12 = vector.load %arg1[%c0_33, %c0_34, %c0_35, %c0_36] : memref<2x8x8x8xf32, #tpu.memory_space<vmem>>, vector<2x8x8x8xf32>
    %13 = vector.shape_cast %12 : vector<2x8x8x8xf32> to vector<128x8xf32>
    %c0_37 = arith.constant 0 : index
    %c0_38 = arith.constant 0 : index
    %14 = vector.load %arg3[%c0_37, %c0_38] : memref<8x16xf32, #tpu.memory_space<vmem>>, vector<8x16xf32>
    %cst_39 = arith.constant dense<0.000000e+00> : vector<128x16xf32>
    %15 = tpu.matmul %13, %14, %cst_39 {dimension_numbers = #tpu.dot_dimension_numbers<[1], [0], [0], [1], [0, 0, 1, 1], [], []>} : vector<128x8xf32>, vector<8x16xf32>, vector<128x16xf32> -> vector<128x16xf32>
    %c0_40 = arith.constant 0 : index
    %c0_41 = arith.constant 0 : index
    %16 = vector.load %arg4[%c0_40, %c0_41] : memref<1x16xf32, #tpu.memory_space<vmem>>, vector<1x16xf32>
    %17 = vector.broadcast %16 : vector<1x16xf32> to vector<128x16xf32>
    %18 = arith.addf %15, %17 : vector<128x16xf32>
    %19 = vector.shape_cast %18 : vector<128x16xf32> to vector<2x8x8x16xf32>
    %c0_42 = arith.constant 0 : index
    %c0_43 = arith.constant 0 : index
    %c0_44 = arith.constant 0 : index
    %c0_45 = arith.constant 0 : index
    %20 = vector.load %arg2[%c0_42, %c0_43, %c0_44, %c0_45] : memref<2x8x8x16xf32, #tpu.memory_space<vmem>>, vector<2x8x8x16xf32>
    %21 = tpu.concatenate %19, %20 in 3 : vector<2x8x8x16xf32>, vector<2x8x8x16xf32> -> vector<2x8x8x32xf32>
    %c0_46 = arith.constant 0 : index
    %c1 = arith.constant 1 : index
    %c1_47 = arith.constant 1 : index
    %c0_48 = arith.constant 0 : index
    %22 = vector.load %arg10[%c0_46, %c1, %c1_47, %c0_48] : memref<2x10x16x32xf32, #tpu.memory_space<vmem>>, vector<2x8x8x32xf32>
    tpu.vector_store %arg10[%c0_46, %c1, %c1_47, %c0_48], %21 {strides = array<i32>} : memref<2x10x16x32xf32, #tpu.memory_space<vmem>>, vector<2x8x8x32xf32>,
    %c0_49 = arith.constant 0 : index
    %c0_50 = arith.constant 0 : index
    %23 = vector.load %arg6[%c0_49, %c0_50] : memref<1x16xf32, #tpu.memory_space<vmem>>, vector<1x16xf32>
    %c0_51 = arith.constant 0 : index
    %c0_52 = arith.constant 0 : index
    %c0_53 = arith.constant 0 : index
    %c0_54 = arith.constant 0 : index
    %24 = vector.load %arg10[%c0_51, %c0_52, %c0_53, %c0_54] : memref<2x10x16x32xf32, #tpu.memory_space<vmem>>, vector<2x10x8x32xf32>
    %c0_55 = arith.constant 0 : index
    %c0_56 = arith.constant 0 : index
    %c1_57 = arith.constant 1 : index
    %c0_58 = arith.constant 0 : index
    %25 = vector.load %arg10[%c0_55, %c0_56, %c1_57, %c0_58] : memref<2x10x16x32xf32, #tpu.memory_space<vmem>>, vector<2x10x8x32xf32>
    %c0_59 = arith.constant 0 : index
    %c0_60 = arith.constant 0 : index
    %c2 = arith.constant 2 : index
    %c0_61 = arith.constant 0 : index
    %26 = vector.load %arg10[%c0_59, %c0_60, %c2, %c0_61] : memref<2x10x16x32xf32, #tpu.memory_space<vmem>>, vector<2x10x8x32xf32>
    %27 = tpu.concatenate %24, %25, %26 in 3 : vector<2x10x8x32xf32>, vector<2x10x8x32xf32>, vector<2x10x8x32xf32> -> vector<2x10x8x96xf32>
    %cst_62 = arith.constant 0.000000e+00 : f32
    %28 = vector.broadcast %cst_62 : f32 to vector<128x16xf32>
    %29 = vector.extract_strided_slice %27 {offsets = [0, 0, 0, 0], sizes = [2, 8, 8, 96], strides = [1, 1, 1, 1]} : vector<2x10x8x96xf32> to vector<2x8x8x96xf32>
    %30 = vector.shape_cast %29 : vector<2x8x8x96xf32> to vector<128x96xf32>
    %c0_63 = arith.constant 0 : index
    %c0_64 = arith.constant 0 : index
    %c0_65 = arith.constant 0 : index
    %31 = vector.load %arg5[%c0_63, %c0_64, %c0_65] : memref<3x96x16xf32, #tpu.memory_space<vmem>>, vector<1x96x16xf32>
    %32 = vector.shape_cast %31 : vector<1x96x16xf32> to vector<96x16xf32>
    %cst_66 = arith.constant dense<0.000000e+00> : vector<128x16xf32>
    %33 = tpu.matmul %30, %32, %cst_66 {dimension_numbers = #tpu.dot_dimension_numbers<[1], [0], [0], [1], [0, 0, 1, 1], [], []>} : vector<128x96xf32>, vector<96x16xf32>, vector<128x16xf32> -> vector<128x16xf32>
    %34 = arith.addf %28, %33 : vector<128x16xf32>
    %35 = vector.extract_strided_slice %27 {offsets = [0, 1, 0, 0], sizes = [2, 8, 8, 96], strides = [1, 1, 1, 1]} : vector<2x10x8x96xf32> to vector<2x8x8x96xf32>
    %36 = vector.shape_cast %35 : vector<2x8x8x96xf32> to vector<128x96xf32>
    %c1_67 = arith.constant 1 : index
    %c0_68 = arith.constant 0 : index
    %c0_69 = arith.constant 0 : index
    %37 = vector.load %arg5[%c1_67, %c0_68, %c0_69] : memref<3x96x16xf32, #tpu.memory_space<vmem>>, vector<1x96x16xf32>
    %38 = vector.shape_cast %37 : vector<1x96x16xf32> to vector<96x16xf32>
    %cst_70 = arith.constant dense<0.000000e+00> : vector<128x16xf32>
    %39 = tpu.matmul %36, %38, %cst_70 {dimension_numbers = #tpu.dot_dimension_numbers<[1], [0], [0], [1], [0, 0, 1, 1], [], []>} : vector<128x96xf32>, vector<96x16xf32>, vector<128x16xf32> -> vector<128x16xf32>
    %40 = arith.addf %34, %39 : vector<128x16xf32>
    %41 = vector.extract_strided_slice %27 {offsets = [0, 2, 0, 0], sizes = [2, 8, 8, 96], strides = [1, 1, 1, 1]} : vector<2x10x8x96xf32> to vector<2x8x8x96xf32>
    %42 = vector.shape_cast %41 : vector<2x8x8x96xf32> to vector<128x96xf32>
    %c2_71 = arith.constant 2 : index
    %c0_72 = arith.constant 0 : index
    %c0_73 = arith.constant 0 : index
    %43 = vector.load %arg5[%c2_71, %c0_72, %c0_73] : memref<3x96x16xf32, #tpu.memory_space<vmem>>, vector<1x96x16xf32>
    %44 = vector.shape_cast %43 : vector<1x96x16xf32> to vector<96x16xf32>
    %cst_74 = arith.constant dense<0.000000e+00> : vector<128x16xf32>
    %45 = tpu.matmul %42, %44, %cst_74 {dimension_numbers = #tpu.dot_dimension_numbers<[1], [0], [0], [1], [0, 0, 1, 1], [], []>} : vector<128x96xf32>, vector<96x16xf32>, vector<128x16xf32> -> vector<128x16xf32>
    %46 = arith.addf %40, %45 : vector<128x16xf32>
    %47 = vector.broadcast %23 : vector<1x16xf32> to vector<128x16xf32>
    %48 = arith.addf %46, %47 : vector<128x16xf32>
    %cst_75 = arith.constant 0.000000e+00 : f32
    %49 = vector.broadcast %cst_75 : f32 to vector<128x16xf32>
    %50 = arith.maximumf %48, %49 : vector<128x16xf32>
    %51 = vector.shape_cast %50 : vector<128x16xf32> to vector<2x8x8x16xf32>
    %c0_76 = arith.constant 0 : index
    %c1_77 = arith.constant 1 : index
    %c1_78 = arith.constant 1 : index
    %c0_79 = arith.constant 0 : index
    %52 = vector.load %arg11[%c0_76, %c1_77, %c1_78, %c0_79] : memref<2x10x16x16xf32, #tpu.memory_space<vmem>>, vector<2x8x8x16xf32>
    tpu.vector_store %arg11[%c0_76, %c1_77, %c1_78, %c0_79], %51 {strides = array<i32>} : memref<2x10x16x16xf32, #tpu.memory_space<vmem>>, vector<2x8x8x16xf32>,
    %c0_80 = arith.constant 0 : index
    %c0_81 = arith.constant 0 : index
    %53 = vector.load %arg8[%c0_80, %c0_81] : memref<1x16xf32, #tpu.memory_space<vmem>>, vector<1x16xf32>
    %c0_82 = arith.constant 0 : index
    %c0_83 = arith.constant 0 : index
    %c0_84 = arith.constant 0 : index
    %c0_85 = arith.constant 0 : index
    %54 = vector.load %arg11[%c0_82, %c0_83, %c0_84, %c0_85] : memref<2x10x16x16xf32, #tpu.memory_space<vmem>>, vector<2x10x8x16xf32>
    %c0_86 = arith.constant 0 : index
    %c0_87 = arith.constant 0 : index
    %c1_88 = arith.constant 1 : index
    %c0_89 = arith.constant 0 : index
    %55 = vector.load %arg11[%c0_86, %c0_87, %c1_88, %c0_89] : memref<2x10x16x16xf32, #tpu.memory_space<vmem>>, vector<2x10x8x16xf32>
    %c0_90 = arith.constant 0 : index
    %c0_91 = arith.constant 0 : index
    %c2_92 = arith.constant 2 : index
    %c0_93 = arith.constant 0 : index
    %56 = vector.load %arg11[%c0_90, %c0_91, %c2_92, %c0_93] : memref<2x10x16x16xf32, #tpu.memory_space<vmem>>, vector<2x10x8x16xf32>
    %57 = tpu.concatenate %54, %55, %56 in 3 : vector<2x10x8x16xf32>, vector<2x10x8x16xf32>, vector<2x10x8x16xf32> -> vector<2x10x8x48xf32>
    %cst_94 = arith.constant 0.000000e+00 : f32
    %58 = vector.broadcast %cst_94 : f32 to vector<128x16xf32>
    %59 = vector.extract_strided_slice %57 {offsets = [0, 0, 0, 0], sizes = [2, 8, 8, 48], strides = [1, 1, 1, 1]} : vector<2x10x8x48xf32> to vector<2x8x8x48xf32>
    %60 = vector.shape_cast %59 : vector<2x8x8x48xf32> to vector<128x48xf32>
    %c0_95 = arith.constant 0 : index
    %c0_96 = arith.constant 0 : index
    %c0_97 = arith.constant 0 : index
    %61 = vector.load %arg7[%c0_95, %c0_96, %c0_97] : memref<3x48x16xf32, #tpu.memory_space<vmem>>, vector<1x48x16xf32>
    %62 = vector.shape_cast %61 : vector<1x48x16xf32> to vector<48x16xf32>
    %cst_98 = arith.constant dense<0.000000e+00> : vector<128x16xf32>
    %63 = tpu.matmul %60, %62, %cst_98 {dimension_numbers = #tpu.dot_dimension_numbers<[1], [0], [0], [1], [0, 0, 1, 1], [], []>} : vector<128x48xf32>, vector<48x16xf32>, vector<128x16xf32> -> vector<128x16xf32>
    %64 = arith.addf %58, %63 : vector<128x16xf32>
    %65 = vector.extract_strided_slice %57 {offsets = [0, 1, 0, 0], sizes = [2, 8, 8, 48], strides = [1, 1, 1, 1]} : vector<2x10x8x48xf32> to vector<2x8x8x48xf32>
    %66 = vector.shape_cast %65 : vector<2x8x8x48xf32> to vector<128x48xf32>
    %c1_99 = arith.constant 1 : index
    %c0_100 = arith.constant 0 : index
    %c0_101 = arith.constant 0 : index
    %67 = vector.load %arg7[%c1_99, %c0_100, %c0_101] : memref<3x48x16xf32, #tpu.memory_space<vmem>>, vector<1x48x16xf32>
    %68 = vector.shape_cast %67 : vector<1x48x16xf32> to vector<48x16xf32>
    %cst_102 = arith.constant dense<0.000000e+00> : vector<128x16xf32>
    %69 = tpu.matmul %66, %68, %cst_102 {dimension_numbers = #tpu.dot_dimension_numbers<[1], [0], [0], [1], [0, 0, 1, 1], [], []>} : vector<128x48xf32>, vector<48x16xf32>, vector<128x16xf32> -> vector<128x16xf32>
    %70 = arith.addf %64, %69 : vector<128x16xf32>
    %71 = vector.extract_strided_slice %57 {offsets = [0, 2, 0, 0], sizes = [2, 8, 8, 48], strides = [1, 1, 1, 1]} : vector<2x10x8x48xf32> to vector<2x8x8x48xf32>
    %72 = vector.shape_cast %71 : vector<2x8x8x48xf32> to vector<128x48xf32>
    %c2_103 = arith.constant 2 : index
    %c0_104 = arith.constant 0 : index
    %c0_105 = arith.constant 0 : index
    %73 = vector.load %arg7[%c2_103, %c0_104, %c0_105] : memref<3x48x16xf32, #tpu.memory_space<vmem>>, vector<1x48x16xf32>
    %74 = vector.shape_cast %73 : vector<1x48x16xf32> to vector<48x16xf32>
    %cst_106 = arith.constant dense<0.000000e+00> : vector<128x16xf32>
    %75 = tpu.matmul %72, %74, %cst_106 {dimension_numbers = #tpu.dot_dimension_numbers<[1], [0], [0], [1], [0, 0, 1, 1], [], []>} : vector<128x48xf32>, vector<48x16xf32>, vector<128x16xf32> -> vector<128x16xf32>
    %76 = arith.addf %70, %75 : vector<128x16xf32>
    %77 = vector.broadcast %53 : vector<1x16xf32> to vector<128x16xf32>
    %78 = arith.addf %76, %77 : vector<128x16xf32>
    %cst_107 = arith.constant 0.000000e+00 : f32
    %79 = vector.broadcast %cst_107 : f32 to vector<128x16xf32>
    %80 = arith.maximumf %78, %79 : vector<128x16xf32>
    %81 = vector.shape_cast %80 : vector<128x16xf32> to vector<2x8x8x16xf32>
    %c0_108 = arith.constant 0 : index
    %c0_109 = arith.constant 0 : index
    %c0_110 = arith.constant 0 : index
    %c0_111 = arith.constant 0 : index
    %82 = vector.load %arg9[%c0_108, %c0_109, %c0_110, %c0_111] : memref<2x8x8x16xf32, #tpu.memory_space<vmem>>, vector<2x8x8x16xf32>
    tpu.vector_store %arg9[%c0_108, %c0_109, %c0_110, %c0_111], %81 {strides = array<i32>} : memref<2x8x8x16xf32, #tpu.memory_space<vmem>>, vector<2x8x8x16xf32>,
    return
  }
  func.func @transform_0(%arg0: i32) -> (i32, i32, i32, i32) {
    %c0_i32 = arith.constant 0 : i32
    %c0_i32_0 = arith.constant 0 : i32
    %c0_i32_1 = arith.constant 0 : i32
    %c0_i32_2 = arith.constant 0 : i32
    return %arg0, %c0_i32, %c0_i32_0, %c0_i32_1 : i32, i32, i32, i32
  }
  func.func @transform_1(%arg0: i32) -> (i32, i32, i32, i32) {
    %c0_i32 = arith.constant 0 : i32
    %c0_i32_0 = arith.constant 0 : i32
    %c0_i32_1 = arith.constant 0 : i32
    %c0_i32_2 = arith.constant 0 : i32
    return %arg0, %c0_i32, %c0_i32_0, %c0_i32_1 : i32, i32, i32, i32
  }
  func.func @transform_2(%arg0: i32) -> (i32, i32) {
    %c0_i32 = arith.constant 0 : i32
    %c0_i32_0 = arith.constant 0 : i32
    %c0_i32_1 = arith.constant 0 : i32
    return %c0_i32, %c0_i32_0 : i32, i32
  }
  func.func @transform_3(%arg0: i32) -> (i32, i32) {
    %c0_i32 = arith.constant 0 : i32
    %c0_i32_0 = arith.constant 0 : i32
    %c0_i32_1 = arith.constant 0 : i32
    return %c0_i32, %c0_i32_0 : i32, i32
  }
  func.func @transform_4(%arg0: i32) -> (i32, i32, i32) {
    %c0_i32 = arith.constant 0 : i32
    %c0_i32_0 = arith.constant 0 : i32
    %c0_i32_1 = arith.constant 0 : i32
    %c0_i32_2 = arith.constant 0 : i32
    return %c0_i32, %c0_i32_0, %c0_i32_1 : i32, i32, i32
  }
  func.func @transform_5(%arg0: i32) -> (i32, i32) {
    %c0_i32 = arith.constant 0 : i32
    %c0_i32_0 = arith.constant 0 : i32
    %c0_i32_1 = arith.constant 0 : i32
    return %c0_i32, %c0_i32_0 : i32, i32
  }
  func.func @transform_6(%arg0: i32) -> (i32, i32, i32) {
    %c0_i32 = arith.constant 0 : i32
    %c0_i32_0 = arith.constant 0 : i32
    %c0_i32_1 = arith.constant 0 : i32
    %c0_i32_2 = arith.constant 0 : i32
    return %c0_i32, %c0_i32_0, %c0_i32_1 : i32, i32, i32
  }
  func.func @transform_7(%arg0: i32) -> (i32, i32) {
    %c0_i32 = arith.constant 0 : i32
    %c0_i32_0 = arith.constant 0 : i32
    %c0_i32_1 = arith.constant 0 : i32
    return %c0_i32, %c0_i32_0 : i32, i32
  }
  func.func @transform_8(%arg0: i32) -> (i32, i32, i32, i32) {
    %c0_i32 = arith.constant 0 : i32
    %c0_i32_0 = arith.constant 0 : i32
    %c0_i32_1 = arith.constant 0 : i32
    %c0_i32_2 = arith.constant 0 : i32
    return %arg0, %c0_i32, %c0_i32_0, %c0_i32_1 : i32, i32, i32, i32
  }
}

module attributes {stable_mosaic.version = 11 : i64} {
  func.func @_upconv_fused_kernel(%arg0: i32, %arg1: memref<2x8x8x8xf32, #tpu.memory_space<vmem>>, %arg2: memref<2x8x8x16xf32, #tpu.memory_space<vmem>>, %arg3: memref<8x16xf32, #tpu.memory_space<vmem>>, %arg4: memref<1x16xf32, #tpu.memory_space<vmem>>, %arg5: memref<3x96x16xf32, #tpu.memory_space<vmem>>, %arg6: memref<1x16xf32, #tpu.memory_space<vmem>>, %arg7: memref<3x48x16xf32, #tpu.memory_space<vmem>>, %arg8: memref<1x16xf32, #tpu.memory_space<vmem>>, %arg9: memref<2x8x8x16xf32, #tpu.memory_space<vmem>>, %arg10: memref<2x10x16x32xf32, #tpu.memory_space<vmem>>, %arg11: memref<2x10x16x16xf32, #tpu.memory_space<vmem>>) attributes {dimension_semantics = [#tpu.dimension_semantics<parallel>], iteration_bounds = array<i64: 1>, scalar_prefetch = 0 : i64, scratch_operands = 2 : i64, tpu.core_type = #tpu.core_type<tc>, window_params = [{transform_indices = @transform_0, window_bounds = array<i64: 2, 8, 8, 8>}, {transform_indices = @transform_1, window_bounds = array<i64: 2, 8, 8, 16>}, {pipeline_mode = #tpu.pipeline_mode<synchronous>, transform_indices = @transform_2, window_bounds = array<i64: 8, 16>}, {pipeline_mode = #tpu.pipeline_mode<synchronous>, transform_indices = @transform_3, window_bounds = array<i64: 1, 16>}, {pipeline_mode = #tpu.pipeline_mode<synchronous>, transform_indices = @transform_4, window_bounds = array<i64: 3, 96, 16>}, {pipeline_mode = #tpu.pipeline_mode<synchronous>, transform_indices = @transform_5, window_bounds = array<i64: 1, 16>}, {pipeline_mode = #tpu.pipeline_mode<synchronous>, transform_indices = @transform_6, window_bounds = array<i64: 3, 48, 16>}, {pipeline_mode = #tpu.pipeline_mode<synchronous>, transform_indices = @transform_7, window_bounds = array<i64: 1, 16>}, {transform_indices = @transform_8, window_bounds = array<i64: 2, 8, 8, 16>}]} {
    %cst = arith.constant 0.000000e+00 : f32
    %0 = vector.broadcast %cst : f32 to vector<2x1x16x32xf32>
    %c0 = arith.constant 0 : index
    %c0_0 = arith.constant 0 : index
    %c0_1 = arith.constant 0 : index
    %c0_2 = arith.constant 0 : index
    %1 = vector.load %arg10[%c0, %c0_0, %c0_1, %c0_2] : memref<2x10x16x32xf32, #tpu.memory_space<vmem>>, vector<2x1x16x32xf32>
    tpu.vector_store %arg10[%c0, %c0_0, %c0_1, %c0_2], %0 {strides = array<i32>} : memref<2x10x16x32xf32, #tpu.memory_space<vmem>>, vector<2x1x16x32xf32>,
    %c0_3 = arith.constant 0 : index
    %c9 = arith.constant 9 : index
    %c0_4 = arith.constant 0 : index
    %c0_5 = arith.constant 0 : index
    %2 = vector.load %arg10[%c0_3, %c9, %c0_4, %c0_5] : memref<2x10x16x32xf32, #tpu.memory_space<vmem>>, vector<2x1x16x32xf32>
    tpu.vector_store %arg10[%c0_3, %c9, %c0_4, %c0_5], %0 {strides = array<i32>} : memref<2x10x16x32xf32, #tpu.memory_space<vmem>>, vector<2x1x16x32xf32>,
    %cst_6 = arith.constant 0.000000e+00 : f32
    %3 = vector.broadcast %cst_6 : f32 to vector<2x10x1x32xf32>
    %c0_7 = arith.constant 0 : index
    %c0_8 = arith.constant 0 : index
    %c0_9 = arith.constant 0 : index
    %c0_10 = arith.constant 0 : index
    %4 = vector.load %arg10[%c0_7, %c0_8, %c0_9, %c0_10] : memref<2x10x16x32xf32, #tpu.memory_space<vmem>>, vector<2x10x1x32xf32>
    tpu.vector_store %arg10[%c0_7, %c0_8, %c0_9, %c0_10], %3 {strides = array<i32>} : memref<2x10x16x32xf32, #tpu.memory_space<vmem>>, vector<2x10x1x32xf32>,
    %c0_11 = arith.constant 0 : index
    %c0_12 = arith.constant 0 : index
    %c9_13 = arith.constant 9 : index
    %c0_14 = arith.constant 0 : index
    %5 = vector.load %arg10[%c0_11, %c0_12, %c9_13, %c0_14] : memref<2x10x16x32xf32, #tpu.memory_space<vmem>>, vector<2x10x1x32xf32>
    tpu.vector_store %arg10[%c0_11, %c0_12, %c9_13, %c0_14], %3 {strides = array<i32>} : memref<2x10x16x32xf32, #tpu.memory_space<vmem>>, vector<2x10x1x32xf32>,
    %cst_15 = arith.constant 0.000000e+00 : f32
    %6 = vector.broadcast %cst_15 : f32 to vector<2x1x16x16xf32>
    %c0_16 = arith.constant 0 : index
    %c0_17 = arith.constant 0 : index
    %c0_18 = arith.constant 0 : index
    %c0_19 = arith.constant 0 : index
    %7 = vector.load %arg11[%c0_16, %c0_17, %c0_18, %c0_19] : memref<2x10x16x16xf32, #tpu.memory_space<vmem>>, vector<2x1x16x16xf32>
    tpu.vector_store %arg11[%c0_16, %c0_17, %c0_18, %c0_19], %6 {strides = array<i32>} : memref<2x10x16x16xf32, #tpu.memory_space<vmem>>, vector<2x1x16x16xf32>,
    %c0_20 = arith.constant 0 : index
    %c9_21 = arith.constant 9 : index
    %c0_22 = arith.constant 0 : index
    %c0_23 = arith.constant 0 : index
    %8 = vector.load %arg11[%c0_20, %c9_21, %c0_22, %c0_23] : memref<2x10x16x16xf32, #tpu.memory_space<vmem>>, vector<2x1x16x16xf32>
    tpu.vector_store %arg11[%c0_20, %c9_21, %c0_22, %c0_23], %6 {strides = array<i32>} : memref<2x10x16x16xf32, #tpu.memory_space<vmem>>, vector<2x1x16x16xf32>,
    %cst_24 = arith.constant 0.000000e+00 : f32
    %9 = vector.broadcast %cst_24 : f32 to vector<2x10x1x16xf32>
    %c0_25 = arith.constant 0 : index
    %c0_26 = arith.constant 0 : index
    %c0_27 = arith.constant 0 : index
    %c0_28 = arith.constant 0 : index
    %10 = vector.load %arg11[%c0_25, %c0_26, %c0_27, %c0_28] : memref<2x10x16x16xf32, #tpu.memory_space<vmem>>, vector<2x10x1x16xf32>
    tpu.vector_store %arg11[%c0_25, %c0_26, %c0_27, %c0_28], %9 {strides = array<i32>} : memref<2x10x16x16xf32, #tpu.memory_space<vmem>>, vector<2x10x1x16xf32>,
    %c0_29 = arith.constant 0 : index
    %c0_30 = arith.constant 0 : index
    %c9_31 = arith.constant 9 : index
    %c0_32 = arith.constant 0 : index
    %11 = vector.load %arg11[%c0_29, %c0_30, %c9_31, %c0_32] : memref<2x10x16x16xf32, #tpu.memory_space<vmem>>, vector<2x10x1x16xf32>
    tpu.vector_store %arg11[%c0_29, %c0_30, %c9_31, %c0_32], %9 {strides = array<i32>} : memref<2x10x16x16xf32, #tpu.memory_space<vmem>>, vector<2x10x1x16xf32>,
    %c0_33 = arith.constant 0 : index
    %c0_34 = arith.constant 0 : index
    %c0_35 = arith.constant 0 : index
    %c0_36 = arith.constant 0 : index
    %12 = vector.load %arg1[%c0_33, %c0_34, %c0_35, %c0_36] : memref<2x8x8x8xf32, #tpu.memory_space<vmem>>, vector<2x8x8x8xf32>
    %13 = vector.shape_cast %12 : vector<2x8x8x8xf32> to vector<128x8xf32>
    %c0_37 = arith.constant 0 : index
    %c0_38 = arith.constant 0 : index
    %14 = vector.load %arg3[%c0_37, %c0_38] : memref<8x16xf32, #tpu.memory_space<vmem>>, vector<8x16xf32>
    %cst_39 = arith.constant dense<0.000000e+00> : vector<128x16xf32>
    %15 = tpu.matmul %13, %14, %cst_39 {dimension_numbers = #tpu.dot_dimension_numbers<[1], [0], [0], [1], [0, 0, 1, 1], [], []>} : vector<128x8xf32>, vector<8x16xf32>, vector<128x16xf32> -> vector<128x16xf32>
    %c0_40 = arith.constant 0 : index
    %c0_41 = arith.constant 0 : index
    %16 = vector.load %arg4[%c0_40, %c0_41] : memref<1x16xf32, #tpu.memory_space<vmem>>, vector<1x16xf32>
    %17 = vector.broadcast %16 : vector<1x16xf32> to vector<128x16xf32>
    %18 = arith.addf %15, %17 : vector<128x16xf32>
    %19 = vector.shape_cast %18 : vector<128x16xf32> to vector<2x8x8x16xf32>
    %c0_42 = arith.constant 0 : index
    %c0_43 = arith.constant 0 : index
    %c0_44 = arith.constant 0 : index
    %c0_45 = arith.constant 0 : index
    %20 = vector.load %arg2[%c0_42, %c0_43, %c0_44, %c0_45] : memref<2x8x8x16xf32, #tpu.memory_space<vmem>>, vector<2x8x8x16xf32>
    %21 = tpu.concatenate %19, %20 in 3 : vector<2x8x8x16xf32>, vector<2x8x8x16xf32> -> vector<2x8x8x32xf32>
    %c0_46 = arith.constant 0 : index
    %c1 = arith.constant 1 : index
    %c1_47 = arith.constant 1 : index
    %c0_48 = arith.constant 0 : index
    %22 = vector.load %arg10[%c0_46, %c1, %c1_47, %c0_48] : memref<2x10x16x32xf32, #tpu.memory_space<vmem>>, vector<2x8x8x32xf32>
    tpu.vector_store %arg10[%c0_46, %c1, %c1_47, %c0_48], %21 {strides = array<i32>} : memref<2x10x16x32xf32, #tpu.memory_space<vmem>>, vector<2x8x8x32xf32>,
    %c0_49 = arith.constant 0 : index
    %c0_50 = arith.constant 0 : index
    %23 = vector.load %arg6[%c0_49, %c0_50] : memref<1x16xf32, #tpu.memory_space<vmem>>, vector<1x16xf32>
    %c0_51 = arith.constant 0 : index
    %c0_52 = arith.constant 0 : index
    %c0_53 = arith.constant 0 : index
    %c0_54 = arith.constant 0 : index
    %24 = vector.load %arg10[%c0_51, %c0_52, %c0_53, %c0_54] : memref<2x10x16x32xf32, #tpu.memory_space<vmem>>, vector<2x10x8x32xf32>
    %c0_55 = arith.constant 0 : index
    %c0_56 = arith.constant 0 : index
    %c1_57 = arith.constant 1 : index
    %c0_58 = arith.constant 0 : index
    %25 = vector.load %arg10[%c0_55, %c0_56, %c1_57, %c0_58] : memref<2x10x16x32xf32, #tpu.memory_space<vmem>>, vector<2x10x8x32xf32>
    %c0_59 = arith.constant 0 : index
    %c0_60 = arith.constant 0 : index
    %c2 = arith.constant 2 : index
    %c0_61 = arith.constant 0 : index
    %26 = vector.load %arg10[%c0_59, %c0_60, %c2, %c0_61] : memref<2x10x16x32xf32, #tpu.memory_space<vmem>>, vector<2x10x8x32xf32>
    %27 = tpu.concatenate %24, %25, %26 in 3 : vector<2x10x8x32xf32>, vector<2x10x8x32xf32>, vector<2x10x8x32xf32> -> vector<2x10x8x96xf32>
    %cst_62 = arith.constant 0.000000e+00 : f32
    %28 = vector.broadcast %cst_62 : f32 to vector<128x16xf32>
    %29 = vector.extract_strided_slice %27 {offsets = [0, 0, 0, 0], sizes = [2, 8, 8, 96], strides = [1, 1, 1, 1]} : vector<2x10x8x96xf32> to vector<2x8x8x96xf32>
    %30 = vector.shape_cast %29 : vector<2x8x8x96xf32> to vector<128x96xf32>
    %c0_63 = arith.constant 0 : index
    %c0_64 = arith.constant 0 : index
    %c0_65 = arith.constant 0 : index
    %31 = vector.load %arg5[%c0_63, %c0_64, %c0_65] : memref<3x96x16xf32, #tpu.memory_space<vmem>>, vector<1x96x16xf32>
    %32 = vector.shape_cast %31 : vector<1x96x16xf32> to vector<96x16xf32>
    %cst_66 = arith.constant dense<0.000000e+00> : vector<128x16xf32>
    %33 = tpu.matmul %30, %32, %cst_66 {dimension_numbers = #tpu.dot_dimension_numbers<[1], [0], [0], [1], [0, 0, 1, 1], [], []>} : vector<128x96xf32>, vector<96x16xf32>, vector<128x16xf32> -> vector<128x16xf32>
    %34 = arith.addf %28, %33 : vector<128x16xf32>
    %35 = vector.extract_strided_slice %27 {offsets = [0, 1, 0, 0], sizes = [2, 8, 8, 96], strides = [1, 1, 1, 1]} : vector<2x10x8x96xf32> to vector<2x8x8x96xf32>
    %36 = vector.shape_cast %35 : vector<2x8x8x96xf32> to vector<128x96xf32>
    %c1_67 = arith.constant 1 : index
    %c0_68 = arith.constant 0 : index
    %c0_69 = arith.constant 0 : index
    %37 = vector.load %arg5[%c1_67, %c0_68, %c0_69] : memref<3x96x16xf32, #tpu.memory_space<vmem>>, vector<1x96x16xf32>
    %38 = vector.shape_cast %37 : vector<1x96x16xf32> to vector<96x16xf32>
    %cst_70 = arith.constant dense<0.000000e+00> : vector<128x16xf32>
    %39 = tpu.matmul %36, %38, %cst_70 {dimension_numbers = #tpu.dot_dimension_numbers<[1], [0], [0], [1], [0, 0, 1, 1], [], []>} : vector<128x96xf32>, vector<96x16xf32>, vector<128x16xf32> -> vector<128x16xf32>
    %40 = arith.addf %34, %39 : vector<128x16xf32>
    %41 = vector.extract_strided_slice %27 {offsets = [0, 2, 0, 0], sizes = [2, 8, 8, 96], strides = [1, 1, 1, 1]} : vector<2x10x8x96xf32> to vector<2x8x8x96xf32>
    %42 = vector.shape_cast %41 : vector<2x8x8x96xf32> to vector<128x96xf32>
    %c2_71 = arith.constant 2 : index
    %c0_72 = arith.constant 0 : index
    %c0_73 = arith.constant 0 : index
    %43 = vector.load %arg5[%c2_71, %c0_72, %c0_73] : memref<3x96x16xf32, #tpu.memory_space<vmem>>, vector<1x96x16xf32>
    %44 = vector.shape_cast %43 : vector<1x96x16xf32> to vector<96x16xf32>
    %cst_74 = arith.constant dense<0.000000e+00> : vector<128x16xf32>
    %45 = tpu.matmul %42, %44, %cst_74 {dimension_numbers = #tpu.dot_dimension_numbers<[1], [0], [0], [1], [0, 0, 1, 1], [], []>} : vector<128x96xf32>, vector<96x16xf32>, vector<128x16xf32> -> vector<128x16xf32>
    %46 = arith.addf %40, %45 : vector<128x16xf32>
    %47 = vector.broadcast %23 : vector<1x16xf32> to vector<128x16xf32>
    %48 = arith.addf %46, %47 : vector<128x16xf32>
    %cst_75 = arith.constant 0.000000e+00 : f32
    %49 = vector.broadcast %cst_75 : f32 to vector<128x16xf32>
    %50 = arith.maximumf %48, %49 : vector<128x16xf32>
    %51 = vector.shape_cast %50 : vector<128x16xf32> to vector<2x8x8x16xf32>
    %c0_76 = arith.constant 0 : index
    %c1_77 = arith.constant 1 : index
    %c1_78 = arith.constant 1 : index
    %c0_79 = arith.constant 0 : index
    %52 = vector.load %arg11[%c0_76, %c1_77, %c1_78, %c0_79] : memref<2x10x16x16xf32, #tpu.memory_space<vmem>>, vector<2x8x8x16xf32>
    tpu.vector_store %arg11[%c0_76, %c1_77, %c1_78, %c0_79], %51 {strides = array<i32>} : memref<2x10x16x16xf32, #tpu.memory_space<vmem>>, vector<2x8x8x16xf32>,
    %c0_80 = arith.constant 0 : index
    %c0_81 = arith.constant 0 : index
    %53 = vector.load %arg8[%c0_80, %c0_81] : memref<1x16xf32, #tpu.memory_space<vmem>>, vector<1x16xf32>
    %c0_82 = arith.constant 0 : index
    %c0_83 = arith.constant 0 : index
    %c0_84 = arith.constant 0 : index
    %c0_85 = arith.constant 0 : index
    %54 = vector.load %arg11[%c0_82, %c0_83, %c0_84, %c0_85] : memref<2x10x16x16xf32, #tpu.memory_space<vmem>>, vector<2x10x8x16xf32>
    %c0_86 = arith.constant 0 : index
    %c0_87 = arith.constant 0 : index
    %c1_88 = arith.constant 1 : index
    %c0_89 = arith.constant 0 : index
    %55 = vector.load %arg11[%c0_86, %c0_87, %c1_88, %c0_89] : memref<2x10x16x16xf32, #tpu.memory_space<vmem>>, vector<2x10x8x16xf32>
    %c0_90 = arith.constant 0 : index
    %c0_91 = arith.constant 0 : index
    %c2_92 = arith.constant 2 : index
    %c0_93 = arith.constant 0 : index
    %56 = vector.load %arg11[%c0_90, %c0_91, %c2_92, %c0_93] : memref<2x10x16x16xf32, #tpu.memory_space<vmem>>, vector<2x10x8x16xf32>
    %57 = tpu.concatenate %54, %55, %56 in 3 : vector<2x10x8x16xf32>, vector<2x10x8x16xf32>, vector<2x10x8x16xf32> -> vector<2x10x8x48xf32>
    %cst_94 = arith.constant 0.000000e+00 : f32
    %58 = vector.broadcast %cst_94 : f32 to vector<128x16xf32>
    %59 = vector.extract_strided_slice %57 {offsets = [0, 0, 0, 0], sizes = [2, 8, 8, 48], strides = [1, 1, 1, 1]} : vector<2x10x8x48xf32> to vector<2x8x8x48xf32>
    %60 = vector.shape_cast %59 : vector<2x8x8x48xf32> to vector<128x48xf32>
    %c0_95 = arith.constant 0 : index
    %c0_96 = arith.constant 0 : index
    %c0_97 = arith.constant 0 : index
    %61 = vector.load %arg7[%c0_95, %c0_96, %c0_97] : memref<3x48x16xf32, #tpu.memory_space<vmem>>, vector<1x48x16xf32>
    %62 = vector.shape_cast %61 : vector<1x48x16xf32> to vector<48x16xf32>
    %cst_98 = arith.constant dense<0.000000e+00> : vector<128x16xf32>
    %63 = tpu.matmul %60, %62, %cst_98 {dimension_numbers = #tpu.dot_dimension_numbers<[1], [0], [0], [1], [0, 0, 1, 1], [], []>} : vector<128x48xf32>, vector<48x16xf32>, vector<128x16xf32> -> vector<128x16xf32>
    %64 = arith.addf %58, %63 : vector<128x16xf32>
    %65 = vector.extract_strided_slice %57 {offsets = [0, 1, 0, 0], sizes = [2, 8, 8, 48], strides = [1, 1, 1, 1]} : vector<2x10x8x48xf32> to vector<2x8x8x48xf32>
    %66 = vector.shape_cast %65 : vector<2x8x8x48xf32> to vector<128x48xf32>
    %c1_99 = arith.constant 1 : index
    %c0_100 = arith.constant 0 : index
    %c0_101 = arith.constant 0 : index
    %67 = vector.load %arg7[%c1_99, %c0_100, %c0_101] : memref<3x48x16xf32, #tpu.memory_space<vmem>>, vector<1x48x16xf32>
    %68 = vector.shape_cast %67 : vector<1x48x16xf32> to vector<48x16xf32>
    %cst_102 = arith.constant dense<0.000000e+00> : vector<128x16xf32>
    %69 = tpu.matmul %66, %68, %cst_102 {dimension_numbers = #tpu.dot_dimension_numbers<[1], [0], [0], [1], [0, 0, 1, 1], [], []>} : vector<128x48xf32>, vector<48x16xf32>, vector<128x16xf32> -> vector<128x16xf32>
    %70 = arith.addf %64, %69 : vector<128x16xf32>
    %71 = vector.extract_strided_slice %57 {offsets = [0, 2, 0, 0], sizes = [2, 8, 8, 48], strides = [1, 1, 1, 1]} : vector<2x10x8x48xf32> to vector<2x8x8x48xf32>
    %72 = vector.shape_cast %71 : vector<2x8x8x48xf32> to vector<128x48xf32>
    %c2_103 = arith.constant 2 : index
    %c0_104 = arith.constant 0 : index
    %c0_105 = arith.constant 0 : index
    %73 = vector.load %arg7[%c2_103, %c0_104, %c0_105] : memref<3x48x16xf32, #tpu.memory_space<vmem>>, vector<1x48x16xf32>
    %74 = vector.shape_cast %73 : vector<1x48x16xf32> to vector<48x16xf32>
    %cst_106 = arith.constant dense<0.000000e+00> : vector<128x16xf32>
    %75 = tpu.matmul %72, %74, %cst_106 {dimension_numbers = #tpu.dot_dimension_numbers<[1], [0], [0], [1], [0, 0, 1, 1], [], []>} : vector<128x48xf32>, vector<48x16xf32>, vector<128x16xf32> -> vector<128x16xf32>
    %76 = arith.addf %70, %75 : vector<128x16xf32>
    %77 = vector.broadcast %53 : vector<1x16xf32> to vector<128x16xf32>
    %78 = arith.addf %76, %77 : vector<128x16xf32>
    %cst_107 = arith.constant 0.000000e+00 : f32
    %79 = vector.broadcast %cst_107 : f32 to vector<128x16xf32>
    %80 = arith.maximumf %78, %79 : vector<128x16xf32>
    %81 = vector.shape_cast %80 : vector<128x16xf32> to vector<2x8x8x16xf32>
    %c0_108 = arith.constant 0 : index
    %c0_109 = arith.constant 0 : index
    %c0_110 = arith.constant 0 : index
    %c0_111 = arith.constant 0 : index
    %82 = vector.load %arg9[%c0_108, %c0_109, %c0_110, %c0_111] : memref<2x8x8x16xf32, #tpu.memory_space<vmem>>, vector<2x8x8x16xf32>
    tpu.vector_store %arg9[%c0_108, %c0_109, %c0_110, %c0_111], %81 {strides = array<i32>} : memref<2x8x8x16xf32, #tpu.memory_space<vmem>>, vector<2x8x8x16xf32>,
    return
  }
  func.func @transform_0(%arg0: i32) -> (i32, i32, i32, i32) {
    %c0_i32 = arith.constant 0 : i32
    %c0_i32_0 = arith.constant 0 : i32
    %c0_i32_1 = arith.constant 0 : i32
    %c0_i32_2 = arith.constant 0 : i32
    return %arg0, %c0_i32, %c0_i32_0, %c0_i32_1 : i32, i32, i32, i32
  }
  func.func @transform_1(%arg0: i32) -> (i32, i32, i32, i32) {
    %c0_i32 = arith.constant 0 : i32
    %c0_i32_0 = arith.constant 0 : i32
    %c0_i32_1 = arith.constant 0 : i32
    %c0_i32_2 = arith.constant 0 : i32
    return %arg0, %c0_i32, %c0_i32_0, %c0_i32_1 : i32, i32, i32, i32
  }
  func.func @transform_2(%arg0: i32) -> (i32, i32) {
    %c0_i32 = arith.constant 0 : i32
    %c0_i32_0 = arith.constant 0 : i32
    %c0_i32_1 = arith.constant 0 : i32
    return %c0_i32, %c0_i32_0 : i32, i32
  }
  func.func @transform_3(%arg0: i32) -> (i32, i32) {
    %c0_i32 = arith.constant 0 : i32
    %c0_i32_0 = arith.constant 0 : i32
    %c0_i32_1 = arith.constant 0 : i32
    return %c0_i32, %c0_i32_0 : i32, i32
  }
  func.func @transform_4(%arg0: i32) -> (i32, i32, i32) {
    %c0_i32 = arith.constant 0 : i32
    %c0_i32_0 = arith.constant 0 : i32
    %c0_i32_1 = arith.constant 0 : i32
    %c0_i32_2 = arith.constant 0 : i32
    return %c0_i32, %c0_i32_0, %c0_i32_1 : i32, i32, i32
  }
  func.func @transform_5(%arg0: i32) -> (i32, i32) {
    %c0_i32 = arith.constant 0 : i32
    %c0_i32_0 = arith.constant 0 : i32
    %c0_i32_1 = arith.constant 0 : i32
    return %c0_i32, %c0_i32_0 : i32, i32
  }
  func.func @transform_6(%arg0: i32) -> (i32, i32, i32) {
    %c0_i32 = arith.constant 0 : i32
    %c0_i32_0 = arith.constant 0 : i32
    %c0_i32_1 = arith.constant 0 : i32
    %c0_i32_2 = arith.constant 0 : i32
    return %c0_i32, %c0_i32_0, %c0_i32_1 : i32, i32, i32
  }
  func.func @transform_7(%arg0: i32) -> (i32, i32) {
    %c0_i32 = arith.constant 0 : i32
    %c0_i32_0 = arith.constant 0 : i32
    %c0_i32_1 = arith.constant 0 : i32
    return %c0_i32, %c0_i32_0 : i32, i32
  }
  func.func @transform_8(%arg0: i32) -> (i32, i32, i32, i32) {
    %c0_i32 = arith.constant 0 : i32
    %c0_i32_0 = arith.constant 0 : i32
    %c0_i32_1 = arith.constant 0 : i32
    %c0_i32_2 = arith.constant 0 : i32
    return %arg0, %c0_i32, %c0_i32_0, %c0_i32_1 : i32, i32, i32, i32
  }
}

</mosaic_0001>

<bundles_post_ra>
// kernel: upconv_forward.1
= control target key start
LH: loop header
LB: loop body
LE: loop exit
PB: predicated region body
PF: predicated region fallthrough
CT: control target
= control target key end

     0   :  { %vm152_vm0 = vcmask 64512   ;;  %s1796_s28 = smov 16   ;;  %vm39_vm1 = vcmask 253952   ;;  %vm29_vm2 = vcmask 261120   ;;  %v1797_v30 = vmov 0.0   ;;  %s1799_s27 = smov 32   ;;  %s2839_s2 = inlined_call_operand.vmem [shape: f32[8,16], index: 2, kind: input, shape index: {}]   ;;  %s2840_s0 = inlined_call_operand.vmem [shape: f32[2,8,8,8], index: 0, kind: input, shape index: {}]   ;;  %s2841_s3 = inlined_call_operand.vmem [shape: f32[1,16], index: 3, kind: input, shape index: {}]   ;;  %s2842_s1 = inlined_call_operand.vmem [shape: f32[2,8,8,16], index: 1, kind: input, shape index: {}]   ;;  %s2843_s4 = inlined_call_operand.vmem [shape: f32[3,96,16], index: 4, kind: input, shape index: {}]   ;;  %s2844_s5 = inlined_call_operand.vmem [shape: f32[1,16], index: 5, kind: input, shape index: {}]   ;;  %s2845_s6 = inlined_call_operand.vmem [shape: f32[3,48,16], index: 6, kind: input, shape index: {}]   ;;  %s2846_s7 = inlined_call_operand.vmem [shape: f32[1,16], index: 7, kind: input, shape index: {}]   ;;  %s2847_s8 = inlined_call_operand.vmem [shape: f32[2,8,8,16], index: 8, kind: output, shape index: {}]  }
   0x1   :  { %v147_v0 = vld [vmem:[%s2839_s2] sm:$0xff]  ;;  %v132_v2 = vld [vmem:[%s2840_s0 + $0x8] sm:$0xff]  ;;  %v133_v3 = vld [vmem:[%s2840_s0 + $0x10] sm:$0xff]  ;;  %75 = vst.msk [vmem:[#allocation2 + $0xf9] sm:$0x1] %vm39_vm1, %v1797_v30  ;;  %vm80_vm3 = vcmask 130048  }
   0x2   :  { %v131_v1 = vld [vmem:[%s2840_s0] sm:$0xff]  ;;  %216 = vmatpush.msra.mxu0 %v147_v0  ;;  %v134_v4 = vld [vmem:[%s2840_s0 + $0x18] sm:$0xff]  ;;  %v136_v6 = vld [vmem:[%s2840_s0 + $0x28] sm:$0xff]  ;;  %30 = vst.msk [vmem:[#allocation2] sm:$0xff] %vm29_vm2, %v1797_v30  ;;  %vm620_vm4 = vcmask 523264   ;;  %vm666_vm5 = vcmask 785408  }
   0x3   :  { %1611 = vmatmul.msk.f32.vlgmr.msra.gmra.mxu0 %vm152_vm0, %v131_v1  ;;  %v135_v5 = vld [vmem:[%s2840_s0 + $0x20] sm:$0xff]  ;;  %v137_v7 = vld [vmem:[%s2840_s0 + $0x30] sm:$0xff]  ;;  %v138_v8 = vld [vmem:[%s2840_s0 + $0x38] sm:$0xff]  ;;  %31 = vst.msk [vmem:[#allocation2 + $0x8] sm:$0xff] %vm29_vm2, %v1797_v30  ;;  %vm90_vm6 = vcmask 122880   ;;  %vm1277_vm7 = vcmask 392192  }
   0x4   :  { %v139_v9 = vld [vmem:[%s2840_s0 + $0x40] sm:$0xff]  ;;  %v140_v10 = vld [vmem:[%s2840_s0 + $0x48] sm:$0xff]  ;;  %v141_v12 = vld [vmem:[%s2840_s0 + $0x50] sm:$0xff]  ;;  %32 = vst.msk [vmem:[#allocation2 + $0xa0] sm:$0xff] %vm29_vm2, %v1797_v30 }
   0x5   :  { %v278_v11 = vld [vmem:[%s2842_s1 + $0x60] sm:$0xff]  ;;  %v279_v13 = vld [vmem:[%s2842_s1 + $0x68] sm:$0xff]  ;;  %v142_v14 = vld [vmem:[%s2840_s0 + $0x58] sm:$0xff]  ;;  %33 = vst.msk [vmem:[#allocation2 + $0xa8] sm:$0xff] %vm29_vm2, %v1797_v30 }
   0x6   :  { %322 = vrot.lane.b32.xlu0 %v278_v11, %s1796_s28  ;;  %v280_v15 = vld [vmem:[%s2842_s1 + $0x70] sm:$0xff]  ;;  %v277_v16 = vld [vmem:[%s2842_s1 + $0x58] sm:$0xff]  ;;  %v143_v17 = vld [vmem:[%s2840_s0 + $0x60] sm:$0xff]  ;;  %35 = vst.msk [vmem:[#allocation2 + $0x90] sm:$0xff] %vm29_vm2, %v1797_v30 }
   0x7   :  { %326 = vrot.lane.b32.xlu1 %v280_v15, %s1796_s28  ;;  %320 = vrot.lane.b32.xlu2 %v277_v16, %s1796_s28  ;;  %v281_v18 = vld [vmem:[%s2842_s1 + $0x78] sm:$0xff]  ;;  %v144_v19 = vld [vmem:[%s2840_s0 + $0x68] sm:$0xff]  ;;  %36 = vst.msk [vmem:[#allocation2 + $0x98] sm:$0xff] %vm29_vm2, %v1797_v30 }
   0x8   :  { %v145_v20 = vld [vmem:[%s2840_s0 + $0x70] sm:$0xff]  ;;  %v146_v21 = vld [vmem:[%s2840_s0 + $0x78] sm:$0xff]  ;;  %37 = vst.msk [vmem:[#allocation2 + $0x130] sm:$0xff] %vm29_vm2, %v1797_v30  ;;  %v2011_v34 = vld [vmem:[%s2841_s3] ss:$0 sm:$0xff]  ;;  %s1798_s3 = smov 64  }
   0x9   :  { %38 = vst.msk [vmem:[#allocation2 + $0x138] sm:$0xff] %vm29_vm2, %v1797_v30  ;;  %v267_v52 = vld [vmem:[%s2842_s1 + $0x8] sm:$0xff]  ;;  %v266_v59 = vld [vmem:[%s2842_s1] sm:$0xff]  ;;  %v268_v0 = vld [vmem:[%s2842_s1 + $0x10] sm:$0xff] }
   0xa   :  { %41 = vst.msk [vmem:[#allocation2 + $0x10] sm:$0x1] %vm39_vm1, %v1797_v30  ;;  %v1636_v11 = vld [vmem:[%s2843_s4 + $0xa8] sm:$0xff]  ;;  %v1631_v16 = vld [vmem:[%s2843_s4 + $0x80] sm:$0xff] }
   0xb   :  { %1612 = vmatmul.msk.f32.gmra.mxu0 %vm152_vm0, %v132_v2  ;;  %42 = vst.msk [vmem:[#allocation2 + $0x20] sm:$0x1] %vm39_vm1, %v1797_v30  ;;  %v1632_v15 = vld [vmem:[%s2843_s4 + $0x88] sm:$0xff] }
   0xc   :  { %43 = vst.msk [vmem:[#allocation2 + $0x30] sm:$0x1] %vm39_vm1, %v1797_v30 }
   0xd   :  { %44 = vst.msk [vmem:[#allocation2 + $0x40] sm:$0x1] %vm39_vm1, %v1797_v30 }
   0xe   :  { %324 = vrot.lane.b32.xlu0 %v279_v13, %s1796_s28  ;;  %45 = vst.msk [vmem:[#allocation2 + $0x50] sm:$0x1] %vm39_vm1, %v1797_v30  ;;  %v1634_v13 = vld [vmem:[%s2843_s4 + $0x98] sm:$0xff] }
   0xf   :  { %328 = vrot.lane.b32.xlu1 %v281_v18, %s1796_s28  ;;  %46 = vst.msk [vmem:[#allocation2 + $0x60] sm:$0x1] %vm39_vm1, %v1797_v30  ;;  %v1629_v18 = vld [vmem:[%s2843_s4 + $0x70] sm:$0xff] }
  0x10   :  { %47 = vst.msk [vmem:[#allocation2 + $0x70] sm:$0x1] %vm39_vm1, %v1797_v30 }
  0x11   :  { %48 = vst.msk [vmem:[#allocation2 + $0x80] sm:$0x1] %vm39_vm1, %v1797_v30 }
  0x12   :  { %51 = vst.msk [vmem:[#allocation2 + $0xb0] sm:$0x1] %vm39_vm1, %v1797_v30 }
  0x13   :  { %1613 = vmatmul.msk.f32.gmra.mxu0 %vm152_vm0, %v133_v3  ;;  %52 = vst.msk [vmem:[#allocation2 + $0xc0] sm:$0x1] %vm39_vm1, %v1797_v30  ;;  %v269_v3 = vld [vmem:[%s2842_s1 + $0x18] sm:$0xff] }
  0x14   :  { %53 = vst.msk [vmem:[#allocation2 + $0xd0] sm:$0x1] %vm39_vm1, %v1797_v30 }
  0x15   :  { %54 = vst.msk [vmem:[#allocation2 + $0xe0] sm:$0x1] %vm39_vm1, %v1797_v30 }
  0x16   :  { %55 = vst.msk [vmem:[#allocation2 + $0xf0] sm:$0x1] %vm39_vm1, %v1797_v30 }
  0x17   :  { %56 = vst.msk [vmem:[#allocation2 + $0x100] sm:$0x1] %vm39_vm1, %v1797_v30 }
  0x18   :  { %57 = vst.msk [vmem:[#allocation2 + $0x110] sm:$0x1] %vm39_vm1, %v1797_v30 }
  0x19   :  { %58 = vst.msk [vmem:[#allocation2 + $0x120] sm:$0x1] %vm39_vm1, %v1797_v30 }
  0x1a   :  { %61 = vst.msk [vmem:[#allocation2 + $0x19] sm:$0x1] %vm39_vm1, %v1797_v30 }
  0x1b   :  { %1614 = vmatmul.msk.f32.gmra.mxu0 %vm152_vm0, %v134_v4  ;;  %62 = vst.msk [vmem:[#allocation2 + $0x29] sm:$0x1] %vm39_vm1, %v1797_v30 }
  0x1c   :  { %63 = vst.msk [vmem:[#allocation2 + $0x39] sm:$0x1] %vm39_vm1, %v1797_v30 }
  0x1d   :  { %64 = vst.msk [vmem:[#allocation2 + $0x49] sm:$0x1] %vm39_vm1, %v1797_v30 }
  0x1e   :  { %65 = vst.msk [vmem:[#allocation2 + $0x59] sm:$0x1] %vm39_vm1, %v1797_v30 }
  0x1f   :  { %66 = vst.msk [vmem:[#allocation2 + $0x69] sm:$0x1] %vm39_vm1, %v1797_v30 }
  0x20   :  { %67 = vst.msk [vmem:[#allocation2 + $0x79] sm:$0x1] %vm39_vm1, %v1797_v30 }
  0x21   :  { %68 = vst.msk [vmem:[#allocation2 + $0x89] sm:$0x1] %vm39_vm1, %v1797_v30 }
  0x22   :  { %71 = vst.msk [vmem:[#allocation2 + $0xb9] sm:$0x1] %vm39_vm1, %v1797_v30 }
  0x23   :  { %1615 = vmatmul.msk.f32.gmra.mxu0 %vm152_vm0, %v135_v5  ;;  %72 = vst.msk [vmem:[#allocation2 + $0xc9] sm:$0x1] %vm39_vm1, %v1797_v30  ;;  %v272_v5 = vld [vmem:[%s2842_s1 + $0x30] sm:$0xff] }
  0x24   :  { %73 = vst.msk [vmem:[#allocation2 + $0xd9] sm:$0x1] %vm39_vm1, %v1797_v30 }
  0x25   :  { %74 = vst.msk [vmem:[#allocation2 + $0xe9] sm:$0x1] %vm39_vm1, %v1797_v30 }
  0x26   :  { %76 = vst.msk [vmem:[#allocation2 + $0x109] sm:$0x1] %vm39_vm1, %v1797_v30 }
  0x27   :  { %77 = vst.msk [vmem:[#allocation2 + $0x119] sm:$0x1] %vm39_vm1, %v1797_v30 }
  0x28   :  { %78 = vst.msk [vmem:[#allocation2 + $0x129] sm:$0x1] %vm39_vm1, %v1797_v30 }
  0x29   :  { %81 = vst.msk [vmem:[#allocation3] sm:$0xff] %vm80_vm3, %v1797_v30 }
  0x2a   :  { %82 = vst.msk [vmem:[#allocation3 + $0x8] sm:$0xff] %vm80_vm3, %v1797_v30 }
  0x2b   :  { %1616 = vmatmul.msk.f32.gmra.mxu0 %vm152_vm0, %v136_v6  ;;  %83 = vst.msk [vmem:[#allocation3 + $0xa0] sm:$0xff] %vm80_vm3, %v1797_v30  ;;  %v270_v6 = vld [vmem:[%s2842_s1 + $0x20] sm:$0xff] }
  0x2c   :  { %84 = vst.msk [vmem:[#allocation3 + $0xa8] sm:$0xff] %vm80_vm3, %v1797_v30 }
  0x2d   :  { %86 = vst.msk [vmem:[#allocation3 + $0x90] sm:$0xff] %vm80_vm3, %v1797_v30 }
  0x2e   :  { %87 = vst.msk [vmem:[#allocation3 + $0x98] sm:$0xff] %vm80_vm3, %v1797_v30 }
  0x2f   :  { %88 = vst.msk [vmem:[#allocation3 + $0x130] sm:$0xff] %vm80_vm3, %v1797_v30 }
  0x30   :  { %89 = vst.msk [vmem:[#allocation3 + $0x138] sm:$0xff] %vm80_vm3, %v1797_v30 }
  0x31   :  { %40 = vst.msk [vmem:[#allocation2] sm:$0x1] %vm39_vm1, %v1797_v30 }
  0x32   :  { %49 = vst.msk [vmem:[#allocation2 + $0x90] sm:$0x1] %vm39_vm1, %v1797_v30 }
  0x33   :  { %1617 = vmatmul.msk.f32.gmra.mxu0 %vm152_vm0, %v137_v7  ;;  %50 = vst.msk [vmem:[#allocation2 + $0xa0] sm:$0x1] %vm39_vm1, %v1797_v30  ;;  %v271_v7 = vld [vmem:[%s2842_s1 + $0x28] sm:$0xff] }
  0x34   :  { %59 = vst.msk [vmem:[#allocation2 + $0x130] sm:$0x1] %vm39_vm1, %v1797_v30 }
  0x35   :  { %60 = vst.msk [vmem:[#allocation2 + $0x9] sm:$0x1] %vm39_vm1, %v1797_v30 }
  0x36   :  { %69 = vst.msk [vmem:[#allocation2 + $0x99] sm:$0x1] %vm39_vm1, %v1797_v30 }
  0x37   :  { %70 = vst.msk [vmem:[#allocation2 + $0xa9] sm:$0x1] %vm39_vm1, %v1797_v30 }
  0x38   :  { %79 = vst.msk [vmem:[#allocation2 + $0x139] sm:$0x1] %vm39_vm1, %v1797_v30 }
  0x39   :  { %113 = vst.msk [vmem:[#allocation3 + $0x29] sm:$0x1] %vm90_vm6, %v1797_v30 }
  0x3a   :  { %91 = vst.msk [vmem:[#allocation3] sm:$0x1] %vm90_vm6, %v1797_v30 }
  0x3b   :  { %1618 = vmatmul.msk.f32.gmra.mxu0 %vm152_vm0, %v138_v8  ;;  %v273_v8 = vld [vmem:[%s2842_s1 + $0x38] sm:$0xff]  ;;  %92 = vst.msk [vmem:[#allocation3 + $0x10] sm:$0x1] %vm90_vm6, %v1797_v30 }
  0x3c   :  { %93 = vst.msk [vmem:[#allocation3 + $0x20] sm:$0x1] %vm90_vm6, %v1797_v30 }
  0x3d   :  { %94 = vst.msk [vmem:[#allocation3 + $0x30] sm:$0x1] %vm90_vm6, %v1797_v30 }
  0x3e   :  { %95 = vst.msk [vmem:[#allocation3 + $0x40] sm:$0x1] %vm90_vm6, %v1797_v30 }
  0x3f   :  { %96 = vst.msk [vmem:[#allocation3 + $0x50] sm:$0x1] %vm90_vm6, %v1797_v30 }
  0x40   :  { %97 = vst.msk [vmem:[#allocation3 + $0x60] sm:$0x1] %vm90_vm6, %v1797_v30 }
  0x41   :  { %98 = vst.msk [vmem:[#allocation3 + $0x70] sm:$0x1] %vm90_vm6, %v1797_v30 }
  0x42   :  { %99 = vst.msk [vmem:[#allocation3 + $0x80] sm:$0x1] %vm90_vm6, %v1797_v30 }
  0x43   :  { %1619 = vmatmul.msk.f32.gmra.mxu0 %vm152_vm0, %v139_v9  ;;  %v1638_v9 = vld [vmem:[%s2843_s4 + $0xb8] sm:$0xff]  ;;  %100 = vst.msk [vmem:[#allocation3 + $0x90] sm:$0x1] %vm90_vm6, %v1797_v30 }
  0x44   :  { %1759 = vmatpush.msra.mxu3 %v1638_v9  ;;  %719 = vmatpush.msra.mxu1 %v1638_v9  ;;  %101 = vst.msk [vmem:[#allocation3 + $0xa0] sm:$0x1] %vm90_vm6, %v1797_v30 }
  0x45   :  { %102 = vst.msk [vmem:[#allocation3 + $0xb0] sm:$0x1] %vm90_vm6, %v1797_v30 }
  0x46   :  { %103 = vst.msk [vmem:[#allocation3 + $0xc0] sm:$0x1] %vm90_vm6, %v1797_v30 }
  0x47   :  { %104 = vst.msk [vmem:[#allocation3 + $0xd0] sm:$0x1] %vm90_vm6, %v1797_v30 }
  0x48   :  { %105 = vst.msk [vmem:[#allocation3 + $0xe0] sm:$0x1] %vm90_vm6, %v1797_v30 }
  0x49   :  { %106 = vst.msk [vmem:[#allocation3 + $0xf0] sm:$0x1] %vm90_vm6, %v1797_v30 }
  0x4a   :  { %107 = vst.msk [vmem:[#allocation3 + $0x100] sm:$0x1] %vm90_vm6, %v1797_v30 }
  0x4b   :  { %1620 = vmatmul.msk.f32.gmra.mxu0 %vm152_vm0, %v140_v10  ;;  %v1637_v10 = vld [vmem:[%s2843_s4 + $0xb0] sm:$0xff]  ;;  %108 = vst.msk [vmem:[#allocation3 + $0x110] sm:$0x1] %vm90_vm6, %v1797_v30 }
  0x4c   :  { %1760 = vmatpush.msra.mxu3 %v1637_v10  ;;  %720 = vmatpush.msra.mxu1 %v1637_v10  ;;  %109 = vst.msk [vmem:[#allocation3 + $0x120] sm:$0x1] %vm90_vm6, %v1797_v30 }
  0x4d   :  { %110 = vst.msk [vmem:[#allocation3 + $0x130] sm:$0x1] %vm90_vm6, %v1797_v30 }
  0x4e   :  { %1761 = vmatpush.msra.mxu3 %v1636_v11  ;;  %721 = vmatpush.msra.mxu1 %v1636_v11  ;;  %111 = vst.msk [vmem:[#allocation3 + $0x9] sm:$0x1] %vm90_vm6, %v1797_v30 }
  0x4f   :  { %112 = vst.msk [vmem:[#allocation3 + $0x19] sm:$0x1] %vm90_vm6, %v1797_v30 }
  0x50   :  { %114 = vst.msk [vmem:[#allocation3 + $0x39] sm:$0x1] %vm90_vm6, %v1797_v30 }
  0x51   :  { %115 = vst.msk [vmem:[#allocation3 + $0x49] sm:$0x1] %vm90_vm6, %v1797_v30 }
  0x52   :  { %116 = vst.msk [vmem:[#allocation3 + $0x59] sm:$0x1] %vm90_vm6, %v1797_v30 }
  0x53   :  { %1621 = vmatmul.msk.f32.gmra.mxu0 %vm152_vm0, %v141_v12  ;;  %v1635_v12 = vld [vmem:[%s2843_s4 + $0xa0] sm:$0xff]  ;;  %117 = vst.msk [vmem:[#allocation3 + $0x69] sm:$0x1] %vm90_vm6, %v1797_v30 }
  0x54   :  { %1762 = vmatpush.msra.mxu3 %v1635_v12  ;;  %722 = vmatpush.msra.mxu1 %v1635_v12  ;;  %118 = vst.msk [vmem:[#allocation3 + $0x79] sm:$0x1] %vm90_vm6, %v1797_v30 }
  0x55   :  { %119 = vst.msk [vmem:[#allocation3 + $0x89] sm:$0x1] %vm90_vm6, %v1797_v30 }
  0x56   :  { %1763 = vmatpush.msra.mxu3 %v1634_v13  ;;  %723 = vmatpush.msra.mxu1 %v1634_v13  ;;  %120 = vst.msk [vmem:[#allocation3 + $0x99] sm:$0x1] %vm90_vm6, %v1797_v30 }
  0x57   :  { %121 = vst.msk [vmem:[#allocation3 + $0xa9] sm:$0x1] %vm90_vm6, %v1797_v30 }
  0x58   :  { %122 = vst.msk [vmem:[#allocation3 + $0xb9] sm:$0x1] %vm90_vm6, %v1797_v30 }
  0x59   :  { %123 = vst.msk [vmem:[#allocation3 + $0xc9] sm:$0x1] %vm90_vm6, %v1797_v30 }
  0x5a   :  { %124 = vst.msk [vmem:[#allocation3 + $0xd9] sm:$0x1] %vm90_vm6, %v1797_v30 }
  0x5b   :  { %1622 = vmatmul.msk.f32.gmra.mxu0 %vm152_vm0, %v142_v14  ;;  %v1633_v14 = vld [vmem:[%s2843_s4 + $0x90] sm:$0xff]  ;;  %125 = vst.msk [vmem:[#allocation3 + $0xe9] sm:$0x1] %vm90_vm6, %v1797_v30 }
  0x5c   :  { %1764 = vmatpush.msra.mxu3 %v1633_v14  ;;  %724 = vmatpush.msra.mxu1 %v1633_v14  ;;  %126 = vst.msk [vmem:[#allocation3 + $0xf9] sm:$0x1] %vm90_vm6, %v1797_v30 }
  0x5d   :  { %127 = vst.msk [vmem:[#allocation3 + $0x109] sm:$0x1] %vm90_vm6, %v1797_v30 }
  0x5e   :  { %1765 = vmatpush.msra.mxu3 %v1632_v15  ;;  %725 = vmatpush.msra.mxu1 %v1632_v15  ;;  %128 = vst.msk [vmem:[#allocation3 + $0x119] sm:$0x1] %vm90_vm6, %v1797_v30 }
  0x5f   :  { %129 = vst.msk [vmem:[#allocation3 + $0x129] sm:$0x1] %vm90_vm6, %v1797_v30 }
  0x60   :  { %1766 = vmatpush.msra.mxu3 %v1631_v16  ;;  %726 = vmatpush.msra.mxu1 %v1631_v16  ;;  %130 = vst.msk [vmem:[#allocation3 + $0x139] sm:$0x1] %vm90_vm6, %v1797_v30 }
  0x61   :  { %v321_v36 = vpop.permute.xlu2 %320 }
  0x63   :  { %1623 = vmatmul.msk.f32.gmra.mxu0 %vm152_vm0, %v143_v17  ;;  %v1630_v17 = vld [vmem:[%s2843_s4 + $0x78] sm:$0xff] }
  0x64   :  { %1767 = vmatpush.msra.mxu3 %v1630_v17  ;;  %727 = vmatpush.msra.mxu1 %v1630_v17 }
  0x66   :  { %1768 = vmatpush.msra.mxu3 %v1629_v18  ;;  %728 = vmatpush.msra.mxu1 %v1629_v18 }
  0x6b   :  { %1624 = vmatmul.msk.f32.gmra.mxu0 %vm152_vm0, %v144_v19  ;;  %v1628_v19 = vld [vmem:[%s2843_s4 + $0x68] sm:$0xff] }
  0x6c   :  { %1769 = vmatpush.msra.mxu3 %v1628_v19  ;;  %729 = vmatpush.msra.mxu1 %v1628_v19 }
  0x73   :  { %1625 = vmatmul.msk.f32.gmra.mxu0 %vm152_vm0, %v145_v20  ;;  %v1627_v20 = vld [vmem:[%s2843_s4 + $0x60] sm:$0xff] }
  0x74   :  { %1770 = vmatpush.msra.mxu3 %v1627_v20  ;;  %730 = vmatpush.msra.mxu1 %v1627_v20 }
  0x78   :  { %v323_v39 = vpop.permute.xlu0 %322 }
  0x79   :  { %v327_v49 = vpop.permute.xlu1 %326 }
  0x7b   :  { %1626 = vmatmul.msk.f32.gmra.mxu0 %vm152_vm0, %v146_v21 }
  0x80   :  { %v1932_v22 = vpop.f32.mrf.mxu0  ;;  %v325_v44 = vpop.permute.xlu0 %324 }
  0x81   :  { %v329_v57 = vpop.permute.xlu1 %328 }
  0x88   :  { %v1934_v23 = vpop.f32.mrf.mxu0 }
  0x90   :  { %v1936_v24 = vpop.f32.mrf.mxu0 }
  0x91   :  { %v225_v13 = vadd.f32 %v2011_v34, %v1936_v24  ;;  %v275_v24 = vld [vmem:[%s2842_s1 + $0x48] sm:$0xff] }
  0x98   :  { %v1938_v25 = vpop.f32.mrf.mxu0 }
  0x99   :  { %v228_v20 = vadd.f32 %v2011_v34, %v1938_v25 }
  0xa0   :  { %v1940_v26 = vpop.f32.mrf.mxu0 }
  0xa8   :  { %v1942_v27 = vpop.f32.mrf.mxu0 }
  0xb0   :  { %v1944_v28 = vpop.f32.mrf.mxu0 }
  0xb1   :  { %v237_v25 = vadd.f32 %v2011_v34, %v1944_v28 }
  0xb8   :  { %v1946_v29 = vpop.f32.mrf.mxu0 }
  0xc0   :  { %v1956_v31 = vpop.f32.mrf.mxu0 }
  0xc8   :  { %v1974_v32 = vpop.f32.mrf.mxu0 }
  0xd0   :  { %v1992_v33 = vpop.f32.mrf.mxu0 }
  0xd8   :  { %v251_v35 = vpop.f32.mrf.mxu0 }
  0xd9   :  { %v252_v37 = vadd.f32 %v2011_v34, %v251_v35  ;;  %v400_v35 = vld [vmem:[#allocation2 + $0x1] sm:$0xff] }
  0xdb   :  { %v357_v38 = vsel %vm80_vm3, %v252_v37, %v321_v36  ;;  %v420_v36 = vld [vmem:[#allocation2 + $0x2] sm:$0xff]  ;;  %v652_v37 = vld [vmem:[%s2843_s4 + $0x58] sm:$0xff] }
  0xdc   :  { %374 = vst.msk [vmem:[#allocation2 + $0xe1] sm:$0xff] %vm29_vm2, %v357_v38  ;;  %v651_v38 = vld [vmem:[%s2843_s4 + $0x50] sm:$0xff]  ;;  %1771 = vmatpush.msrb.mxu3 %v652_v37  ;;  %790 = vmatpush.msra.mxu2 %v652_v37 }
  0xde   :  { %1772 = vmatpush.msrb.mxu3 %v651_v38  ;;  %791 = vmatpush.msra.mxu2 %v651_v38 }
  0xe0   :  { %v254_v40 = vpop.f32.mrf.mxu0 }
  0xe1   :  { %v255_v41 = vadd.f32 %v2011_v34, %v254_v40 }
  0xe3   :  { %v358_v42 = vsel %vm80_vm3, %v255_v41, %v323_v39  ;;  %v434_v2 = vld [vmem:[#allocation2 + $0xe2] sm:$0xff] }
  0xe4   :  { %375 = vst.msk [vmem:[#allocation2 + $0xf1] sm:$0xff] %vm29_vm2, %v358_v42  ;;  %v414_v4 = vld [vmem:[#allocation2 + $0xe1] sm:$0xff]  ;;  %v648_v42 = vld [vmem:[%s2843_s4 + $0x38] sm:$0xff] }
  0xe5   :  { %v650_v39 = vld [vmem:[%s2843_s4 + $0x48] sm:$0xff]  ;;  %v649_v41 = vld [vmem:[%s2843_s4 + $0x40] sm:$0xff] }
  0xe6   :  { %1773 = vmatpush.msrb.mxu3 %v650_v39  ;;  %792 = vmatpush.msra.mxu2 %v650_v39  ;;  %v394_v19 = vld [vmem:[#allocation2 + $0xe0] sm:$0xff] }
  0xe8   :  { %v257_v43 = vpop.f32.mrf.mxu0  ;;  %1774 = vmatpush.msrb.mxu3 %v649_v41  ;;  %793 = vmatpush.msra.mxu2 %v649_v41 }
  0xe9   :  { %v258_v45 = vadd.f32 %v2011_v34, %v257_v43  ;;  %v647_v43 = vld [vmem:[%s2843_s4 + $0x30] sm:$0xff] }
  0xea   :  { %1775 = vmatpush.msrb.mxu3 %v648_v42  ;;  %794 = vmatpush.msra.mxu2 %v648_v42 }
  0xeb   :  { %v359_v46 = vsel %vm80_vm3, %v258_v45, %v325_v44  ;;  %v435_v47 = vld [vmem:[#allocation2 + $0xf2] sm:$0xff]  ;;  %v646_v44 = vld [vmem:[%s2843_s4 + $0x28] sm:$0xff] }
  0xec   :  { %v415_v48 = vld [vmem:[#allocation2 + $0xf1] sm:$0xff]  ;;  %376 = vst.msk [vmem:[#allocation2 + $0x101] sm:$0xff] %vm29_vm2, %v359_v46  ;;  %570 = vrot.lane.b32.xlu0 %v435_v47, %s1798_s3  ;;  %1776 = vmatpush.msrb.mxu3 %v647_v43  ;;  %v645_v46 = vld [vmem:[%s2843_s4 + $0x20] sm:$0xff] }
  0xed   :  { %490 = vrot.lane.b32.xlu2 %v415_v48, %s1799_s27  ;;  %795 = vmatpush.msra.mxu2 %v647_v43  ;;  %v644_v47 = vld [vmem:[%s2843_s4 + $0x18] sm:$0xff]  ;;  %v395_v48 = vld [vmem:[#allocation2 + $0xf0] sm:$0xff]  ;;  %v231_v43 = vadd.f32 %v2011_v34, %v1940_v26  ;;  %v240_v26 = vadd.f32 %v2011_v34, %v1946_v29 }
  0xee   :  { %1777 = vmatpush.msrb.mxu3 %v646_v44 }
  0xef   :  { %796 = vmatpush.msra.mxu2 %v646_v44 }
  0xf0   :  { %v260_v50 = vpop.f32.mrf.mxu0  ;;  %1778 = vmatpush.msrb.mxu3 %v645_v46 }
  0xf1   :  { %v261_v51 = vadd.f32 %v2011_v34, %v260_v50  ;;  %797 = vmatpush.msra.mxu2 %v645_v46 }
  0xf2   :  { %1779 = vmatpush.msrb.mxu3 %v644_v47 }
  0xf3   :  { %v416_v53 = vld [vmem:[#allocation2 + $0x101] sm:$0xff]  ;;  %v360_v55 = vsel %vm80_vm3, %v261_v51, %v327_v49  ;;  %v643_v51 = vld [vmem:[%s2843_s4 + $0x10] sm:$0xff]  ;;  %798 = vmatpush.msra.mxu2 %v644_v47 }
  0xf4   :  { %v436_v54 = vld [vmem:[#allocation2 + $0x102] sm:$0xff]  ;;  %492 = vrot.lane.b32.xlu1 %v416_v53, %s1799_s27  ;;  %300 = vrot.lane.b32.xlu0 %v267_v52, %s1796_s28  ;;  %377 = vst.msk [vmem:[#allocation2 + $0x111] sm:$0xff] %vm29_vm2, %v360_v55 }
  0xf5   :  { %572 = vrot.lane.b32.xlu2 %v436_v54, %s1798_s3  ;;  %v642_v53 = vld [vmem:[%s2843_s4 + $0x8] sm:$0xff]  ;;  %799 = vmatpush.msra.mxu2 %v643_v51  ;;  %v641_v55 = vld [vmem:[%s2843_s4] sm:$0xff] }
  0xf6   :  { %1780 = vmatpush.msrb.mxu3 %v643_v51 }
  0xf7   :  { %800 = vmatpush.msra.mxu2 %v642_v53 }
  0xf8   :  { %v263_v56 = vpop.f32.mrf.mxu0  ;;  %1781 = vmatpush.msrb.mxu3 %v642_v53 }
  0xf9   :  { %v264_v58 = vadd.f32 %v2011_v34, %v263_v56  ;;  %801 = vmatpush.msra.mxu2 %v641_v55  ;;  %v222_v56 = vadd.f32 %v2011_v34, %v1934_v23  ;;  %v219_v23 = vadd.f32 %v2011_v34, %v1932_v22 }
  0xfa   :  { %1782 = vmatpush.msrb.mxu3 %v641_v55 }
  0xfb   :  { %v361_v60 = vsel %vm80_vm3, %v264_v58, %v329_v57  ;;  %v417_v61 = vld [vmem:[#allocation2 + $0x111] sm:$0xff]  ;;  %v396_v58 = vld [vmem:[#allocation2 + $0x100] sm:$0xff] }
  0xfc   :  { %378 = vst.msk [vmem:[#allocation2 + $0x121] sm:$0xff] %vm29_vm2, %v361_v60  ;;  %298 = vrot.lane.b32.xlu0 %v266_v59, %s1796_s28  ;;  %v437_v62 = vld [vmem:[#allocation2 + $0x112] sm:$0xff]  ;;  %494 = vrot.lane.b32.xlu1 %v417_v61, %s1799_s27 }
  0xfd   :  { %574 = vrot.lane.b32.xlu2 %v437_v62, %s1798_s3 }
 0x103   :  { %v438_v63 = vld [vmem:[#allocation2 + $0x122] sm:$0xff] }
 0x104   :  { %576 = vrot.lane.b32.xlu0 %v438_v63, %s1798_s3  ;;  %v418_v1 = vld [vmem:[#allocation2 + $0x121] sm:$0xff]  ;;  %302 = vrot.lane.b32.xlu1 %v268_v0, %s1796_s28 }
 0x105   :  { %496 = vrot.lane.b32.xlu2 %v418_v1, %s1799_s27  ;;  %v398_v10 = vld [vmem:[#allocation2 + $0x120] sm:$0xff] }
 0x10c   :  { %568 = vrot.lane.b32.xlu0 %v434_v2, %s1798_s3  ;;  %304 = vrot.lane.b32.xlu1 %v269_v3, %s1796_s28 }
 0x10d   :  { %488 = vrot.lane.b32.xlu2 %v414_v4, %s1799_s27  ;;  %v234_v4 = vadd.f32 %v2011_v34, %v1942_v27 }
 0x114   :  { %310 = vrot.lane.b32.xlu0 %v272_v5, %s1796_s28  ;;  %306 = vrot.lane.b32.xlu1 %v270_v6, %s1796_s28  ;;  %v397_v5 = vld [vmem:[#allocation2 + $0x110] sm:$0xff] }
 0x115   :  { %308 = vrot.lane.b32.xlu2 %v271_v7, %s1796_s28 }
 0x11c   :  { %312 = vrot.lane.b32.xlu0 %v273_v8, %s1796_s28  ;;  %460 = vrot.lane.b32.xlu1 %v400_v35, %s1799_s27 }
 0x11d   :  { %540 = vrot.lane.b32.xlu2 %v420_v36, %s1798_s3 }
 0x147   :  { %v491_v21 = vpop.permute.xlu2 %490 }
 0x148   :  { %v615_v49 = vsel %vm29_vm2, %v395_v48, %v491_v21 }
 0x14f   :  { %v573_v40 = vpop.permute.xlu2 %572 }
 0x157   :  { %v575_v45 = vpop.permute.xlu2 %574 }
 0x15e   :  { %v571_v50 = vpop.permute.xlu0 %570 }
 0x15f   :  { %v2198_v52 = vsel %vm620_vm4, %v615_v49, %v571_v50  ;;  %v497_v54 = vpop.permute.xlu2 %496  ;;  %v276_v49 = vld [vmem:[%s2842_s1 + $0x50] sm:$0xff] }
 0x160   :  { %1651 = vmatmul.msk.f32.vlgmr.msra.gmra.mxu3 %vm666_vm5, %v2198_v52  ;;  %v618_v14 = vsel %vm29_vm2, %v398_v10, %v497_v54  ;;  %v1672_v10 = vld [vmem:[%s2843_s4 + $0xc8] sm:$0xff] }
 0x166   :  { %v493_v57 = vpop.permute.xlu1 %492  ;;  %v301_v59 = vpop.permute.xlu0 %300 }
 0x167   :  { %v616_v60 = vsel %vm29_vm2, %v396_v58, %v493_v57  ;;  %v347_v61 = vsel %vm80_vm3, %v222_v56, %v301_v59  ;;  %v489_v63 = vpop.permute.xlu2 %488  ;;  %v409_v58 = vld [vmem:[#allocation2 + $0x91] sm:$0xff] }
 0x168   :  { %364 = vst.msk [vmem:[#allocation2 + $0x21] sm:$0xff] %vm29_vm2, %v347_v61  ;;  %v2214_v62 = vsel %vm620_vm4, %v616_v60, %v573_v40  ;;  %v614_v21 = vsel %vm29_vm2, %v394_v19, %v489_v63  ;;  %v274_v40 = vld [vmem:[%s2842_s1 + $0x40] sm:$0xff]  ;;  %v429_v59 = vld [vmem:[#allocation2 + $0x92] sm:$0xff]  ;;  %v1680_v63 = vld [vmem:[%s2843_s4 + $0x108] sm:$0xff] }
 0x169   :  { %1652 = vmatmul.msk.f32.gmra.mxu3 %vm666_vm5, %v2214_v62  ;;  %v1682_v60 = vld [vmem:[%s2843_s4 + $0x118] sm:$0xff]  ;;  %v1681_v61 = vld [vmem:[%s2843_s4 + $0x110] sm:$0xff] }
 0x16a   :  { %874 = vmatpush.msra.mxu3 %v1682_v60 }
 0x16c   :  { %875 = vmatpush.msra.mxu3 %v1681_v61 }
 0x16e   :  { %v299_v0 = vpop.permute.xlu0 %298  ;;  %v495_v6 = vpop.permute.xlu1 %494  ;;  %876 = vmatpush.msra.mxu3 %v1680_v63 }
 0x16f   :  { %v346_v1 = vsel %vm80_vm3, %v219_v23, %v299_v0  ;;  %v422_v2 = vld [vmem:[#allocation2 + $0x22] sm:$0xff]  ;;  %v309_v7 = vpop.permute.xlu2 %308  ;;  %v617_v8 = vsel %vm29_vm2, %v397_v5, %v495_v6  ;;  %v1678_v0 = vld [vmem:[%s2843_s4 + $0xf8] sm:$0xff] }
 0x170   :  { %v402_v3 = vld [vmem:[#allocation2 + $0x21] sm:$0xff]  ;;  %363 = vst.msk [vmem:[#allocation2 + $0x11] sm:$0xff] %vm29_vm2, %v346_v1  ;;  %544 = vrot.lane.b32.xlu2 %v422_v2, %s1798_s3  ;;  %v351_v22 = vsel %vm80_vm3, %v234_v4, %v309_v7  ;;  %v2230_v9 = vsel %vm620_vm4, %v617_v8, %v575_v45  ;;  %v1677_v1 = vld [vmem:[%s2843_s4 + $0xf0] sm:$0xff]  ;;  %v1674_v8 = vld [vmem:[%s2843_s4 + $0xd8] sm:$0xff] }
 0x171   :  { %464 = vrot.lane.b32.xlu1 %v402_v3, %s1799_s27  ;;  %368 = vst.msk [vmem:[#allocation2 + $0x61] sm:$0xff] %vm29_vm2, %v351_v22  ;;  %1653 = vmatmul.msk.f32.gmra.mxu3 %vm666_vm5, %v2230_v9  ;;  %v1679_v23 = vld [vmem:[%s2843_s4 + $0x100] sm:$0xff]  ;;  %v1676_v2 = vld [vmem:[%s2843_s4 + $0xe8] sm:$0xff] }
 0x172   :  { %877 = vmatpush.msra.mxu3 %v1679_v23  ;;  %v380_v3 = vld [vmem:[#allocation2] sm:$0xff] }
 0x173   :  { %v1675_v7 = vld [vmem:[%s2843_s4 + $0xe0] sm:$0xff] }
 0x174   :  { %878 = vmatpush.msra.mxu3 %v1678_v0 }
 0x176   :  { %v577_v27 = vpop.permute.xlu0 %576  ;;  %v303_v15 = vpop.permute.xlu1 %302  ;;  %879 = vmatpush.msra.mxu3 %v1677_v1  ;;  %v439_v1 = vld [vmem:[#allocation2 + $0x132] sm:$0xff] }
 0x177   :  { %v421_v11 = vld [vmem:[#allocation2 + $0x12] sm:$0xff]  ;;  %v2240_v16 = vsel %vm620_vm4, %v618_v14, %v577_v27  ;;  %v348_v17 = vsel %vm80_vm3, %v225_v13, %v303_v15  ;;  %v541_v5 = vpop.permute.xlu2 %540  ;;  %v410_v13 = vld [vmem:[#allocation2 + $0xa1] sm:$0xff] }
 0x178   :  { %v401_v12 = vld [vmem:[#allocation2 + $0x11] sm:$0xff]  ;;  %365 = vst.msk [vmem:[#allocation2 + $0x31] sm:$0xff] %vm29_vm2, %v348_v17  ;;  %v406_v29 = vld [vmem:[#allocation2 + $0x61] sm:$0xff]  ;;  %880 = vmatpush.msra.mxu3 %v1676_v2 }
 0x179   :  { %542 = vrot.lane.b32.xlu1 %v421_v11, %s1798_s3  ;;  %462 = vrot.lane.b32.xlu0 %v401_v12, %s1799_s27  ;;  %v426_v54 = vld [vmem:[#allocation2 + $0x62] sm:$0xff]  ;;  %v1673_v27 = vld [vmem:[%s2843_s4 + $0xd0] sm:$0xff] }
 0x17a   :  { %1654 = vmatmul.msk.f32.gmra.mxu3 %vm666_vm5, %v2240_v16  ;;  %v1671_v11 = vld [vmem:[%s2843_s4 + $0xc0] sm:$0xff]  ;;  %v419_v2 = vld [vmem:[#allocation2 + $0x131] sm:$0xff] }
 0x17b   :  { %881 = vmatpush.msra.mxu3 %v1675_v7  ;;  %v430_v15 = vld [vmem:[#allocation2 + $0xa2] sm:$0xff] }
 0x17d   :  { %882 = vmatpush.msra.mxu3 %v1674_v8 }
 0x17e   :  { %v569_v18 = vpop.permute.xlu0 %568  ;;  %v305_v35 = vpop.permute.xlu1 %304 }
 0x17f   :  { %v2254_v36 = vsel %vm620_vm4, %v614_v21, %v569_v18  ;;  %v349_v37 = vsel %vm80_vm3, %v228_v20, %v305_v35  ;;  %v403_v38 = vld [vmem:[#allocation2 + $0x31] sm:$0xff]  ;;  %883 = vmatpush.msra.mxu3 %v1673_v27 }
 0x180   :  { %v423_v39 = vld [vmem:[#allocation2 + $0x32] sm:$0xff]  ;;  %366 = vst.msk [vmem:[#allocation2 + $0x41] sm:$0xff] %vm29_vm2, %v349_v37  ;;  %466 = vrot.lane.b32.xlu2 %v403_v38, %s1799_s27 }
 0x181   :  { %316 = vrot.lane.b32.xlu1 %v275_v24, %s1796_s28  ;;  %546 = vrot.lane.b32.xlu0 %v423_v39, %s1798_s3  ;;  %v382_v24 = vld [vmem:[#allocation2 + $0x20] sm:$0xff]  ;;  %v381_v38 = vld [vmem:[#allocation2 + $0x10] sm:$0xff] }
 0x182   :  { %1667 = vmatmul.msk.f32.vlgmr.msrb.gmra.mxu3 %vm666_vm5, %v2254_v36 }
 0x183   :  { %884 = vmatpush.msra.mxu3 %v1672_v10 }
 0x185   :  { %885 = vmatpush.msra.mxu3 %v1671_v11 }
 0x186   :  { %v311_v41 = vpop.permute.xlu0 %310  ;;  %v307_v44 = vpop.permute.xlu1 %306 }
 0x187   :  { %v352_v42 = vsel %vm80_vm3, %v237_v25, %v311_v41  ;;  %v350_v45 = vsel %vm80_vm3, %v231_v43, %v307_v44  ;;  %v404_v46 = vld [vmem:[#allocation2 + $0x41] sm:$0xff]  ;;  %v249_v25 = vadd.f32 %v2011_v34, %v1992_v33  ;;  %v246_v44 = vadd.f32 %v2011_v34, %v1974_v32  ;;  %v383_v33 = vld [vmem:[#allocation2 + $0x30] sm:$0xff] }
 0x188   :  { %369 = vst.msk [vmem:[#allocation2 + $0x71] sm:$0xff] %vm29_vm2, %v352_v42  ;;  %v424_v47 = vld [vmem:[#allocation2 + $0x42] sm:$0xff]  ;;  %468 = vrot.lane.b32.xlu2 %v404_v46, %s1799_s27  ;;  %v243_v32 = vadd.f32 %v2011_v34, %v1956_v31 }
 0x189   :  { %314 = vrot.lane.b32.xlu1 %v274_v40, %s1796_s28  ;;  %367 = vst.msk [vmem:[#allocation2 + $0x51] sm:$0xff] %vm29_vm2, %v350_v45  ;;  %548 = vrot.lane.b32.xlu0 %v424_v47, %s1798_s3 }
 0x18a   :  { %1668 = vmatmul.msk.f32.gmra.mxu3 %vm666_vm5, %v2198_v52 }
 0x18e   :  { %v313_v28 = vpop.permute.xlu0 %312  ;;  %v461_v4 = vpop.permute.xlu1 %460 }
 0x18f   :  { %v353_v48 = vsel %vm80_vm3, %v240_v26, %v313_v28  ;;  %v407_v53 = vld [vmem:[#allocation2 + $0x71] sm:$0xff]  ;;  %v600_v6 = vsel %vm29_vm2, %v380_v3, %v461_v4 }
 0x190   :  { %370 = vst.msk [vmem:[#allocation2 + $0x81] sm:$0xff] %vm29_vm2, %v353_v48  ;;  %v425_v50 = vld [vmem:[#allocation2 + $0x52] sm:$0xff]  ;;  %318 = vrot.lane.b32.xlu2 %v276_v49, %s1796_s28  ;;  %v621_v22 = vsel %vm620_vm4, %v600_v6, %v541_v5  ;;  %v386_v5 = vld [vmem:[#allocation2 + $0x60] sm:$0xff] }
 0x191   :  { %v405_v51 = vld [vmem:[#allocation2 + $0x51] sm:$0xff]  ;;  %550 = vrot.lane.b32.xlu1 %v425_v50, %s1798_s3  ;;  %1655 = vmatmul.msk.f32.vlgmr.msra.gmra.mxu2 %vm666_vm5, %v621_v22 }
 0x192   :  { %470 = vrot.lane.b32.xlu0 %v405_v51, %s1799_s27  ;;  %1669 = vmatmul.msk.f32.gmra.mxu3 %vm666_vm5, %v2214_v62  ;;  %v427_v55 = vld [vmem:[#allocation2 + $0x72] sm:$0xff] }
 0x193   :  { %v385_v60 = vld [vmem:[#allocation2 + $0x50] sm:$0xff] }
 0x194   :  { %v387_v10 = vld [vmem:[#allocation2 + $0x70] sm:$0xff] }
 0x197   :  { %v428_v56 = vld [vmem:[#allocation2 + $0x82] sm:$0xff] }
 0x198   :  { %472 = vrot.lane.b32.xlu2 %v406_v29, %s1799_s27  ;;  %v408_v57 = vld [vmem:[#allocation2 + $0x81] sm:$0xff] }
 0x199   :  { %474 = vrot.lane.b32.xlu1 %v407_v53, %s1799_s27  ;;  %v384_v53 = vld [vmem:[#allocation2 + $0x40] sm:$0xff] }
 0x19a   :  { %552 = vrot.lane.b32.xlu0 %v426_v54, %s1798_s3  ;;  %1670 = vmatmul.msk.f32.gmra.mxu3 %vm666_vm5, %v2230_v9 }
 0x1a0   :  { %554 = vrot.lane.b32.xlu2 %v427_v55, %s1798_s3 }
 0x1a1   :  { %556 = vrot.lane.b32.xlu1 %v428_v56, %s1798_s3 }
 0x1a2   :  { %476 = vrot.lane.b32.xlu0 %v408_v57, %s1799_s27 }
 0x1a8   :  { %478 = vrot.lane.b32.xlu2 %v409_v58, %s1799_s27 }
 0x1a9   :  { %480 = vrot.lane.b32.xlu1 %v410_v13, %s1799_s27 }
 0x1aa   :  { %558 = vrot.lane.b32.xlu0 %v429_v59, %s1798_s3 }
 0x1b0   :  { %560 = vrot.lane.b32.xlu2 %v430_v15, %s1798_s3 }
 0x1ca   :  { %v545_v12 = vpop.permute.xlu2 %544 }
 0x1da   :  { %v467_v14 = vpop.permute.xlu2 %466 }
 0x1db   :  { %v603_v47 = vsel %vm29_vm2, %v383_v33, %v467_v14 }
 0x1e2   :  { %v469_v21 = vpop.permute.xlu2 %468 }
 0x1e3   :  { %v465_v17 = vpop.permute.xlu1 %464  ;;  %v2342_v19 = vpop.f32.mrf.mxu3  ;;  %v604_v54 = vsel %vm29_vm2, %v384_v53, %v469_v21 }
 0x1e4   :  { %v602_v18 = vsel %vm29_vm2, %v382_v24, %v465_v17  ;;  %v388_v24 = vld [vmem:[#allocation2 + $0x80] sm:$0xff] }
 0x1e5   :  { %v623_v20 = vsel %vm620_vm4, %v602_v18, %v545_v12 }
 0x1e6   :  { %1683 = vmatmul.msk.f32.vlgmr.msra.gmra.mxu3 %vm666_vm5, %v623_v20 }
 0x1ea   :  { %v319_v41 = vpop.permute.xlu2 %318 }
 0x1eb   :  { %v543_v35 = vpop.permute.xlu1 %542  ;;  %v463_v37 = vpop.permute.xlu0 %462  ;;  %v356_v43 = vsel %vm80_vm3, %v249_v25, %v319_v41 }
 0x1ec   :  { %v601_v39 = vsel %vm29_vm2, %v381_v38, %v463_v37  ;;  %v2350_v42 = vpop.f32.mrf.mxu3  ;;  %373 = vst.msk [vmem:[#allocation2 + $0xd1] sm:$0xff] %vm29_vm2, %v356_v43 }
 0x1ed   :  { %v622_v40 = vsel %vm620_vm4, %v601_v39, %v543_v35  ;;  %v389_v35 = vld [vmem:[#allocation2 + $0x90] sm:$0xff] }
 0x1ee   :  { %1639 = vmatmul.msk.f32.vlgmr.msra.gmra.mxu1 %vm666_vm5, %v622_v40  ;;  %1656 = vmatmul.msk.f32.gmra.mxu2 %vm666_vm5, %v622_v40  ;;  %v390_v40 = vld [vmem:[#allocation2 + $0xa0] sm:$0xff] }
 0x1f2   :  { %v473_v3 = vpop.permute.xlu2 %472 }
 0x1f3   :  { %v317_v45 = vpop.permute.xlu1 %316  ;;  %v547_v26 = vpop.permute.xlu0 %546  ;;  %v413_v56 = vld [vmem:[#allocation2 + $0xd1] sm:$0xff]  ;;  %v606_v6 = vsel %vm29_vm2, %v386_v5, %v473_v3 }
 0x1f4   :  { %v355_v46 = vsel %vm80_vm3, %v246_v44, %v317_v45  ;;  %v624_v28 = vsel %vm620_vm4, %v603_v47, %v547_v26  ;;  %v774_v48 = vpop.f32.mrf.mxu3  ;;  %v433_v4 = vld [vmem:[#allocation2 + $0xd2] sm:$0xff]  ;;  %v1024_v47 = vld [vmem:[#allocation3 + $0x1] sm:$0xff] }
 0x1f5   :  { %372 = vst.msk [vmem:[#allocation2 + $0xc1] sm:$0xff] %vm29_vm2, %v355_v46  ;;  %1684 = vmatmul.msk.f32.gmra.mxu3 %vm666_vm5, %v624_v28 }
 0x1f6   :  { %1640 = vmatmul.msk.f32.gmra.mxu1 %vm666_vm5, %v623_v20  ;;  %1657 = vmatmul.msk.f32.gmra.mxu2 %vm666_vm5, %v623_v20 }
 0x1fa   :  { %v555_v12 = vpop.permute.xlu2 %554 }
 0x1fb   :  { %v315_v49 = vpop.permute.xlu1 %314  ;;  %v549_v55 = vpop.permute.xlu0 %548 }
 0x1fc   :  { %v354_v50 = vsel %vm80_vm3, %v243_v32, %v315_v49  ;;  %v432_v51 = vld [vmem:[#allocation2 + $0xc2] sm:$0xff]  ;;  %v625_v31 = vsel %vm620_vm4, %v604_v54, %v549_v55 }
 0x1fd   :  { %v412_v29 = vld [vmem:[#allocation2 + $0xc1] sm:$0xff]  ;;  %371 = vst.msk [vmem:[#allocation2 + $0xb1] sm:$0xff] %vm29_vm2, %v354_v50  ;;  %564 = vrot.lane.b32.xlu1 %v432_v51, %s1798_s3  ;;  %v2375_v34 = vpop.f32.mrf.mxu3  ;;  %1685 = vmatmul.msk.f32.gmra.mxu3 %vm666_vm5, %v625_v31 }
 0x1fe   :  { %484 = vrot.lane.b32.xlu0 %v412_v29, %s1799_s27  ;;  %1641 = vmatmul.msk.f32.gmra.mxu1 %vm666_vm5, %v624_v28  ;;  %v392_v29 = vld [vmem:[#allocation2 + $0xc0] sm:$0xff] }
 0x1ff   :  { %1658 = vmatmul.msk.f32.gmra.mxu2 %vm666_vm5, %v624_v28 }
 0x202   :  { %v479_v37 = vpop.permute.xlu2 %478 }
 0x203   :  { %v551_v59 = vpop.permute.xlu1 %550  ;;  %v609_v38 = vsel %vm29_vm2, %v389_v35, %v479_v37 }
 0x204   :  { %v411_v57 = vld [vmem:[#allocation2 + $0xb1] sm:$0xff]  ;;  %v471_v61 = vpop.permute.xlu0 %470 }
 0x205   :  { %v431_v58 = vld [vmem:[#allocation2 + $0xb2] sm:$0xff]  ;;  %486 = vrot.lane.b32.xlu1 %v413_v56, %s1799_s27  ;;  %482 = vrot.lane.b32.xlu2 %v411_v57, %s1799_s27  ;;  %v605_v63 = vsel %vm29_vm2, %v385_v60, %v471_v61  ;;  %v2384_v23 = vpop.f32.mrf.mxu3 }
 0x206   :  { %562 = vrot.lane.b32.xlu0 %v431_v58, %s1798_s3  ;;  %1642 = vmatmul.msk.f32.gmra.mxu1 %vm666_vm5, %v625_v31  ;;  %v626_v0 = vsel %vm620_vm4, %v605_v63, %v551_v59  ;;  %v391_v59 = vld [vmem:[#allocation2 + $0xb0] sm:$0xff] }
 0x207   :  { %1659 = vmatmul.msk.f32.gmra.mxu2 %vm666_vm5, %v625_v31  ;;  %1686 = vmatmul.msk.f32.gmra.mxu3 %vm666_vm5, %v626_v0  ;;  %v393_v60 = vld [vmem:[#allocation2 + $0xd0] sm:$0xff] }
 0x20a   :  { %v561_v44 = vpop.permute.xlu2 %560 }
 0x20b   :  { %v475_v27 = vpop.permute.xlu1 %474 }
 0x20c   :  { %v553_v7 = vpop.permute.xlu0 %552  ;;  %v607_v11 = vsel %vm29_vm2, %v387_v10, %v475_v27 }
 0x20d   :  { %566 = vrot.lane.b32.xlu2 %v433_v4, %s1798_s3  ;;  %578 = vrot.lane.b32.xlu1 %v439_v1, %s1798_s3  ;;  %v2394_v8 = vpop.f32.mrf.mxu3  ;;  %v627_v22 = vsel %vm620_vm4, %v606_v6, %v553_v7  ;;  %v628_v15 = vsel %vm620_vm4, %v607_v11, %v555_v12 }
 0x20e   :  { %1643 = vmatmul.msk.f32.gmra.mxu1 %vm666_vm5, %v626_v0  ;;  %498 = vrot.lane.b32.xlu0 %v419_v2, %s1799_s27 }
 0x20f   :  { %1660 = vmatmul.msk.f32.gmra.mxu2 %vm666_vm5, %v626_v0  ;;  %1687 = vmatmul.msk.f32.gmra.mxu3 %vm666_vm5, %v627_v22 }
 0x213   :  { %v557_v18 = vpop.permute.xlu1 %556 }
 0x214   :  { %v477_v17 = vpop.permute.xlu0 %476  ;;  %v803_v33 = vpop.f32.mrf.mxu2 }
 0x215   :  { %v845_v13 = vpop.f32.mrf.mxu3  ;;  %v608_v20 = vsel %vm29_vm2, %v388_v24, %v477_v17  ;;  %1084 = vrot.lane.b32.xlu1 %v1024_v47, %s1796_s28 }
 0x216   :  { %1644 = vmatmul.msk.f32.gmra.mxu1 %vm666_vm5, %v627_v22  ;;  %v2401_v14 = vadd.f32 %v845_v13, %v774_v48  ;;  %v629_v21 = vsel %vm620_vm4, %v608_v20, %v557_v18  ;;  %v2461_v48 = vld [vmem:[%s2844_s5] ss:$0 sm:$0xff] }
 0x217   :  { %1661 = vmatmul.msk.f32.gmra.mxu2 %vm666_vm5, %v627_v22  ;;  %1688 = vmatmul.msk.f32.gmra.mxu3 %vm666_vm5, %v628_v15 }
 0x21b   :  { %v481_v41 = vpop.permute.xlu1 %480 }
 0x21c   :  { %v559_v39 = vpop.permute.xlu0 %558  ;;  %v610_v43 = vsel %vm29_vm2, %v390_v40, %v481_v41  ;;  %v1044_v40 = vld [vmem:[#allocation3 + $0x2] sm:$0xff] }
 0x21d   :  { %v630_v25 = vsel %vm620_vm4, %v609_v38, %v559_v39  ;;  %v631_v45 = vsel %vm620_vm4, %v610_v43, %v561_v44  ;;  %v2441_v46 = vpop.f32.mrf.mxu3 }
 0x21e   :  { %1645 = vmatmul.msk.f32.gmra.mxu1 %vm666_vm5, %v628_v15 }
 0x21f   :  { %1662 = vmatmul.msk.f32.gmra.mxu2 %vm666_vm5, %v628_v15  ;;  %1689 = vmatmul.msk.f32.gmra.mxu3 %vm666_vm5, %v629_v21 }
 0x226   :  { %1646 = vmatmul.msk.f32.gmra.mxu1 %vm666_vm5, %v629_v21 }
 0x227   :  { %1690 = vmatmul.msk.f32.gmra.mxu3 %vm666_vm5, %v630_v25  ;;  %1663 = vmatmul.msk.f32.gmra.mxu2 %vm666_vm5, %v631_v45 }
 0x25f   :  { %v483_v49 = vpop.permute.xlu2 %482 }
 0x260   :  { %v611_v63 = vsel %vm29_vm2, %v391_v59, %v483_v49 }
 0x267   :  { %v567_v0 = vpop.permute.xlu2 %566 }
 0x269   :  { %v887_v32 = vpop.f32.mrf.mxu3 }
 0x26b   :  { %v732_v26 = vpop.f32.mrf.mxu1 }
 0x26c   :  { %v804_v28 = vadd.f32 %v803_v33, %v732_v26 }
 0x26e   :  { %v935_v50 = vadd.f32 %v887_v32, %v804_v28 }
 0x26f   :  { %v565_v51 = vpop.permute.xlu1 %564 }
 0x270   :  { %v485_v53 = vpop.permute.xlu0 %484  ;;  %v954_v54 = vadd.f32 %v2461_v48, %v935_v50 }
 0x271   :  { %v612_v55 = vsel %vm29_vm2, %v392_v29, %v485_v53  ;;  %v806_v31 = vpop.f32.mrf.mxu2 }
 0x272   :  { %v633_v56 = vsel %vm620_vm4, %v612_v55, %v565_v51  ;;  %v970_v57 = vmax.f32 %v954_v54, 0.0 }
 0x273   :  { %1691 = vmatmul.msk.f32.gmra.mxu3 %vm666_vm5, %v633_v56  ;;  %v735_v58 = vpop.f32.mrf.mxu1 }
 0x274   :  { %987 = vst.msk [vmem:[#allocation3 + $0x11] sm:$0xff] %vm80_vm3, %v970_v57  ;;  %v807_v6 = vadd.f32 %v806_v31, %v735_v58 }
 0x277   :  { %v487_v61 = vpop.permute.xlu1 %486 }
 0x278   :  { %v613_v1 = vsel %vm29_vm2, %v393_v60, %v487_v61  ;;  %v563_v2 = vpop.permute.xlu0 %562  ;;  %v890_v7 = vpop.f32.mrf.mxu3 }
 0x279   :  { %v632_v3 = vsel %vm620_vm4, %v611_v63, %v563_v2  ;;  %v809_v4 = vpop.f32.mrf.mxu2  ;;  %v634_v5 = vsel %vm620_vm4, %v613_v1, %v567_v0  ;;  %v936_v27 = vadd.f32 %v890_v7, %v807_v6  ;;  %v1704_v63 = vld [vmem:[%s2845_s6 + $0x58] sm:$0xff] }
 0x27a   :  { %1647 = vmatmul.msk.f32.gmra.mxu1 %vm666_vm5, %v632_v3  ;;  %1664 = vmatmul.msk.f32.gmra.mxu2 %vm666_vm5, %v632_v3 }
 0x27b   :  { %1692 = vmatmul.msk.f32.gmra.mxu3 %vm666_vm5, %v634_v5  ;;  %v738_v22 = vpop.f32.mrf.mxu1  ;;  %v955_v10 = vadd.f32 %v2461_v48, %v936_v27  ;;  %v1025_v49 = vld [vmem:[#allocation3 + $0x11] sm:$0xff]  ;;  %1336 = vmatpush.msrb.mxu0 %v1704_v63 }
 0x27c   :  { %v810_v12 = vadd.f32 %v809_v4, %v738_v22  ;;  %v1045_v51 = vld [vmem:[#allocation3 + $0x12] sm:$0xff]  ;;  %1783 = vmatpush.msrb.mxu3 %v1704_v63 }
 0x27d   :  { %v971_v11 = vmax.f32 %v955_v10, 0.0 }
 0x27f   :  { %988 = vst.msk [vmem:[#allocation3 + $0x21] sm:$0xff] %vm80_vm3, %v971_v11  ;;  %v579_v3 = vpop.permute.xlu1 %578 }
 0x280   :  { %v893_v15 = vpop.f32.mrf.mxu3  ;;  %v499_v61 = vpop.permute.xlu0 %498 }
 0x281   :  { %v937_v24 = vadd.f32 %v893_v15, %v810_v12 }
 0x282   :  { %1648 = vmatmul.msk.f32.gmra.mxu1 %vm666_vm5, %v633_v56  ;;  %v812_v13 = vpop.f32.mrf.mxu2  ;;  %1665 = vmatmul.msk.f32.gmra.mxu2 %vm666_vm5, %v633_v56 }
 0x283   :  { %1693 = vmatmul.msk.f32.gmra.mxu3 %vm666_vm5, %v2254_v36  ;;  %v741_v17 = vpop.f32.mrf.mxu1  ;;  %v956_v18 = vadd.f32 %v2461_v48, %v937_v24 }
 0x284   :  { %v813_v37 = vadd.f32 %v812_v13, %v741_v17 }
 0x285   :  { %v972_v20 = vmax.f32 %v956_v18, 0.0 }
 0x286   :  { %v1046_v21 = vld [vmem:[#allocation3 + $0x22] sm:$0xff] }
 0x287   :  { %v1026_v35 = vld [vmem:[#allocation3 + $0x21] sm:$0xff]  ;;  %989 = vst.msk [vmem:[#allocation3 + $0x31] sm:$0xff] %vm80_vm3, %v972_v20  ;;  %1168 = vrot.lane.b32.xlu0 %v1046_v21, %s1799_s27  ;;  %v1053_v21 = vld [vmem:[#allocation3 + $0x92] sm:$0xff] }
 0x288   :  { %1088 = vrot.lane.b32.xlu2 %v1026_v35, %s1796_s28  ;;  %v1033_v35 = vld [vmem:[#allocation3 + $0x91] sm:$0xff] }
 0x28a   :  { %1649 = vmatmul.msk.f32.gmra.mxu1 %vm666_vm5, %v634_v5  ;;  %1666 = vmatmul.msk.f32.gmra.mxu2 %vm666_vm5, %v634_v5  ;;  %v815_v38 = vpop.f32.mrf.mxu2  ;;  %v896_v39 = vpop.f32.mrf.mxu3 }
 0x28b   :  { %v744_v30 = vpop.f32.mrf.mxu1  ;;  %1694 = vmatmul.msk.f32.gmra.mxu3 %vm666_vm5, %v2198_v52  ;;  %v938_v25 = vadd.f32 %v896_v39, %v813_v37  ;;  %v1269_v37 = vld [vmem:[%s2845_s6 + $0x28] sm:$0xff]  ;;  %v1740_v39 = vld [vmem:[%s2845_s6 + $0x78] sm:$0xff] }
 0x28c   :  { %v816_v52 = vadd.f32 %v815_v38, %v744_v30  ;;  %v1742_v30 = vld [vmem:[%s2845_s6 + $0x88] sm:$0xff]  ;;  %1407 = vmatpush.msrb.mxu1 %v1269_v37  ;;  %v1741_v38 = vld [vmem:[%s2845_s6 + $0x80] sm:$0xff] }
 0x28d   :  { %v957_v41 = vadd.f32 %v2461_v48, %v938_v25  ;;  %1485 = vmatpush.msrb.mxu2 %v1742_v30  ;;  %v1703_v25 = vld [vmem:[%s2845_s6 + $0x50] sm:$0xff] }
 0x28e   :  { %v1047_v43 = vld [vmem:[#allocation3 + $0x32] sm:$0xff]  ;;  %1337 = vmatpush.msrb.mxu0 %v1703_v25  ;;  %1784 = vmatpush.msrb.mxu3 %v1703_v25 }
 0x28f   :  { %v1027_v44 = vld [vmem:[#allocation3 + $0x31] sm:$0xff]  ;;  %v973_v45 = vmax.f32 %v957_v41, 0.0  ;;  %1170 = vrot.lane.b32.xlu1 %v1047_v43, %s1799_s27  ;;  %1486 = vmatpush.msrb.mxu2 %v1741_v38  ;;  %v1738_v41 = vld [vmem:[%s2845_s6 + $0x68] sm:$0xff]  ;;  %v1268_v43 = vld [vmem:[%s2845_s6 + $0x20] sm:$0xff] }
 0x290   :  { %1164 = vrot.lane.b32.xlu2 %v1044_v40, %s1799_s27  ;;  %1090 = vrot.lane.b32.xlu0 %v1027_v44, %s1796_s28  ;;  %v1739_v40 = vld [vmem:[%s2845_s6 + $0x70] sm:$0xff]  ;;  %v1737_v44 = vld [vmem:[%s2845_s6 + $0x60] sm:$0xff] }
 0x291   :  { %990 = vst.msk [vmem:[#allocation3 + $0x41] sm:$0xff] %vm80_vm3, %v973_v45  ;;  %1487 = vmatpush.msrb.mxu2 %v1740_v39  ;;  %1408 = vmatpush.msrb.mxu1 %v1268_v43  ;;  %v1267_v45 = vld [vmem:[%s2845_s6 + $0x18] sm:$0xff] }
 0x292   :  { %1650 = vmatmul.msk.f32.gmra.mxu1 %vm666_vm5, %v2254_v36  ;;  %v899_v33 = vpop.f32.mrf.mxu3  ;;  %v818_v28 = vpop.f32.mrf.mxu2 }
 0x293   :  { %1695 = vmatmul.msk.f32.gmra.mxu3 %vm666_vm5, %v2214_v62  ;;  %v747_v47 = vpop.f32.mrf.mxu1  ;;  %v939_v26 = vadd.f32 %v899_v33, %v816_v52  ;;  %1488 = vmatpush.msrb.mxu2 %v1739_v40  ;;  %v1266_v52 = vld [vmem:[%s2845_s6 + $0x10] sm:$0xff] }
 0x294   :  { %v819_v29 = vadd.f32 %v818_v28, %v747_v47  ;;  %1409 = vmatpush.msrb.mxu1 %v1267_v45  ;;  %v1265_v47 = vld [vmem:[%s2845_s6 + $0x8] sm:$0xff]  ;;  %v1004_v28 = vld [vmem:[#allocation3] sm:$0xff] }
 0x295   :  { %v958_v32 = vadd.f32 %v2461_v48, %v939_v26  ;;  %1489 = vmatpush.msrb.mxu2 %v1738_v41  ;;  %v1264_v26 = vld [vmem:[%s2845_s6] sm:$0xff] }
 0x296   :  { %1410 = vmatpush.msrb.mxu1 %v1266_v52 }
 0x297   :  { %v974_v50 = vmax.f32 %v958_v32, 0.0  ;;  %1490 = vmatpush.msrb.mxu2 %v1737_v44  ;;  %v1702_v32 = vld [vmem:[%s2845_s6 + $0x48] sm:$0xff] }
 0x298   :  { %1086 = vrot.lane.b32.xlu2 %v1025_v49, %s1796_s28  ;;  %1166 = vrot.lane.b32.xlu0 %v1045_v51, %s1799_s27  ;;  %v1028_v36 = vld [vmem:[#allocation3 + $0x41] sm:$0xff]  ;;  %v1085_v49 = vpop.permute.xlu1 %1084 }
 0x299   :  { %991 = vst.msk [vmem:[#allocation3 + $0x51] sm:$0xff] %vm80_vm3, %v974_v50  ;;  %1092 = vrot.lane.b32.xlu1 %v1028_v36, %s1796_s28  ;;  %v1048_v56 = vld [vmem:[#allocation3 + $0x42] sm:$0xff]  ;;  %1411 = vmatpush.msrb.mxu1 %v1265_v47  ;;  %v1224_v50 = vsel %vm80_vm3, %v1004_v28, %v1085_v49 }
 0x29a   :  { %v902_v62 = vpop.f32.mrf.mxu3  ;;  %v821_v31 = vpop.f32.mrf.mxu2  ;;  %1338 = vmatpush.msrb.mxu0 %v1702_v32  ;;  %1785 = vmatpush.msrb.mxu3 %v1702_v32  ;;  %v1701_v51 = vld [vmem:[%s2845_s6 + $0x40] sm:$0xff] }
 0x29b   :  { %1696 = vmatmul.msk.f32.gmra.mxu3 %vm666_vm5, %v2230_v9  ;;  %v940_v53 = vadd.f32 %v902_v62, %v819_v29  ;;  %v750_v54 = vpop.f32.mrf.mxu1  ;;  %v399_v9 = vld [vmem:[#allocation2 + $0x130] sm:$0xff]  ;;  %1412 = vmatpush.msrb.mxu1 %v1264_v26  ;;  %v1700_v29 = vld [vmem:[%s2845_s6 + $0x38] sm:$0xff]  ;;  %v1008_v39 = vld [vmem:[#allocation3 + $0x40] sm:$0xff] }
 0x29c   :  { %v822_v60 = vadd.f32 %v821_v31, %v750_v54  ;;  %v619_v2 = vsel %vm29_vm2, %v399_v9, %v499_v61  ;;  %1339 = vmatpush.msrb.mxu0 %v1701_v51  ;;  %1786 = vmatpush.msrb.mxu3 %v1701_v51  ;;  %v1034_v54 = vld [vmem:[#allocation3 + $0xa1] sm:$0xff] }
 0x29d   :  { %v959_v55 = vadd.f32 %v2461_v48, %v940_v53  ;;  %v640_v7 = vsel %vm620_vm4, %v619_v2, %v579_v3  ;;  %v1699_v53 = vld [vmem:[%s2845_s6 + $0x30] sm:$0xff]  ;;  %v1054_v49 = vld [vmem:[#allocation3 + $0xa2] sm:$0xff] }
 0x29e   :  { %1340 = vmatpush.msrb.mxu0 %v1700_v29  ;;  %1787 = vmatpush.msrb.mxu3 %v1700_v29 }
 0x29f   :  { %v975_v57 = vmax.f32 %v959_v55, 0.0 }
 0x2a0   :  { %1172 = vrot.lane.b32.xlu2 %v1048_v56, %s1799_s27  ;;  %v1049_v58 = vld [vmem:[#allocation3 + $0x52] sm:$0xff]  ;;  %1341 = vmatpush.msrb.mxu0 %v1699_v53 }
 0x2a1   :  { %v1029_v59 = vld [vmem:[#allocation3 + $0x51] sm:$0xff]  ;;  %992 = vst.msk [vmem:[#allocation3 + $0x61] sm:$0xff] %vm80_vm3, %v975_v57  ;;  %1174 = vrot.lane.b32.xlu1 %v1049_v58, %s1799_s27  ;;  %1788 = vmatpush.msrb.mxu3 %v1699_v53 }
 0x2a2   :  { %1094 = vrot.lane.b32.xlu0 %v1029_v59, %s1796_s28  ;;  %v905_v0 = vpop.f32.mrf.mxu3  ;;  %v824_v22 = vpop.f32.mrf.mxu2  ;;  %v1006_v59 = vld [vmem:[#allocation3 + $0x20] sm:$0xff]  ;;  %v1009_v29 = vld [vmem:[#allocation3 + $0x50] sm:$0xff] }
 0x2a3   :  { %1697 = vmatmul.msk.f32.gmra.mxu3 %vm666_vm5, %v2240_v16  ;;  %v941_v1 = vadd.f32 %v905_v0, %v822_v60  ;;  %v753_v5 = vpop.f32.mrf.mxu1 }
 0x2a4   :  { %v825_v11 = vadd.f32 %v824_v22, %v753_v5 }
 0x2a5   :  { %v960_v4 = vadd.f32 %v2461_v48, %v941_v1 }
 0x2a7   :  { %v976_v6 = vmax.f32 %v960_v4, 0.0 }
 0x2a8   :  { %v1050_v27 = vld [vmem:[#allocation3 + $0x62] sm:$0xff] }
 0x2a9   :  { %v1030_v10 = vld [vmem:[#allocation3 + $0x61] sm:$0xff]  ;;  %993 = vst.msk [vmem:[#allocation3 + $0x71] sm:$0xff] %vm80_vm3, %v976_v6 }
 0x2aa   :  { %1176 = vrot.lane.b32.xlu0 %v1050_v27, %s1799_s27  ;;  %1096 = vrot.lane.b32.xlu2 %v1030_v10, %s1796_s28  ;;  %v908_v16 = vpop.f32.mrf.mxu3  ;;  %v827_v55 = vpop.f32.mrf.mxu2  ;;  %v1007_v10 = vld [vmem:[#allocation3 + $0x30] sm:$0xff] }
 0x2ab   :  { %1698 = vmatmul.msk.f32.gmra.mxu3 %vm666_vm5, %v640_v7  ;;  %v942_v12 = vadd.f32 %v908_v16, %v825_v11 }
 0x2ad   :  { %v961_v13 = vadd.f32 %v2461_v48, %v942_v12 }
 0x2af   :  { %v977_v15 = vmax.f32 %v961_v13, 0.0 }
 0x2b0   :  { %v1051_v17 = vld [vmem:[#allocation3 + $0x72] sm:$0xff] }
 0x2b1   :  { %v1031_v24 = vld [vmem:[#allocation3 + $0x71] sm:$0xff]  ;;  %994 = vst.msk [vmem:[#allocation3 + $0x81] sm:$0xff] %vm80_vm3, %v977_v15 }
 0x2b2   :  { %1178 = vrot.lane.b32.xlu2 %v1051_v17, %s1799_s27  ;;  %1098 = vrot.lane.b32.xlu1 %v1031_v24, %s1796_s28 }
 0x2b8   :  { %v1052_v18 = vld [vmem:[#allocation3 + $0x82] sm:$0xff] }
 0x2b9   :  { %v1032_v20 = vld [vmem:[#allocation3 + $0x81] sm:$0xff] }
 0x2ba   :  { %1180 = vrot.lane.b32.xlu1 %v1052_v18, %s1799_s27  ;;  %1100 = vrot.lane.b32.xlu0 %v1032_v20, %s1796_s28  ;;  %v1005_v20 = vld [vmem:[#allocation3 + $0x10] sm:$0xff] }
 0x2bb   :  { %1102 = vrot.lane.b32.xlu2 %v1033_v35, %s1796_s28 }
 0x2c2   :  { %1182 = vrot.lane.b32.xlu0 %v1053_v21, %s1799_s27 }
 0x2ca   :  { %1104 = vrot.lane.b32.xlu0 %v1034_v54, %s1796_s28 }
 0x2e2   :  { %v1089_v33 = vpop.permute.xlu2 %1088 }
 0x2e3   :  { %v1226_v60 = vsel %vm80_vm3, %v1006_v59, %v1089_v33  ;;  %v1010_v59 = vld [vmem:[#allocation3 + $0x60] sm:$0xff] }
 0x2ea   :  { %v1165_v36 = vpop.permute.xlu2 %1164 }
 0x2eb   :  { %v1244_v62 = vsel %vm29_vm2, %v1224_v50, %v1165_v36  ;;  %v840_v50 = vadd.f32 %v2384_v23, %v2342_v19 }
 0x2ec   :  { %1721 = vmatmul.msk.f32.vlgmr.msrb.gmra.mxu1 %vm1277_vm7, %v1244_v62 }
 0x2f2   :  { %v1087_v22 = vpop.permute.xlu2 %1086 }
 0x2f3   :  { %v1225_v21 = vsel %vm80_vm3, %v1005_v20, %v1087_v22  ;;  %v1012_v20 = vld [vmem:[#allocation3 + $0x80] sm:$0xff] }
 0x2f6   :  { %v911_v31 = vpop.f32.mrf.mxu3 }
 0x2f7   :  { %v756_v56 = vpop.f32.mrf.mxu1 }
 0x2f8   :  { %v828_v57 = vadd.f32 %v827_v55, %v756_v56 }
 0x2f9   :  { %v1169_v61 = vpop.permute.xlu0 %1168 }
 0x2fa   :  { %v943_v58 = vadd.f32 %v911_v31, %v828_v57  ;;  %v1246_v63 = vsel %vm29_vm2, %v1226_v60, %v1169_v61  ;;  %v1173_v25 = vpop.permute.xlu2 %1172  ;;  %v843_v60 = vadd.f32 %v2394_v8, %v2350_v42 }
 0x2fb   :  { %1743 = vmatmul.msk.f32.vlgmr.msrb.gmra.mxu2 %vm1277_vm7, %v1246_v63 }
 0x2fc   :  { %v962_v9 = vadd.f32 %v2461_v48, %v943_v58 }
 0x2fd   :  { %v830_v0 = vpop.f32.mrf.mxu2 }
 0x2fe   :  { %v978_v1 = vmax.f32 %v962_v9, 0.0  ;;  %v914_v2 = vpop.f32.mrf.mxu3 }
 0x2ff   :  { %v759_v3 = vpop.f32.mrf.mxu1 }
 0x300   :  { %995 = vst.msk [vmem:[#allocation3 + $0xb1] sm:$0xff] %vm80_vm3, %v978_v1  ;;  %v831_v4 = vadd.f32 %v830_v0, %v759_v3 }
 0x301   :  { %v1171_v7 = vpop.permute.xlu1 %1170 }
 0x302   :  { %v944_v5 = vadd.f32 %v914_v2, %v831_v4  ;;  %v1091_v27 = vpop.permute.xlu0 %1090 }
 0x303   :  { %v1227_v16 = vsel %vm80_vm3, %v1007_v10, %v1091_v27 }
 0x304   :  { %v963_v6 = vadd.f32 %v2461_v48, %v944_v5  ;;  %v1247_v15 = vsel %vm29_vm2, %v1227_v16, %v1171_v7  ;;  %v1097_v23 = vpop.permute.xlu2 %1096 }
 0x305   :  { %v833_v12 = vpop.f32.mrf.mxu2  ;;  %1744 = vmatmul.msk.f32.gmra.mxu2 %vm1277_vm7, %v1247_v15  ;;  %v1230_v9 = vsel %vm80_vm3, %v1010_v59, %v1097_v23 }
 0x306   :  { %v979_v11 = vmax.f32 %v963_v6, 0.0  ;;  %v917_v13 = vpop.f32.mrf.mxu3  ;;  %v1011_v6 = vld [vmem:[#allocation3 + $0x70] sm:$0xff] }
 0x307   :  { %v762_v17 = vpop.f32.mrf.mxu1  ;;  %v1035_v1 = vld [vmem:[#allocation3 + $0xb1] sm:$0xff] }
 0x308   :  { %996 = vst.msk [vmem:[#allocation3 + $0xc1] sm:$0xff] %vm80_vm3, %v979_v11  ;;  %v834_v24 = vadd.f32 %v833_v12, %v762_v17  ;;  %v1055_v42 = vld [vmem:[#allocation3 + $0xb2] sm:$0xff] }
 0x30a   :  { %v945_v18 = vadd.f32 %v917_v13, %v834_v24  ;;  %v1167_v30 = vpop.permute.xlu0 %1166 }
 0x30b   :  { %v1245_v37 = vsel %vm29_vm2, %v1225_v21, %v1167_v30  ;;  %v1093_v38 = vpop.permute.xlu1 %1092  ;;  %v849_v21 = vadd.f32 %v2441_v46, %v2375_v34 }
 0x30c   :  { %v964_v35 = vadd.f32 %v2461_v48, %v945_v18  ;;  %v1228_v41 = vsel %vm80_vm3, %v1008_v39, %v1093_v38  ;;  %1705 = vmatmul.msk.f32.vlgmr.msrb.gmra.mxu0 %vm1277_vm7, %v1245_v37  ;;  %1722 = vmatmul.msk.f32.gmra.mxu1 %vm1277_vm7, %v1245_v37  ;;  %v1179_v7 = vpop.permute.xlu2 %1178 }
 0x30d   :  { %v836_v52 = vpop.f32.mrf.mxu2  ;;  %v1248_v33 = vsel %vm29_vm2, %v1228_v41, %v1173_v25  ;;  %v1013_v25 = vld [vmem:[#allocation3 + $0x90] sm:$0xff] }
 0x30e   :  { %v980_v40 = vmax.f32 %v964_v35, 0.0  ;;  %v920_v43 = vpop.f32.mrf.mxu3  ;;  %1745 = vmatmul.msk.f32.gmra.mxu2 %vm1277_vm7, %v1248_v33 }
 0x30f   :  { %v1056_v44 = vld [vmem:[#allocation3 + $0xc2] sm:$0xff]  ;;  %v765_v47 = vpop.f32.mrf.mxu1 }
 0x310   :  { %v1036_v45 = vld [vmem:[#allocation3 + $0xc1] sm:$0xff]  ;;  %1188 = vrot.lane.b32.xlu2 %v1056_v44, %s1799_s27  ;;  %997 = vst.msk [vmem:[#allocation3 + $0xd1] sm:$0xff] %vm80_vm3, %v980_v40  ;;  %v837_v26 = vadd.f32 %v836_v52, %v765_v47  ;;  %v1043_v47 = vld [vmem:[#allocation3 + $0x131] sm:$0xff] }
 0x311   :  { %1108 = vrot.lane.b32.xlu1 %v1036_v45, %s1796_s28 }
 0x312   :  { %v946_v28 = vadd.f32 %v920_v43, %v837_v26  ;;  %v1063_v26 = vld [vmem:[#allocation3 + $0x132] sm:$0xff] }
 0x313   :  { %v1175_v51 = vpop.permute.xlu1 %1174 }
 0x314   :  { %v965_v32 = vadd.f32 %v2461_v48, %v946_v28  ;;  %v1095_v36 = vpop.permute.xlu0 %1094  ;;  %1706 = vmatmul.msk.f32.gmra.mxu0 %vm1277_vm7, %v1246_v63  ;;  %1723 = vmatmul.msk.f32.gmra.mxu1 %vm1277_vm7, %v1246_v63 }
 0x315   :  { %v1229_v53 = vsel %vm80_vm3, %v1009_v29, %v1095_v36  ;;  %v1103_v34 = vpop.permute.xlu2 %1102  ;;  %v1016_v36 = vld [vmem:[#allocation3 + $0xc0] sm:$0xff] }
 0x316   :  { %v981_v62 = vmax.f32 %v965_v32, 0.0  ;;  %v923_v54 = vpop.f32.mrf.mxu3  ;;  %v1249_v31 = vsel %vm29_vm2, %v1229_v53, %v1175_v51  ;;  %v1233_v40 = vsel %vm80_vm3, %v1013_v25, %v1103_v34  ;;  %v1014_v53 = vld [vmem:[#allocation3 + $0xa0] sm:$0xff] }
 0x317   :  { %v947_v55 = vadd.f32 %v923_v54, %v840_v50  ;;  %v1057_v56 = vld [vmem:[#allocation3 + $0xd2] sm:$0xff]  ;;  %1746 = vmatmul.msk.f32.gmra.mxu2 %vm1277_vm7, %v1249_v31 }
 0x318   :  { %v1037_v57 = vld [vmem:[#allocation3 + $0xd1] sm:$0xff]  ;;  %998 = vst.msk [vmem:[#allocation3 + $0xe1] sm:$0xff] %vm80_vm3, %v981_v62  ;;  %1190 = vrot.lane.b32.xlu0 %v1057_v56, %s1799_s27 }
 0x319   :  { %1184 = vrot.lane.b32.xlu1 %v1054_v49, %s1799_s27  ;;  %v966_v19 = vadd.f32 %v2461_v48, %v947_v55  ;;  %1110 = vrot.lane.b32.xlu2 %v1037_v57, %s1796_s28 }
 0x31b   :  { %v982_v58 = vmax.f32 %v966_v19, 0.0 }
 0x31c   :  { %v1177_v61 = vpop.permute.xlu0 %1176  ;;  %1707 = vmatmul.msk.f32.gmra.mxu0 %vm1277_vm7, %v1247_v15  ;;  %1724 = vmatmul.msk.f32.gmra.mxu1 %vm1277_vm7, %v1247_v15 }
 0x31d   :  { %999 = vst.msk [vmem:[#allocation3 + $0xf1] sm:$0xff] %vm80_vm3, %v982_v58  ;;  %v1250_v0 = vsel %vm29_vm2, %v1230_v9, %v1177_v61 }
 0x31e   :  { %v926_v63 = vpop.f32.mrf.mxu3 }
 0x31f   :  { %v948_v2 = vadd.f32 %v926_v63, %v843_v60  ;;  %v1038_v3 = vld [vmem:[#allocation3 + $0xe1] sm:$0xff]  ;;  %1747 = vmatmul.msk.f32.gmra.mxu2 %vm1277_vm7, %v1250_v0  ;;  %v2721_v63 = vld [vmem:[%s2846_s7] ss:$0 sm:$0xff] }
 0x320   :  { %1112 = vrot.lane.b32.xlu0 %v1038_v3, %s1796_s28  ;;  %v1058_v27 = vld [vmem:[#allocation3 + $0xe2] sm:$0xff] }
 0x321   :  { %1106 = vrot.lane.b32.xlu1 %v1035_v1, %s1796_s28  ;;  %v967_v8 = vadd.f32 %v2461_v48, %v948_v2  ;;  %1186 = vrot.lane.b32.xlu2 %v1055_v42, %s1799_s27  ;;  %v1015_v2 = vld [vmem:[#allocation3 + $0xb0] sm:$0xff] }
 0x323   :  { %v983_v4 = vmax.f32 %v967_v8, 0.0 }
 0x324   :  { %v1099_v5 = vpop.permute.xlu1 %1098  ;;  %1708 = vmatmul.msk.f32.gmra.mxu0 %vm1277_vm7, %v1248_v33  ;;  %1725 = vmatmul.msk.f32.gmra.mxu1 %vm1277_vm7, %v1248_v33  ;;  %v1059_v16 = vld [vmem:[#allocation3 + $0xf2] sm:$0xff] }
 0x325   :  { %1000 = vst.msk [vmem:[#allocation3 + $0x101] sm:$0xff] %vm80_vm3, %v983_v4  ;;  %v1231_v22 = vsel %vm80_vm3, %v1011_v6, %v1099_v5  ;;  %v1039_v13 = vld [vmem:[#allocation3 + $0xf1] sm:$0xff] }
 0x326   :  { %v929_v10 = vpop.f32.mrf.mxu3  ;;  %v1251_v11 = vsel %vm29_vm2, %v1231_v22, %v1179_v7 }
 0x327   :  { %v949_v12 = vadd.f32 %v929_v10, %v2401_v14  ;;  %1748 = vmatmul.msk.f32.gmra.mxu2 %vm1277_vm7, %v1251_v11 }
 0x328   :  { %1194 = vrot.lane.b32.xlu0 %v1059_v16, %s1799_s27 }
 0x329   :  { %1192 = vrot.lane.b32.xlu1 %v1058_v27, %s1799_s27  ;;  %1114 = vrot.lane.b32.xlu2 %v1039_v13, %s1796_s28  ;;  %v968_v15 = vadd.f32 %v2461_v48, %v949_v12  ;;  %v1018_v12 = vld [vmem:[#allocation3 + $0xe0] sm:$0xff] }
 0x32b   :  { %v984_v17 = vmax.f32 %v968_v15, 0.0 }
 0x32c   :  { %v1181_v24 = vpop.permute.xlu1 %1180  ;;  %v1101_v18 = vpop.permute.xlu0 %1100  ;;  %1709 = vmatmul.msk.f32.gmra.mxu0 %vm1277_vm7, %v1249_v31  ;;  %1726 = vmatmul.msk.f32.gmra.mxu1 %vm1277_vm7, %v1249_v31  ;;  %v1040_v35 = vld [vmem:[#allocation3 + $0x101] sm:$0xff]  ;;  %v1017_v31 = vld [vmem:[#allocation3 + $0xd0] sm:$0xff] }
 0x32d   :  { %1001 = vst.msk [vmem:[#allocation3 + $0x111] sm:$0xff] %vm80_vm3, %v984_v17  ;;  %v1232_v14 = vsel %vm80_vm3, %v1012_v20, %v1101_v18  ;;  %v1060_v39 = vld [vmem:[#allocation3 + $0x102] sm:$0xff] }
 0x32e   :  { %v932_v30 = vpop.f32.mrf.mxu3  ;;  %v1252_v37 = vsel %vm29_vm2, %v1232_v14, %v1181_v24 }
 0x32f   :  { %v950_v38 = vadd.f32 %v932_v30, %v849_v21  ;;  %1749 = vmatmul.msk.f32.gmra.mxu2 %vm1277_vm7, %v1252_v37 }
 0x331   :  { %1116 = vrot.lane.b32.xlu1 %v1040_v35, %s1796_s28  ;;  %1196 = vrot.lane.b32.xlu2 %v1060_v39, %s1799_s27  ;;  %v969_v46 = vadd.f32 %v2461_v48, %v950_v38  ;;  %v1019_v38 = vld [vmem:[#allocation3 + $0xf0] sm:$0xff] }
 0x333   :  { %v985_v41 = vmax.f32 %v969_v46, 0.0 }
 0x334   :  { %v1041_v43 = vld [vmem:[#allocation3 + $0x111] sm:$0xff]  ;;  %v1183_v44 = vpop.permute.xlu0 %1182  ;;  %1710 = vmatmul.msk.f32.gmra.mxu0 %vm1277_vm7, %v1250_v0  ;;  %1727 = vmatmul.msk.f32.gmra.mxu1 %vm1277_vm7, %v1250_v0 }
 0x335   :  { %1002 = vst.msk [vmem:[#allocation3 + $0x121] sm:$0xff] %vm80_vm3, %v985_v41  ;;  %v1061_v45 = vld [vmem:[#allocation3 + $0x112] sm:$0xff]  ;;  %v1253_v52 = vsel %vm29_vm2, %v1233_v40, %v1183_v44  ;;  %1118 = vrot.lane.b32.xlu0 %v1041_v43, %s1796_s28 }
 0x337   :  { %1750 = vmatmul.msk.f32.gmra.mxu2 %vm1277_vm7, %v1253_v52  ;;  %v1020_v52 = vld [vmem:[#allocation3 + $0x100] sm:$0xff] }
 0x339   :  { %1198 = vrot.lane.b32.xlu1 %v1061_v45, %s1799_s27 }
 0x33c   :  { %v1042_v48 = vld [vmem:[#allocation3 + $0x121] sm:$0xff]  ;;  %1711 = vmatmul.msk.f32.gmra.mxu0 %vm1277_vm7, %v1251_v11  ;;  %1728 = vmatmul.msk.f32.gmra.mxu1 %vm1277_vm7, %v1251_v11  ;;  %v1105_v49 = vpop.permute.xlu0 %1104 }
 0x33d   :  { %v1062_v33 = vld [vmem:[#allocation3 + $0x122] sm:$0xff]  ;;  %1120 = vrot.lane.b32.xlu2 %v1042_v48, %s1796_s28  ;;  %v1234_v55 = vsel %vm80_vm3, %v1014_v53, %v1105_v49 }
 0x33e   :  { %1200 = vrot.lane.b32.xlu0 %v1062_v33, %s1799_s27 }
 0x341   :  { %1122 = vrot.lane.b32.xlu1 %v1043_v47, %s1796_s28 }
 0x344   :  { %1712 = vmatmul.msk.f32.gmra.mxu0 %vm1277_vm7, %v1252_v37 }
 0x345   :  { %1202 = vrot.lane.b32.xlu2 %v1063_v26, %s1799_s27 }
 0x369   :  { %v1414_v50 = vpop.f32.mrf.mxu1 }
 0x36a   :  { %v1189_v28 = vpop.permute.xlu2 %1188 }
 0x373   :  { %v1111_v54 = vpop.permute.xlu2 %1110 }
 0x374   :  { %v1237_v57 = vsel %vm80_vm3, %v1017_v31, %v1111_v54 }
 0x37b   :  { %v1187_v42 = vpop.permute.xlu2 %1186 }
 0x37e   :  { %v1492_v32 = vpop.f32.mrf.mxu2 }
 0x383   :  { %v1109_v51 = vpop.permute.xlu1 %1108  ;;  %v1115_v14 = vpop.permute.xlu2 %1114 }
 0x384   :  { %v1236_v29 = vsel %vm80_vm3, %v1016_v36, %v1109_v51  ;;  %v1239_v25 = vsel %vm80_vm3, %v1019_v38, %v1115_v14 }
 0x385   :  { %v1256_v62 = vsel %vm29_vm2, %v1236_v29, %v1189_v28  ;;  %v1021_v28 = vld [vmem:[#allocation3 + $0x110] sm:$0xff] }
 0x386   :  { %1751 = vmatmul.msk.f32.gmra.mxu2 %vm1277_vm7, %v1256_v62 }
 0x388   :  { %v1495_v19 = vpop.f32.mrf.mxu2 }
 0x389   :  { %v1343_v59 = vpop.f32.mrf.mxu0  ;;  %v1417_v60 = vpop.f32.mrf.mxu1 }
 0x38a   :  { %v1191_v23 = vpop.permute.xlu0 %1190  ;;  %v1415_v61 = vadd.f32 %v1414_v50, %v1343_v59 }
 0x38b   :  { %v1185_v56 = vpop.permute.xlu1 %1184  ;;  %v1257_v9 = vsel %vm29_vm2, %v1237_v57, %v1191_v23  ;;  %v1197_v48 = vpop.permute.xlu2 %1196  ;;  %v1022_v57 = vld [vmem:[#allocation3 + $0x120] sm:$0xff] }
 0x38c   :  { %v1254_v58 = vsel %vm29_vm2, %v1234_v55, %v1185_v56  ;;  %v1540_v0 = vadd.f32 %v1492_v32, %v1415_v61 }
 0x38d   :  { %1729 = vmatmul.msk.f32.gmra.mxu1 %vm1277_vm7, %v1254_v58 }
 0x38e   :  { %1752 = vmatmul.msk.f32.gmra.mxu2 %vm1277_vm7, %v1257_v9  ;;  %v1559_v1 = vadd.f32 %v2721_v63, %v1540_v0 }
 0x390   :  { %v1575_v8 = vmax.f32 %v1559_v1, 0.0 }
 0x391   :  { %v1346_v5 = vpop.f32.mrf.mxu0  ;;  %v1420_v6 = vpop.f32.mrf.mxu1 }
 0x392   :  { %1591 = vst.msk [vmem:[%s2847_s8] sm:$0xff] %vm80_vm3, %v1575_v8  ;;  %v1418_v22 = vadd.f32 %v1417_v60, %v1346_v5  ;;  %v1498_v27 = vpop.f32.mrf.mxu2  ;;  %v1113_v10 = vpop.permute.xlu0 %1112 }
 0x393   :  { %v1107_v3 = vpop.permute.xlu1 %1106  ;;  %v1238_v13 = vsel %vm80_vm3, %v1018_v12, %v1113_v10 }
 0x394   :  { %v1235_v4 = vsel %vm80_vm3, %v1015_v2, %v1107_v3  ;;  %v1541_v11 = vadd.f32 %v1495_v19, %v1418_v22 }
 0x395   :  { %v1255_v7 = vsel %vm29_vm2, %v1235_v4, %v1187_v42  ;;  %v1023_v42 = vld [vmem:[#allocation3 + $0x130] sm:$0xff] }
 0x396   :  { %1713 = vmatmul.msk.f32.gmra.mxu0 %vm1277_vm7, %v1255_v7  ;;  %1730 = vmatmul.msk.f32.gmra.mxu1 %vm1277_vm7, %v1255_v7  ;;  %v1560_v16 = vadd.f32 %v2721_v63, %v1541_v11 }
 0x397   :  { %v1121_v31 = vpop.permute.xlu2 %1120 }
 0x398   :  { %v1576_v17 = vmax.f32 %v1560_v16, 0.0  ;;  %v1242_v58 = vsel %vm80_vm3, %v1022_v57, %v1121_v31 }
 0x399   :  { %v1349_v18 = vpop.f32.mrf.mxu0  ;;  %v1423_v20 = vpop.f32.mrf.mxu1 }
 0x39a   :  { %1592 = vst.msk [vmem:[%s2847_s8 + $0x8] sm:$0xff] %vm80_vm3, %v1576_v17  ;;  %v1421_v21 = vadd.f32 %v1420_v6, %v1349_v18  ;;  %v1501_v35 = vpop.f32.mrf.mxu2  ;;  %v1195_v37 = vpop.permute.xlu0 %1194 }
 0x39b   :  { %v1193_v15 = vpop.permute.xlu1 %1192  ;;  %v1259_v40 = vsel %vm29_vm2, %v1239_v25, %v1195_v37 }
 0x39c   :  { %v1258_v24 = vsel %vm29_vm2, %v1238_v13, %v1193_v15  ;;  %v1542_v30 = vadd.f32 %v1498_v27, %v1421_v21 }
 0x39d   :  { %1753 = vmatmul.msk.f32.gmra.mxu2 %vm1277_vm7, %v1258_v24 }
 0x39e   :  { %1714 = vmatmul.msk.f32.gmra.mxu0 %vm1277_vm7, %v1256_v62  ;;  %1731 = vmatmul.msk.f32.gmra.mxu1 %vm1277_vm7, %v1256_v62  ;;  %v1561_v39 = vadd.f32 %v2721_v63, %v1542_v30 }
 0x39f   :  { %v1203_v22 = vpop.permute.xlu2 %1202 }
 0x3a0   :  { %v1577_v46 = vmax.f32 %v1561_v39, 0.0 }
 0x3a1   :  { %v1352_v41 = vpop.f32.mrf.mxu0  ;;  %v1426_v44 = vpop.f32.mrf.mxu1 }
 0x3a2   :  { %1593 = vst.msk [vmem:[%s2847_s8 + $0x10] sm:$0xff] %vm80_vm3, %v1577_v46  ;;  %v1424_v43 = vadd.f32 %v1423_v20, %v1352_v41  ;;  %v1504_v33 = vpop.f32.mrf.mxu2 }
 0x3a3   :  { %v1117_v34 = vpop.permute.xlu1 %1116 }
 0x3a4   :  { %v1543_v45 = vadd.f32 %v1501_v35, %v1424_v43  ;;  %v1240_v47 = vsel %vm80_vm3, %v1020_v52, %v1117_v34 }
 0x3a5   :  { %1754 = vmatmul.msk.f32.gmra.mxu2 %vm1277_vm7, %v1259_v40  ;;  %v1260_v36 = vsel %vm29_vm2, %v1240_v47, %v1197_v48 }
 0x3a6   :  { %1715 = vmatmul.msk.f32.gmra.mxu0 %vm1277_vm7, %v1257_v9  ;;  %1732 = vmatmul.msk.f32.gmra.mxu1 %vm1277_vm7, %v1257_v9  ;;  %v1562_v26 = vadd.f32 %v2721_v63, %v1543_v45 }
 0x3a7   :  { %v1119_v32 = vpop.permute.xlu0 %1118 }
 0x3a8   :  { %v1578_v50 = vmax.f32 %v1562_v26, 0.0  ;;  %v1241_v51 = vsel %vm80_vm3, %v1021_v28, %v1119_v32 }
 0x3a9   :  { %v1355_v29 = vpop.f32.mrf.mxu0  ;;  %v1429_v55 = vpop.f32.mrf.mxu1 }
 0x3aa   :  { %1594 = vst.msk [vmem:[%s2847_s8 + $0x18] sm:$0xff] %vm80_vm3, %v1578_v50  ;;  %v1427_v53 = vadd.f32 %v1426_v44, %v1355_v29  ;;  %v1507_v19 = vpop.f32.mrf.mxu2 }
 0x3ab   :  { %v1199_v49 = vpop.permute.xlu1 %1198 }
 0x3ac   :  { %v1261_v62 = vsel %vm29_vm2, %v1241_v51, %v1199_v49  ;;  %v1544_v54 = vadd.f32 %v1504_v33, %v1427_v53 }
 0x3ad   :  { %1755 = vmatmul.msk.f32.gmra.mxu2 %vm1277_vm7, %v1260_v36  ;;  %1719 = vmatmul.msk.f32.vlgmr.msrb.gmra.mxu3 %vm1277_vm7, %v1261_v62 }
 0x3ae   :  { %1716 = vmatmul.msk.f32.gmra.mxu0 %vm1277_vm7, %v1258_v24  ;;  %1733 = vmatmul.msk.f32.gmra.mxu1 %vm1277_vm7, %v1258_v24  ;;  %v1563_v56 = vadd.f32 %v2721_v63, %v1544_v54 }
 0x3b0   :  { %v1201_v23 = vpop.permute.xlu0 %1200  ;;  %v1579_v59 = vmax.f32 %v1563_v56, 0.0 }
 0x3b1   :  { %v1262_v60 = vsel %vm29_vm2, %v1242_v58, %v1201_v23  ;;  %v1358_v9 = vpop.f32.mrf.mxu0  ;;  %v1432_v2 = vpop.f32.mrf.mxu1 }
 0x3b2   :  { %1595 = vst.msk [vmem:[%s2847_s8 + $0x20] sm:$0xff] %vm80_vm3, %v1579_v59  ;;  %v1430_v61 = vadd.f32 %v1429_v55, %v1358_v9  ;;  %v1510_v4 = vpop.f32.mrf.mxu2 }
 0x3b3   :  { %v1123_v8 = vpop.permute.xlu1 %1122 }
 0x3b4   :  { %v1545_v0 = vadd.f32 %v1507_v19, %v1430_v61  ;;  %v1243_v7 = vsel %vm80_vm3, %v1023_v42, %v1123_v8 }
 0x3b5   :  { %1756 = vmatmul.msk.f32.gmra.mxu2 %vm1277_vm7, %v1261_v62  ;;  %1720 = vmatmul.msk.f32.gmra.mxu3 %vm1277_vm7, %v1262_v60  ;;  %v1263_v11 = vsel %vm29_vm2, %v1243_v7, %v1203_v22 }
 0x3b6   :  { %1717 = vmatmul.msk.f32.gmra.mxu0 %vm1277_vm7, %v1259_v40  ;;  %1734 = vmatmul.msk.f32.gmra.mxu1 %vm1277_vm7, %v1259_v40  ;;  %v1564_v1 = vadd.f32 %v2721_v63, %v1545_v0 }
 0x3b8   :  { %v1580_v3 = vmax.f32 %v1564_v1, 0.0 }
 0x3b9   :  { %v1361_v5 = vpop.f32.mrf.mxu0  ;;  %v1435_v12 = vpop.f32.mrf.mxu1 }
 0x3ba   :  { %1596 = vst.msk [vmem:[%s2847_s8 + $0x28] sm:$0xff] %vm80_vm3, %v1580_v3  ;;  %v1433_v6 = vadd.f32 %v1432_v2, %v1361_v5  ;;  %v1513_v15 = vpop.f32.mrf.mxu2 }
 0x3bc   :  { %v1546_v27 = vadd.f32 %v1510_v4, %v1433_v6 }
 0x3bd   :  { %1757 = vmatmul.msk.f32.gmra.mxu2 %vm1277_vm7, %v1262_v60 }
 0x3be   :  { %1718 = vmatmul.msk.f32.gmra.mxu0 %vm1277_vm7, %v1260_v36  ;;  %1735 = vmatmul.msk.f32.gmra.mxu1 %vm1277_vm7, %v1260_v36  ;;  %v1565_v10 = vadd.f32 %v2721_v63, %v1546_v27 }
 0x3c0   :  { %v1581_v16 = vmax.f32 %v1565_v10, 0.0 }
 0x3c1   :  { %v1364_v13 = vpop.f32.mrf.mxu0 }
 0x3c2   :  { %1597 = vst.msk [vmem:[%s2847_s8 + $0x30] sm:$0xff] %vm80_vm3, %v1581_v16  ;;  %v1436_v17 = vadd.f32 %v1435_v12, %v1364_v13 }
 0x3c4   :  { %v1547_v24 = vadd.f32 %v1513_v15, %v1436_v17 }
 0x3c5   :  { %1758 = vmatmul.msk.f32.gmra.mxu2 %vm1277_vm7, %v1263_v11 }
 0x3c6   :  { %1736 = vmatmul.msk.f32.gmra.mxu1 %vm1277_vm7, %v1261_v62  ;;  %v1566_v18 = vadd.f32 %v2721_v63, %v1547_v24 }
 0x3c8   :  { %v1582_v20 = vmax.f32 %v1566_v18, 0.0 }
 0x3ca   :  { %1598 = vst.msk [vmem:[%s2847_s8 + $0x38] sm:$0xff] %vm80_vm3, %v1582_v20 }
 0x409   :  { %v1516_v14 = vpop.f32.mrf.mxu2 }
 0x40a   :  { %v1438_v21 = vpop.f32.mrf.mxu1 }
 0x411   :  { %v1519_v39 = vpop.f32.mrf.mxu2 }
 0x413   :  { %v1367_v35 = vpop.f32.mrf.mxu0  ;;  %v1441_v30 = vpop.f32.mrf.mxu1 }
 0x414   :  { %v1439_v37 = vadd.f32 %v1438_v21, %v1367_v35 }
 0x416   :  { %v1548_v38 = vadd.f32 %v1516_v14, %v1439_v37 }
 0x418   :  { %v1567_v25 = vadd.f32 %v2721_v63, %v1548_v38 }
 0x41a   :  { %v1583_v34 = vmax.f32 %v1567_v25, 0.0 }
 0x41b   :  { %v1370_v46 = vpop.f32.mrf.mxu0  ;;  %v1444_v40 = vpop.f32.mrf.mxu1 }
 0x41c   :  { %1599 = vst.msk [vmem:[%s2847_s8 + $0x40] sm:$0xff] %vm80_vm3, %v1583_v34  ;;  %v1442_v41 = vadd.f32 %v1441_v30, %v1370_v46 }
 0x41e   :  { %v1549_v43 = vadd.f32 %v1519_v39, %v1442_v41 }
 0x420   :  { %v1568_v44 = vadd.f32 %v2721_v63, %v1549_v43  ;;  %v1522_v45 = vpop.f32.mrf.mxu2 }
 0x422   :  { %v1584_v52 = vmax.f32 %v1568_v44, 0.0 }
 0x423   :  { %v1373_v48 = vpop.f32.mrf.mxu0  ;;  %v1447_v33 = vpop.f32.mrf.mxu1 }
 0x424   :  { %1600 = vst.msk [vmem:[%s2847_s8 + $0x48] sm:$0xff] %vm80_vm3, %v1584_v52  ;;  %v1445_v47 = vadd.f32 %v1444_v40, %v1373_v48 }
 0x426   :  { %v1550_v26 = vadd.f32 %v1522_v45, %v1445_v47 }
 0x428   :  { %v1569_v28 = vadd.f32 %v2721_v63, %v1550_v26  ;;  %v1525_v32 = vpop.f32.mrf.mxu2 }
 0x42a   :  { %v1585_v49 = vmax.f32 %v1569_v28, 0.0 }
 0x42b   :  { %v1376_v50 = vpop.f32.mrf.mxu0  ;;  %v1450_v36 = vpop.f32.mrf.mxu1 }
 0x42c   :  { %1601 = vst.msk [vmem:[%s2847_s8 + $0x50] sm:$0xff] %vm80_vm3, %v1585_v49  ;;  %v1448_v51 = vadd.f32 %v1447_v33, %v1376_v50 }
 0x42e   :  { %v1551_v29 = vadd.f32 %v1525_v32, %v1448_v51 }
 0x430   :  { %v1570_v62 = vadd.f32 %v2721_v63, %v1551_v29  ;;  %v1528_v53 = vpop.f32.mrf.mxu2  ;;  %v1385_v60 = vpop.f32.mrf.mxu3 }
 0x432   :  { %v1586_v54 = vmax.f32 %v1570_v62, 0.0 }
 0x433   :  { %v1379_v55 = vpop.f32.mrf.mxu0  ;;  %v1453_v56 = vpop.f32.mrf.mxu1 }
 0x434   :  { %1602 = vst.msk [vmem:[%s2847_s8 + $0x58] sm:$0xff] %vm80_vm3, %v1586_v54  ;;  %v1451_v31 = vadd.f32 %v1450_v36, %v1379_v55 }
 0x436   :  { %v1552_v57 = vadd.f32 %v1528_v53, %v1451_v31 }
 0x438   :  { %v1571_v19 = vadd.f32 %v2721_v63, %v1552_v57  ;;  %v1531_v23 = vpop.f32.mrf.mxu2  ;;  %v1388_v7 = vpop.f32.mrf.mxu3 }
 0x43a   :  { %v1587_v58 = vmax.f32 %v1571_v19, 0.0 }
 0x43b   :  { %v1382_v59 = vpop.f32.mrf.mxu0  ;;  %v1456_v61 = vpop.f32.mrf.mxu1 }
 0x43c   :  { %1603 = vst.msk [vmem:[%s2847_s8 + $0x60] sm:$0xff] %vm80_vm3, %v1587_v58  ;;  %v1454_v9 = vadd.f32 %v1453_v56, %v1382_v59  ;;  %v1457_v1 = vadd.f32 %v1456_v61, %v1385_v60 }
 0x43e   :  { %v1553_v0 = vadd.f32 %v1531_v23, %v1454_v9 }
 0x440   :  { %v1572_v2 = vadd.f32 %v2721_v63, %v1553_v0  ;;  %v1534_v3 = vpop.f32.mrf.mxu2 }
 0x441   :  { %v1554_v42 = vadd.f32 %v1534_v3, %v1457_v1 }
 0x442   :  { %v1588_v8 = vmax.f32 %v1572_v2, 0.0 }
 0x443   :  { %v1573_v4 = vadd.f32 %v2721_v63, %v1554_v42  ;;  %v1459_v5 = vpop.f32.mrf.mxu1 }
 0x444   :  { %1604 = vst.msk [vmem:[%s2847_s8 + $0x68] sm:$0xff] %vm80_vm3, %v1588_v8  ;;  %v1460_v22 = vadd.f32 %v1459_v5, %v1388_v7 }
 0x445   :  { %v1589_v6 = vmax.f32 %v1573_v4, 0.0 }
 0x447   :  { %1605 = vst.msk [vmem:[%s2847_s8 + $0x70] sm:$0xff] %vm80_vm3, %v1589_v6 }
 0x448   :  { %v1537_v27 = vpop.f32.mrf.mxu2 }
 0x449   :  { %v1555_v10 = vadd.f32 %v1537_v27, %v1460_v22 }
 0x44b   :  { %v1574_v11 = vadd.f32 %v2721_v63, %v1555_v10 }
 0x44d   :  { %v1590_v16 = vmax.f32 %v1574_v11, 0.0 }
 0x44f   :  { %1606 = vst.msk [vmem:[%s2847_s8 + $0x78] sm:$0xff] %vm80_vm3, %v1590_v16 }

// kernel: upconv_forward.1
= control target key start
LH: loop header
LB: loop body
LE: loop exit
PB: predicated region body
PF: predicated region fallthrough
CT: control target
= control target key end

     0   :  { %vm152_vm0 = vcmask 64512   ;;  %s1796_s28 = smov 16   ;;  %vm39_vm1 = vcmask 253952   ;;  %vm29_vm2 = vcmask 261120   ;;  %v1797_v30 = vmov 0.0   ;;  %s1799_s27 = smov 32   ;;  %s2839_s2 = inlined_call_operand.vmem [shape: f32[8,16], index: 2, kind: input, shape index: {}]   ;;  %s2840_s0 = inlined_call_operand.vmem [shape: f32[2,8,8,8], index: 0, kind: input, shape index: {}]   ;;  %s2841_s3 = inlined_call_operand.vmem [shape: f32[1,16], index: 3, kind: input, shape index: {}]   ;;  %s2842_s1 = inlined_call_operand.vmem [shape: f32[2,8,8,16], index: 1, kind: input, shape index: {}]   ;;  %s2843_s4 = inlined_call_operand.vmem [shape: f32[3,96,16], index: 4, kind: input, shape index: {}]   ;;  %s2844_s5 = inlined_call_operand.vmem [shape: f32[1,16], index: 5, kind: input, shape index: {}]   ;;  %s2845_s6 = inlined_call_operand.vmem [shape: f32[3,48,16], index: 6, kind: input, shape index: {}]   ;;  %s2846_s7 = inlined_call_operand.vmem [shape: f32[1,16], index: 7, kind: input, shape index: {}]   ;;  %s2847_s8 = inlined_call_operand.vmem [shape: f32[2,8,8,16], index: 8, kind: output, shape index: {}]  }
   0x1   :  { %v147_v0 = vld [vmem:[%s2839_s2] sm:$0xff]  ;;  %v132_v2 = vld [vmem:[%s2840_s0 + $0x8] sm:$0xff]  ;;  %v133_v3 = vld [vmem:[%s2840_s0 + $0x10] sm:$0xff]  ;;  %75 = vst.msk [vmem:[#allocation2 + $0xf9] sm:$0x1] %vm39_vm1, %v1797_v30  ;;  %vm80_vm3 = vcmask 130048  }
   0x2   :  { %v131_v1 = vld [vmem:[%s2840_s0] sm:$0xff]  ;;  %216 = vmatpush.msra.mxu0 %v147_v0  ;;  %v134_v4 = vld [vmem:[%s2840_s0 + $0x18] sm:$0xff]  ;;  %v136_v6 = vld [vmem:[%s2840_s0 + $0x28] sm:$0xff]  ;;  %30 = vst.msk [vmem:[#allocation2] sm:$0xff] %vm29_vm2, %v1797_v30  ;;  %vm620_vm4 = vcmask 523264   ;;  %vm666_vm5 = vcmask 785408  }
   0x3   :  { %1611 = vmatmul.msk.f32.vlgmr.msra.gmra.mxu0 %vm152_vm0, %v131_v1  ;;  %v135_v5 = vld [vmem:[%s2840_s0 + $0x20] sm:$0xff]  ;;  %v137_v7 = vld [vmem:[%s2840_s0 + $0x30] sm:$0xff]  ;;  %v138_v8 = vld [vmem:[%s2840_s0 + $0x38] sm:$0xff]  ;;  %31 = vst.msk [vmem:[#allocation2 + $0x8] sm:$0xff] %vm29_vm2, %v1797_v30  ;;  %vm90_vm6 = vcmask 122880   ;;  %vm1277_vm7 = vcmask 392192  }
   0x4   :  { %v139_v9 = vld [vmem:[%s2840_s0 + $0x40] sm:$0xff]  ;;  %v140_v10 = vld [vmem:[%s2840_s0 + $0x48] sm:$0xff]  ;;  %v141_v12 = vld [vmem:[%s2840_s0 + $0x50] sm:$0xff]  ;;  %32 = vst.msk [vmem:[#allocation2 + $0xa0] sm:$0xff] %vm29_vm2, %v1797_v30 }
   0x5   :  { %v278_v11 = vld [vmem:[%s2842_s1 + $0x60] sm:$0xff]  ;;  %v279_v13 = vld [vmem:[%s2842_s1 + $0x68] sm:$0xff]  ;;  %v142_v14 = vld [vmem:[%s2840_s0 + $0x58] sm:$0xff]  ;;  %33 = vst.msk [vmem:[#allocation2 + $0xa8] sm:$0xff] %vm29_vm2, %v1797_v30 }
   0x6   :  { %322 = vrot.lane.b32.xlu0 %v278_v11, %s1796_s28  ;;  %v280_v15 = vld [vmem:[%s2842_s1 + $0x70] sm:$0xff]  ;;  %v277_v16 = vld [vmem:[%s2842_s1 + $0x58] sm:$0xff]  ;;  %v143_v17 = vld [vmem:[%s2840_s0 + $0x60] sm:$0xff]  ;;  %35 = vst.msk [vmem:[#allocation2 + $0x90] sm:$0xff] %vm29_vm2, %v1797_v30 }
   0x7   :  { %326 = vrot.lane.b32.xlu1 %v280_v15, %s1796_s28  ;;  %320 = vrot.lane.b32.xlu2 %v277_v16, %s1796_s28  ;;  %v281_v18 = vld [vmem:[%s2842_s1 + $0x78] sm:$0xff]  ;;  %v144_v19 = vld [vmem:[%s2840_s0 + $0x68] sm:$0xff]  ;;  %36 = vst.msk [vmem:[#allocation2 + $0x98] sm:$0xff] %vm29_vm2, %v1797_v30 }
   0x8   :  { %v145_v20 = vld [vmem:[%s2840_s0 + $0x70] sm:$0xff]  ;;  %v146_v21 = vld [vmem:[%s2840_s0 + $0x78] sm:$0xff]  ;;  %37 = vst.msk [vmem:[#allocation2 + $0x130] sm:$0xff] %vm29_vm2, %v1797_v30  ;;  %v2011_v34 = vld [vmem:[%s2841_s3] ss:$0 sm:$0xff]  ;;  %s1798_s3 = smov 64  }
   0x9   :  { %38 = vst.msk [vmem:[#allocation2 + $0x138] sm:$0xff] %vm29_vm2, %v1797_v30  ;;  %v267_v52 = vld [vmem:[%s2842_s1 + $0x8] sm:$0xff]  ;;  %v266_v59 = vld [vmem:[%s2842_s1] sm:$0xff]  ;;  %v268_v0 = vld [vmem:[%s2842_s1 + $0x10] sm:$0xff] }
   0xa   :  { %41 = vst.msk [vmem:[#allocation2 + $0x10] sm:$0x1] %vm39_vm1, %v1797_v30  ;;  %v1636_v11 = vld [vmem:[%s2843_s4 + $0xa8] sm:$0xff]  ;;  %v1631_v16 = vld [vmem:[%s2843_s4 + $0x80] sm:$0xff] }
   0xb   :  { %1612 = vmatmul.msk.f32.gmra.mxu0 %vm152_vm0, %v132_v2  ;;  %42 = vst.msk [vmem:[#allocation2 + $0x20] sm:$0x1] %vm39_vm1, %v1797_v30  ;;  %v1632_v15 = vld [vmem:[%s2843_s4 + $0x88] sm:$0xff] }
   0xc   :  { %43 = vst.msk [vmem:[#allocation2 + $0x30] sm:$0x1] %vm39_vm1, %v1797_v30 }
   0xd   :  { %44 = vst.msk [vmem:[#allocation2 + $0x40] sm:$0x1] %vm39_vm1, %v1797_v30 }
   0xe   :  { %324 = vrot.lane.b32.xlu0 %v279_v13, %s1796_s28  ;;  %45 = vst.msk [vmem:[#allocation2 + $0x50] sm:$0x1] %vm39_vm1, %v1797_v30  ;;  %v1634_v13 = vld [vmem:[%s2843_s4 + $0x98] sm:$0xff] }
   0xf   :  { %328 = vrot.lane.b32.xlu1 %v281_v18, %s1796_s28  ;;  %46 = vst.msk [vmem:[#allocation2 + $0x60] sm:$0x1] %vm39_vm1, %v1797_v30  ;;  %v1629_v18 = vld [vmem:[%s2843_s4 + $0x70] sm:$0xff] }
  0x10   :  { %47 = vst.msk [vmem:[#allocation2 + $0x70] sm:$0x1] %vm39_vm1, %v1797_v30 }
  0x11   :  { %48 = vst.msk [vmem:[#allocation2 + $0x80] sm:$0x1] %vm39_vm1, %v1797_v30 }
  0x12   :  { %51 = vst.msk [vmem:[#allocation2 + $0xb0] sm:$0x1] %vm39_vm1, %v1797_v30 }
  0x13   :  { %1613 = vmatmul.msk.f32.gmra.mxu0 %vm152_vm0, %v133_v3  ;;  %52 = vst.msk [vmem:[#allocation2 + $0xc0] sm:$0x1] %vm39_vm1, %v1797_v30  ;;  %v269_v3 = vld [vmem:[%s2842_s1 + $0x18] sm:$0xff] }
  0x14   :  { %53 = vst.msk [vmem:[#allocation2 + $0xd0] sm:$0x1] %vm39_vm1, %v1797_v30 }
  0x15   :  { %54 = vst.msk [vmem:[#allocation2 + $0xe0] sm:$0x1] %vm39_vm1, %v1797_v30 }
  0x16   :  { %55 = vst.msk [vmem:[#allocation2 + $0xf0] sm:$0x1] %vm39_vm1, %v1797_v30 }
  0x17   :  { %56 = vst.msk [vmem:[#allocation2 + $0x100] sm:$0x1] %vm39_vm1, %v1797_v30 }
  0x18   :  { %57 = vst.msk [vmem:[#allocation2 + $0x110] sm:$0x1] %vm39_vm1, %v1797_v30 }
  0x19   :  { %58 = vst.msk [vmem:[#allocation2 + $0x120] sm:$0x1] %vm39_vm1, %v1797_v30 }
  0x1a   :  { %61 = vst.msk [vmem:[#allocation2 + $0x19] sm:$0x1] %vm39_vm1, %v1797_v30 }
  0x1b   :  { %1614 = vmatmul.msk.f32.gmra.mxu0 %vm152_vm0, %v134_v4  ;;  %62 = vst.msk [vmem:[#allocation2 + $0x29] sm:$0x1] %vm39_vm1, %v1797_v30 }
  0x1c   :  { %63 = vst.msk [vmem:[#allocation2 + $0x39] sm:$0x1] %vm39_vm1, %v1797_v30 }
  0x1d   :  { %64 = vst.msk [vmem:[#allocation2 + $0x49] sm:$0x1] %vm39_vm1, %v1797_v30 }
  0x1e   :  { %65 = vst.msk [vmem:[#allocation2 + $0x59] sm:$0x1] %vm39_vm1, %v1797_v30 }
  0x1f   :  { %66 = vst.msk [vmem:[#allocation2 + $0x69] sm:$0x1] %vm39_vm1, %v1797_v30 }
  0x20   :  { %67 = vst.msk [vmem:[#allocation2 + $0x79] sm:$0x1] %vm39_vm1, %v1797_v30 }
  0x21   :  { %68 = vst.msk [vmem:[#allocation2 + $0x89] sm:$0x1] %vm39_vm1, %v1797_v30 }
  0x22   :  { %71 = vst.msk [vmem:[#allocation2 + $0xb9] sm:$0x1] %vm39_vm1, %v1797_v30 }
  0x23   :  { %1615 = vmatmul.msk.f32.gmra.mxu0 %vm152_vm0, %v135_v5  ;;  %72 = vst.msk [vmem:[#allocation2 + $0xc9] sm:$0x1] %vm39_vm1, %v1797_v30  ;;  %v272_v5 = vld [vmem:[%s2842_s1 + $0x30] sm:$0xff] }
  0x24   :  { %73 = vst.msk [vmem:[#allocation2 + $0xd9] sm:$0x1] %vm39_vm1, %v1797_v30 }
  0x25   :  { %74 = vst.msk [vmem:[#allocation2 + $0xe9] sm:$0x1] %vm39_vm1, %v1797_v30 }
  0x26   :  { %76 = vst.msk [vmem:[#allocation2 + $0x109] sm:$0x1] %vm39_vm1, %v1797_v30 }
  0x27   :  { %77 = vst.msk [vmem:[#allocation2 + $0x119] sm:$0x1] %vm39_vm1, %v1797_v30 }
  0x28   :  { %78 = vst.msk [vmem:[#allocation2 + $0x129] sm:$0x1] %vm39_vm1, %v1797_v30 }
  0x29   :  { %81 = vst.msk [vmem:[#allocation3] sm:$0xff] %vm80_vm3, %v1797_v30 }
  0x2a   :  { %82 = vst.msk [vmem:[#allocation3 + $0x8] sm:$0xff] %vm80_vm3, %v1797_v30 }
  0x2b   :  { %1616 = vmatmul.msk.f32.gmra.mxu0 %vm152_vm0, %v136_v6  ;;  %83 = vst.msk [vmem:[#allocation3 + $0xa0] sm:$0xff] %vm80_vm3, %v1797_v30  ;;  %v270_v6 = vld [vmem:[%s2842_s1 + $0x20] sm:$0xff] }
  0x2c   :  { %84 = vst.msk [vmem:[#allocation3 + $0xa8] sm:$0xff] %vm80_vm3, %v1797_v30 }
  0x2d   :  { %86 = vst.msk [vmem:[#allocation3 + $0x90] sm:$0xff] %vm80_vm3, %v1797_v30 }
  0x2e   :  { %87 = vst.msk [vmem:[#allocation3 + $0x98] sm:$0xff] %vm80_vm3, %v1797_v30 }
  0x2f   :  { %88 = vst.msk [vmem:[#allocation3 + $0x130] sm:$0xff] %vm80_vm3, %v1797_v30 }
  0x30   :  { %89 = vst.msk [vmem:[#allocation3 + $0x138] sm:$0xff] %vm80_vm3, %v1797_v30 }
  0x31   :  { %40 = vst.msk [vmem:[#allocation2] sm:$0x1] %vm39_vm1, %v1797_v30 }
  0x32   :  { %49 = vst.msk [vmem:[#allocation2 + $0x90] sm:$0x1] %vm39_vm1, %v1797_v30 }
  0x33   :  { %1617 = vmatmul.msk.f32.gmra.mxu0 %vm152_vm0, %v137_v7  ;;  %50 = vst.msk [vmem:[#allocation2 + $0xa0] sm:$0x1] %vm39_vm1, %v1797_v30  ;;  %v271_v7 = vld [vmem:[%s2842_s1 + $0x28] sm:$0xff] }
  0x34   :  { %59 = vst.msk [vmem:[#allocation2 + $0x130] sm:$0x1] %vm39_vm1, %v1797_v30 }
  0x35   :  { %60 = vst.msk [vmem:[#allocation2 + $0x9] sm:$0x1] %vm39_vm1, %v1797_v30 }
  0x36   :  { %69 = vst.msk [vmem:[#allocation2 + $0x99] sm:$0x1] %vm39_vm1, %v1797_v30 }
  0x37   :  { %70 = vst.msk [vmem:[#allocation2 + $0xa9] sm:$0x1] %vm39_vm1, %v1797_v30 }
  0x38   :  { %79 = vst.msk [vmem:[#allocation2 + $0x139] sm:$0x1] %vm39_vm1, %v1797_v30 }
  0x39   :  { %113 = vst.msk [vmem:[#allocation3 + $0x29] sm:$0x1] %vm90_vm6, %v1797_v30 }
  0x3a   :  { %91 = vst.msk [vmem:[#allocation3] sm:$0x1] %vm90_vm6, %v1797_v30 }
  0x3b   :  { %1618 = vmatmul.msk.f32.gmra.mxu0 %vm152_vm0, %v138_v8  ;;  %v273_v8 = vld [vmem:[%s2842_s1 + $0x38] sm:$0xff]  ;;  %92 = vst.msk [vmem:[#allocation3 + $0x10] sm:$0x1] %vm90_vm6, %v1797_v30 }
  0x3c   :  { %93 = vst.msk [vmem:[#allocation3 + $0x20] sm:$0x1] %vm90_vm6, %v1797_v30 }
  0x3d   :  { %94 = vst.msk [vmem:[#allocation3 + $0x30] sm:$0x1] %vm90_vm6, %v1797_v30 }
  0x3e   :  { %95 = vst.msk [vmem:[#allocation3 + $0x40] sm:$0x1] %vm90_vm6, %v1797_v30 }
  0x3f   :  { %96 = vst.msk [vmem:[#allocation3 + $0x50] sm:$0x1] %vm90_vm6, %v1797_v30 }
  0x40   :  { %97 = vst.msk [vmem:[#allocation3 + $0x60] sm:$0x1] %vm90_vm6, %v1797_v30 }
  0x41   :  { %98 = vst.msk [vmem:[#allocation3 + $0x70] sm:$0x1] %vm90_vm6, %v1797_v30 }
  0x42   :  { %99 = vst.msk [vmem:[#allocation3 + $0x80] sm:$0x1] %vm90_vm6, %v1797_v30 }
  0x43   :  { %1619 = vmatmul.msk.f32.gmra.mxu0 %vm152_vm0, %v139_v9  ;;  %v1638_v9 = vld [vmem:[%s2843_s4 + $0xb8] sm:$0xff]  ;;  %100 = vst.msk [vmem:[#allocation3 + $0x90] sm:$0x1] %vm90_vm6, %v1797_v30 }
  0x44   :  { %1759 = vmatpush.msra.mxu3 %v1638_v9  ;;  %719 = vmatpush.msra.mxu1 %v1638_v9  ;;  %101 = vst.msk [vmem:[#allocation3 + $0xa0] sm:$0x1] %vm90_vm6, %v1797_v30 }
  0x45   :  { %102 = vst.msk [vmem:[#allocation3 + $0xb0] sm:$0x1] %vm90_vm6, %v1797_v30 }
  0x46   :  { %103 = vst.msk [vmem:[#allocation3 + $0xc0] sm:$0x1] %vm90_vm6, %v1797_v30 }
  0x47   :  { %104 = vst.msk [vmem:[#allocation3 + $0xd0] sm:$0x1] %vm90_vm6, %v1797_v30 }
  0x48   :  { %105 = vst.msk [vmem:[#allocation3 + $0xe0] sm:$0x1] %vm90_vm6, %v1797_v30 }
  0x49   :  { %106 = vst.msk [vmem:[#allocation3 + $0xf0] sm:$0x1] %vm90_vm6, %v1797_v30 }
  0x4a   :  { %107 = vst.msk [vmem:[#allocation3 + $0x100] sm:$0x1] %vm90_vm6, %v1797_v30 }
  0x4b   :  { %1620 = vmatmul.msk.f32.gmra.mxu0 %vm152_vm0, %v140_v10  ;;  %v1637_v10 = vld [vmem:[%s2843_s4 + $0xb0] sm:$0xff]  ;;  %108 = vst.msk [vmem:[#allocation3 + $0x110] sm:$0x1] %vm90_vm6, %v1797_v30 }
  0x4c   :  { %1760 = vmatpush.msra.mxu3 %v1637_v10  ;;  %720 = vmatpush.msra.mxu1 %v1637_v10  ;;  %109 = vst.msk [vmem:[#allocation3 + $0x120] sm:$0x1] %vm90_vm6, %v1797_v30 }
  0x4d   :  { %110 = vst.msk [vmem:[#allocation3 + $0x130] sm:$0x1] %vm90_vm6, %v1797_v30 }
  0x4e   :  { %1761 = vmatpush.msra.mxu3 %v1636_v11  ;;  %721 = vmatpush.msra.mxu1 %v1636_v11  ;;  %111 = vst.msk [vmem:[#allocation3 + $0x9] sm:$0x1] %vm90_vm6, %v1797_v30 }
  0x4f   :  { %112 = vst.msk [vmem:[#allocation3 + $0x19] sm:$0x1] %vm90_vm6, %v1797_v30 }
  0x50   :  { %114 = vst.msk [vmem:[#allocation3 + $0x39] sm:$0x1] %vm90_vm6, %v1797_v30 }
  0x51   :  { %115 = vst.msk [vmem:[#allocation3 + $0x49] sm:$0x1] %vm90_vm6, %v1797_v30 }
  0x52   :  { %116 = vst.msk [vmem:[#allocation3 + $0x59] sm:$0x1] %vm90_vm6, %v1797_v30 }
  0x53   :  { %1621 = vmatmul.msk.f32.gmra.mxu0 %vm152_vm0, %v141_v12  ;;  %v1635_v12 = vld [vmem:[%s2843_s4 + $0xa0] sm:$0xff]  ;;  %117 = vst.msk [vmem:[#allocation3 + $0x69] sm:$0x1] %vm90_vm6, %v1797_v30 }
  0x54   :  { %1762 = vmatpush.msra.mxu3 %v1635_v12  ;;  %722 = vmatpush.msra.mxu1 %v1635_v12  ;;  %118 = vst.msk [vmem:[#allocation3 + $0x79] sm:$0x1] %vm90_vm6, %v1797_v30 }
  0x55   :  { %119 = vst.msk [vmem:[#allocation3 + $0x89] sm:$0x1] %vm90_vm6, %v1797_v30 }
  0x56   :  { %1763 = vmatpush.msra.mxu3 %v1634_v13  ;;  %723 = vmatpush.msra.mxu1 %v1634_v13  ;;  %120 = vst.msk [vmem:[#allocation3 + $0x99] sm:$0x1] %vm90_vm6, %v1797_v30 }
  0x57   :  { %121 = vst.msk [vmem:[#allocation3 + $0xa9] sm:$0x1] %vm90_vm6, %v1797_v30 }
  0x58   :  { %122 = vst.msk [vmem:[#allocation3 + $0xb9] sm:$0x1] %vm90_vm6, %v1797_v30 }
  0x59   :  { %123 = vst.msk [vmem:[#allocation3 + $0xc9] sm:$0x1] %vm90_vm6, %v1797_v30 }
  0x5a   :  { %124 = vst.msk [vmem:[#allocation3 + $0xd9] sm:$0x1] %vm90_vm6, %v1797_v30 }
  0x5b   :  { %1622 = vmatmul.msk.f32.gmra.mxu0 %vm152_vm0, %v142_v14  ;;  %v1633_v14 = vld [vmem:[%s2843_s4 + $0x90] sm:$0xff]  ;;  %125 = vst.msk [vmem:[#allocation3 + $0xe9] sm:$0x1] %vm90_vm6, %v1797_v30 }
  0x5c   :  { %1764 = vmatpush.msra.mxu3 %v1633_v14  ;;  %724 = vmatpush.msra.mxu1 %v1633_v14  ;;  %126 = vst.msk [vmem:[#allocation3 + $0xf9] sm:$0x1] %vm90_vm6, %v1797_v30 }
  0x5d   :  { %127 = vst.msk [vmem:[#allocation3 + $0x109] sm:$0x1] %vm90_vm6, %v1797_v30 }
  0x5e   :  { %1765 = vmatpush.msra.mxu3 %v1632_v15  ;;  %725 = vmatpush.msra.mxu1 %v1632_v15  ;;  %128 = vst.msk [vmem:[#allocation3 + $0x119] sm:$0x1] %vm90_vm6, %v1797_v30 }
  0x5f   :  { %129 = vst.msk [vmem:[#allocation3 + $0x129] sm:$0x1] %vm90_vm6, %v1797_v30 }
  0x60   :  { %1766 = vmatpush.msra.mxu3 %v1631_v16  ;;  %726 = vmatpush.msra.mxu1 %v1631_v16  ;;  %130 = vst.msk [vmem:[#allocation3 + $0x139] sm:$0x1] %vm90_vm6, %v1797_v30 }
  0x61   :  { %v321_v36 = vpop.permute.xlu2 %320 }
  0x63   :  { %1623 = vmatmul.msk.f32.gmra.mxu0 %vm152_vm0, %v143_v17  ;;  %v1630_v17 = vld [vmem:[%s2843_s4 + $0x78] sm:$0xff] }
  0x64   :  { %1767 = vmatpush.msra.mxu3 %v1630_v17  ;;  %727 = vmatpush.msra.mxu1 %v1630_v17 }
  0x66   :  { %1768 = vmatpush.msra.mxu3 %v1629_v18  ;;  %728 = vmatpush.msra.mxu1 %v1629_v18 }
  0x6b   :  { %1624 = vmatmul.msk.f32.gmra.mxu0 %vm152_vm0, %v144_v19  ;;  %v1628_v19 = vld [vmem:[%s2843_s4 + $0x68] sm:$0xff] }
  0x6c   :  { %1769 = vmatpush.msra.mxu3 %v1628_v19  ;;  %729 = vmatpush.msra.mxu1 %v1628_v19 }
  0x73   :  { %1625 = vmatmul.msk.f32.gmra.mxu0 %vm152_vm0, %v145_v20  ;;  %v1627_v20 = vld [vmem:[%s2843_s4 + $0x60] sm:$0xff] }
  0x74   :  { %1770 = vmatpush.msra.mxu3 %v1627_v20  ;;  %730 = vmatpush.msra.mxu1 %v1627_v20 }
  0x78   :  { %v323_v39 = vpop.permute.xlu0 %322 }
  0x79   :  { %v327_v49 = vpop.permute.xlu1 %326 }
  0x7b   :  { %1626 = vmatmul.msk.f32.gmra.mxu0 %vm152_vm0, %v146_v21 }
  0x80   :  { %v1932_v22 = vpop.f32.mrf.mxu0  ;;  %v325_v44 = vpop.permute.xlu0 %324 }
  0x81   :  { %v329_v57 = vpop.permute.xlu1 %328 }
  0x88   :  { %v1934_v23 = vpop.f32.mrf.mxu0 }
  0x90   :  { %v1936_v24 = vpop.f32.mrf.mxu0 }
  0x91   :  { %v225_v13 = vadd.f32 %v2011_v34, %v1936_v24  ;;  %v275_v24 = vld [vmem:[%s2842_s1 + $0x48] sm:$0xff] }
  0x98   :  { %v1938_v25 = vpop.f32.mrf.mxu0 }
  0x99   :  { %v228_v20 = vadd.f32 %v2011_v34, %v1938_v25 }
  0xa0   :  { %v1940_v26 = vpop.f32.mrf.mxu0 }
  0xa8   :  { %v1942_v27 = vpop.f32.mrf.mxu0 }
  0xb0   :  { %v1944_v28 = vpop.f32.mrf.mxu0 }
  0xb1   :  { %v237_v25 = vadd.f32 %v2011_v34, %v1944_v28 }
  0xb8   :  { %v1946_v29 = vpop.f32.mrf.mxu0 }
  0xc0   :  { %v1956_v31 = vpop.f32.mrf.mxu0 }
  0xc8   :  { %v1974_v32 = vpop.f32.mrf.mxu0 }
  0xd0   :  { %v1992_v33 = vpop.f32.mrf.mxu0 }
  0xd8   :  { %v251_v35 = vpop.f32.mrf.mxu0 }
  0xd9   :  { %v252_v37 = vadd.f32 %v2011_v34, %v251_v35  ;;  %v400_v35 = vld [vmem:[#allocation2 + $0x1] sm:$0xff] }
  0xdb   :  { %v357_v38 = vsel %vm80_vm3, %v252_v37, %v321_v36  ;;  %v420_v36 = vld [vmem:[#allocation2 + $0x2] sm:$0xff]  ;;  %v652_v37 = vld [vmem:[%s2843_s4 + $0x58] sm:$0xff] }
  0xdc   :  { %374 = vst.msk [vmem:[#allocation2 + $0xe1] sm:$0xff] %vm29_vm2, %v357_v38  ;;  %v651_v38 = vld [vmem:[%s2843_s4 + $0x50] sm:$0xff]  ;;  %1771 = vmatpush.msrb.mxu3 %v652_v37  ;;  %790 = vmatpush.msra.mxu2 %v652_v37 }
  0xde   :  { %1772 = vmatpush.msrb.mxu3 %v651_v38  ;;  %791 = vmatpush.msra.mxu2 %v651_v38 }
  0xe0   :  { %v254_v40 = vpop.f32.mrf.mxu0 }
  0xe1   :  { %v255_v41 = vadd.f32 %v2011_v34, %v254_v40 }
  0xe3   :  { %v358_v42 = vsel %vm80_vm3, %v255_v41, %v323_v39  ;;  %v434_v2 = vld [vmem:[#allocation2 + $0xe2] sm:$0xff] }
  0xe4   :  { %375 = vst.msk [vmem:[#allocation2 + $0xf1] sm:$0xff] %vm29_vm2, %v358_v42  ;;  %v414_v4 = vld [vmem:[#allocation2 + $0xe1] sm:$0xff]  ;;  %v648_v42 = vld [vmem:[%s2843_s4 + $0x38] sm:$0xff] }
  0xe5   :  { %v650_v39 = vld [vmem:[%s2843_s4 + $0x48] sm:$0xff]  ;;  %v649_v41 = vld [vmem:[%s2843_s4 + $0x40] sm:$0xff] }
  0xe6   :  { %1773 = vmatpush.msrb.mxu3 %v650_v39  ;;  %792 = vmatpush.msra.mxu2 %v650_v39  ;;  %v394_v19 = vld [vmem:[#allocation2 + $0xe0] sm:$0xff] }
  0xe8   :  { %v257_v43 = vpop.f32.mrf.mxu0  ;;  %1774 = vmatpush.msrb.mxu3 %v649_v41  ;;  %793 = vmatpush.msra.mxu2 %v649_v41 }
  0xe9   :  { %v258_v45 = vadd.f32 %v2011_v34, %v257_v43  ;;  %v647_v43 = vld [vmem:[%s2843_s4 + $0x30] sm:$0xff] }
  0xea   :  { %1775 = vmatpush.msrb.mxu3 %v648_v42  ;;  %794 = vmatpush.msra.mxu2 %v648_v42 }
  0xeb   :  { %v359_v46 = vsel %vm80_vm3, %v258_v45, %v325_v44  ;;  %v435_v47 = vld [vmem:[#allocation2 + $0xf2] sm:$0xff]  ;;  %v646_v44 = vld [vmem:[%s2843_s4 + $0x28] sm:$0xff] }
  0xec   :  { %v415_v48 = vld [vmem:[#allocation2 + $0xf1] sm:$0xff]  ;;  %376 = vst.msk [vmem:[#allocation2 + $0x101] sm:$0xff] %vm29_vm2, %v359_v46  ;;  %570 = vrot.lane.b32.xlu0 %v435_v47, %s1798_s3  ;;  %1776 = vmatpush.msrb.mxu3 %v647_v43  ;;  %v645_v46 = vld [vmem:[%s2843_s4 + $0x20] sm:$0xff] }
  0xed   :  { %490 = vrot.lane.b32.xlu2 %v415_v48, %s1799_s27  ;;  %795 = vmatpush.msra.mxu2 %v647_v43  ;;  %v644_v47 = vld [vmem:[%s2843_s4 + $0x18] sm:$0xff]  ;;  %v395_v48 = vld [vmem:[#allocation2 + $0xf0] sm:$0xff]  ;;  %v231_v43 = vadd.f32 %v2011_v34, %v1940_v26  ;;  %v240_v26 = vadd.f32 %v2011_v34, %v1946_v29 }
  0xee   :  { %1777 = vmatpush.msrb.mxu3 %v646_v44 }
  0xef   :  { %796 = vmatpush.msra.mxu2 %v646_v44 }
  0xf0   :  { %v260_v50 = vpop.f32.mrf.mxu0  ;;  %1778 = vmatpush.msrb.mxu3 %v645_v46 }
  0xf1   :  { %v261_v51 = vadd.f32 %v2011_v34, %v260_v50  ;;  %797 = vmatpush.msra.mxu2 %v645_v46 }
  0xf2   :  { %1779 = vmatpush.msrb.mxu3 %v644_v47 }
  0xf3   :  { %v416_v53 = vld [vmem:[#allocation2 + $0x101] sm:$0xff]  ;;  %v360_v55 = vsel %vm80_vm3, %v261_v51, %v327_v49  ;;  %v643_v51 = vld [vmem:[%s2843_s4 + $0x10] sm:$0xff]  ;;  %798 = vmatpush.msra.mxu2 %v644_v47 }
  0xf4   :  { %v436_v54 = vld [vmem:[#allocation2 + $0x102] sm:$0xff]  ;;  %492 = vrot.lane.b32.xlu1 %v416_v53, %s1799_s27  ;;  %300 = vrot.lane.b32.xlu0 %v267_v52, %s1796_s28  ;;  %377 = vst.msk [vmem:[#allocation2 + $0x111] sm:$0xff] %vm29_vm2, %v360_v55 }
  0xf5   :  { %572 = vrot.lane.b32.xlu2 %v436_v54, %s1798_s3  ;;  %v642_v53 = vld [vmem:[%s2843_s4 + $0x8] sm:$0xff]  ;;  %799 = vmatpush.msra.mxu2 %v643_v51  ;;  %v641_v55 = vld [vmem:[%s2843_s4] sm:$0xff] }
  0xf6   :  { %1780 = vmatpush.msrb.mxu3 %v643_v51 }
  0xf7   :  { %800 = vmatpush.msra.mxu2 %v642_v53 }
  0xf8   :  { %v263_v56 = vpop.f32.mrf.mxu0  ;;  %1781 = vmatpush.msrb.mxu3 %v642_v53 }
  0xf9   :  { %v264_v58 = vadd.f32 %v2011_v34, %v263_v56  ;;  %801 = vmatpush.msra.mxu2 %v641_v55  ;;  %v222_v56 = vadd.f32 %v2011_v34, %v1934_v23  ;;  %v219_v23 = vadd.f32 %v2011_v34, %v1932_v22 }
  0xfa   :  { %1782 = vmatpush.msrb.mxu3 %v641_v55 }
  0xfb   :  { %v361_v60 = vsel %vm80_vm3, %v264_v58, %v329_v57  ;;  %v417_v61 = vld [vmem:[#allocation2 + $0x111] sm:$0xff]  ;;  %v396_v58 = vld [vmem:[#allocation2 + $0x100] sm:$0xff] }
  0xfc   :  { %378 = vst.msk [vmem:[#allocation2 + $0x121] sm:$0xff] %vm29_vm2, %v361_v60  ;;  %298 = vrot.lane.b32.xlu0 %v266_v59, %s1796_s28  ;;  %v437_v62 = vld [vmem:[#allocation2 + $0x112] sm:$0xff]  ;;  %494 = vrot.lane.b32.xlu1 %v417_v61, %s1799_s27 }
  0xfd   :  { %574 = vrot.lane.b32.xlu2 %v437_v62, %s1798_s3 }
 0x103   :  { %v438_v63 = vld [vmem:[#allocation2 + $0x122] sm:$0xff] }
 0x104   :  { %576 = vrot.lane.b32.xlu0 %v438_v63, %s1798_s3  ;;  %v418_v1 = vld [vmem:[#allocation2 + $0x121] sm:$0xff]  ;;  %302 = vrot.lane.b32.xlu1 %v268_v0, %s1796_s28 }
 0x105   :  { %496 = vrot.lane.b32.xlu2 %v418_v1, %s1799_s27  ;;  %v398_v10 = vld [vmem:[#allocation2 + $0x120] sm:$0xff] }
 0x10c   :  { %568 = vrot.lane.b32.xlu0 %v434_v2, %s1798_s3  ;;  %304 = vrot.lane.b32.xlu1 %v269_v3, %s1796_s28 }
 0x10d   :  { %488 = vrot.lane.b32.xlu2 %v414_v4, %s1799_s27  ;;  %v234_v4 = vadd.f32 %v2011_v34, %v1942_v27 }
 0x114   :  { %310 = vrot.lane.b32.xlu0 %v272_v5, %s1796_s28  ;;  %306 = vrot.lane.b32.xlu1 %v270_v6, %s1796_s28  ;;  %v397_v5 = vld [vmem:[#allocation2 + $0x110] sm:$0xff] }
 0x115   :  { %308 = vrot.lane.b32.xlu2 %v271_v7, %s1796_s28 }
 0x11c   :  { %312 = vrot.lane.b32.xlu0 %v273_v8, %s1796_s28  ;;  %460 = vrot.lane.b32.xlu1 %v400_v35, %s1799_s27 }
 0x11d   :  { %540 = vrot.lane.b32.xlu2 %v420_v36, %s1798_s3 }
 0x147   :  { %v491_v21 = vpop.permute.xlu2 %490 }
 0x148   :  { %v615_v49 = vsel %vm29_vm2, %v395_v48, %v491_v21 }
 0x14f   :  { %v573_v40 = vpop.permute.xlu2 %572 }
 0x157   :  { %v575_v45 = vpop.permute.xlu2 %574 }
 0x15e   :  { %v571_v50 = vpop.permute.xlu0 %570 }
 0x15f   :  { %v2198_v52 = vsel %vm620_vm4, %v615_v49, %v571_v50  ;;  %v497_v54 = vpop.permute.xlu2 %496  ;;  %v276_v49 = vld [vmem:[%s2842_s1 + $0x50] sm:$0xff] }
 0x160   :  { %1651 = vmatmul.msk.f32.vlgmr.msra.gmra.mxu3 %vm666_vm5, %v2198_v52  ;;  %v618_v14 = vsel %vm29_vm2, %v398_v10, %v497_v54  ;;  %v1672_v10 = vld [vmem:[%s2843_s4 + $0xc8] sm:$0xff] }
 0x166   :  { %v493_v57 = vpop.permute.xlu1 %492  ;;  %v301_v59 = vpop.permute.xlu0 %300 }
 0x167   :  { %v616_v60 = vsel %vm29_vm2, %v396_v58, %v493_v57  ;;  %v347_v61 = vsel %vm80_vm3, %v222_v56, %v301_v59  ;;  %v489_v63 = vpop.permute.xlu2 %488  ;;  %v409_v58 = vld [vmem:[#allocation2 + $0x91] sm:$0xff] }
 0x168   :  { %364 = vst.msk [vmem:[#allocation2 + $0x21] sm:$0xff] %vm29_vm2, %v347_v61  ;;  %v2214_v62 = vsel %vm620_vm4, %v616_v60, %v573_v40  ;;  %v614_v21 = vsel %vm29_vm2, %v394_v19, %v489_v63  ;;  %v274_v40 = vld [vmem:[%s2842_s1 + $0x40] sm:$0xff]  ;;  %v429_v59 = vld [vmem:[#allocation2 + $0x92] sm:$0xff]  ;;  %v1680_v63 = vld [vmem:[%s2843_s4 + $0x108] sm:$0xff] }
 0x169   :  { %1652 = vmatmul.msk.f32.gmra.mxu3 %vm666_vm5, %v2214_v62  ;;  %v1682_v60 = vld [vmem:[%s2843_s4 + $0x118] sm:$0xff]  ;;  %v1681_v61 = vld [vmem:[%s2843_s4 + $0x110] sm:$0xff] }
 0x16a   :  { %874 = vmatpush.msra.mxu3 %v1682_v60 }
 0x16c   :  { %875 = vmatpush.msra.mxu3 %v1681_v61 }
 0x16e   :  { %v299_v0 = vpop.permute.xlu0 %298  ;;  %v495_v6 = vpop.permute.xlu1 %494  ;;  %876 = vmatpush.msra.mxu3 %v1680_v63 }
 0x16f   :  { %v346_v1 = vsel %vm80_vm3, %v219_v23, %v299_v0  ;;  %v422_v2 = vld [vmem:[#allocation2 + $0x22] sm:$0xff]  ;;  %v309_v7 = vpop.permute.xlu2 %308  ;;  %v617_v8 = vsel %vm29_vm2, %v397_v5, %v495_v6  ;;  %v1678_v0 = vld [vmem:[%s2843_s4 + $0xf8] sm:$0xff] }
 0x170   :  { %v402_v3 = vld [vmem:[#allocation2 + $0x21] sm:$0xff]  ;;  %363 = vst.msk [vmem:[#allocation2 + $0x11] sm:$0xff] %vm29_vm2, %v346_v1  ;;  %544 = vrot.lane.b32.xlu2 %v422_v2, %s1798_s3  ;;  %v351_v22 = vsel %vm80_vm3, %v234_v4, %v309_v7  ;;  %v2230_v9 = vsel %vm620_vm4, %v617_v8, %v575_v45  ;;  %v1677_v1 = vld [vmem:[%s2843_s4 + $0xf0] sm:$0xff]  ;;  %v1674_v8 = vld [vmem:[%s2843_s4 + $0xd8] sm:$0xff] }
 0x171   :  { %464 = vrot.lane.b32.xlu1 %v402_v3, %s1799_s27  ;;  %368 = vst.msk [vmem:[#allocation2 + $0x61] sm:$0xff] %vm29_vm2, %v351_v22  ;;  %1653 = vmatmul.msk.f32.gmra.mxu3 %vm666_vm5, %v2230_v9  ;;  %v1679_v23 = vld [vmem:[%s2843_s4 + $0x100] sm:$0xff]  ;;  %v1676_v2 = vld [vmem:[%s2843_s4 + $0xe8] sm:$0xff] }
 0x172   :  { %877 = vmatpush.msra.mxu3 %v1679_v23  ;;  %v380_v3 = vld [vmem:[#allocation2] sm:$0xff] }
 0x173   :  { %v1675_v7 = vld [vmem:[%s2843_s4 + $0xe0] sm:$0xff] }
 0x174   :  { %878 = vmatpush.msra.mxu3 %v1678_v0 }
 0x176   :  { %v577_v27 = vpop.permute.xlu0 %576  ;;  %v303_v15 = vpop.permute.xlu1 %302  ;;  %879 = vmatpush.msra.mxu3 %v1677_v1  ;;  %v439_v1 = vld [vmem:[#allocation2 + $0x132] sm:$0xff] }
 0x177   :  { %v421_v11 = vld [vmem:[#allocation2 + $0x12] sm:$0xff]  ;;  %v2240_v16 = vsel %vm620_vm4, %v618_v14, %v577_v27  ;;  %v348_v17 = vsel %vm80_vm3, %v225_v13, %v303_v15  ;;  %v541_v5 = vpop.permute.xlu2 %540  ;;  %v410_v13 = vld [vmem:[#allocation2 + $0xa1] sm:$0xff] }
 0x178   :  { %v401_v12 = vld [vmem:[#allocation2 + $0x11] sm:$0xff]  ;;  %365 = vst.msk [vmem:[#allocation2 + $0x31] sm:$0xff] %vm29_vm2, %v348_v17  ;;  %v406_v29 = vld [vmem:[#allocation2 + $0x61] sm:$0xff]  ;;  %880 = vmatpush.msra.mxu3 %v1676_v2 }
 0x179   :  { %542 = vrot.lane.b32.xlu1 %v421_v11, %s1798_s3  ;;  %462 = vrot.lane.b32.xlu0 %v401_v12, %s1799_s27  ;;  %v426_v54 = vld [vmem:[#allocation2 + $0x62] sm:$0xff]  ;;  %v1673_v27 = vld [vmem:[%s2843_s4 + $0xd0] sm:$0xff] }
 0x17a   :  { %1654 = vmatmul.msk.f32.gmra.mxu3 %vm666_vm5, %v2240_v16  ;;  %v1671_v11 = vld [vmem:[%s2843_s4 + $0xc0] sm:$0xff]  ;;  %v419_v2 = vld [vmem:[#allocation2 + $0x131] sm:$0xff] }
 0x17b   :  { %881 = vmatpush.msra.mxu3 %v1675_v7  ;;  %v430_v15 = vld [vmem:[#allocation2 + $0xa2] sm:$0xff] }
 0x17d   :  { %882 = vmatpush.msra.mxu3 %v1674_v8 }
 0x17e   :  { %v569_v18 = vpop.permute.xlu0 %568  ;;  %v305_v35 = vpop.permute.xlu1 %304 }
 0x17f   :  { %v2254_v36 = vsel %vm620_vm4, %v614_v21, %v569_v18  ;;  %v349_v37 = vsel %vm80_vm3, %v228_v20, %v305_v35  ;;  %v403_v38 = vld [vmem:[#allocation2 + $0x31] sm:$0xff]  ;;  %883 = vmatpush.msra.mxu3 %v1673_v27 }
 0x180   :  { %v423_v39 = vld [vmem:[#allocation2 + $0x32] sm:$0xff]  ;;  %366 = vst.msk [vmem:[#allocation2 + $0x41] sm:$0xff] %vm29_vm2, %v349_v37  ;;  %466 = vrot.lane.b32.xlu2 %v403_v38, %s1799_s27 }
 0x181   :  { %316 = vrot.lane.b32.xlu1 %v275_v24, %s1796_s28  ;;  %546 = vrot.lane.b32.xlu0 %v423_v39, %s1798_s3  ;;  %v382_v24 = vld [vmem:[#allocation2 + $0x20] sm:$0xff]  ;;  %v381_v38 = vld [vmem:[#allocation2 + $0x10] sm:$0xff] }
 0x182   :  { %1667 = vmatmul.msk.f32.vlgmr.msrb.gmra.mxu3 %vm666_vm5, %v2254_v36 }
 0x183   :  { %884 = vmatpush.msra.mxu3 %v1672_v10 }
 0x185   :  { %885 = vmatpush.msra.mxu3 %v1671_v11 }
 0x186   :  { %v311_v41 = vpop.permute.xlu0 %310  ;;  %v307_v44 = vpop.permute.xlu1 %306 }
 0x187   :  { %v352_v42 = vsel %vm80_vm3, %v237_v25, %v311_v41  ;;  %v350_v45 = vsel %vm80_vm3, %v231_v43, %v307_v44  ;;  %v404_v46 = vld [vmem:[#allocation2 + $0x41] sm:$0xff]  ;;  %v249_v25 = vadd.f32 %v2011_v34, %v1992_v33  ;;  %v246_v44 = vadd.f32 %v2011_v34, %v1974_v32  ;;  %v383_v33 = vld [vmem:[#allocation2 + $0x30] sm:$0xff] }
 0x188   :  { %369 = vst.msk [vmem:[#allocation2 + $0x71] sm:$0xff] %vm29_vm2, %v352_v42  ;;  %v424_v47 = vld [vmem:[#allocation2 + $0x42] sm:$0xff]  ;;  %468 = vrot.lane.b32.xlu2 %v404_v46, %s1799_s27  ;;  %v243_v32 = vadd.f32 %v2011_v34, %v1956_v31 }
 0x189   :  { %314 = vrot.lane.b32.xlu1 %v274_v40, %s1796_s28  ;;  %367 = vst.msk [vmem:[#allocation2 + $0x51] sm:$0xff] %vm29_vm2, %v350_v45  ;;  %548 = vrot.lane.b32.xlu0 %v424_v47, %s1798_s3 }
 0x18a   :  { %1668 = vmatmul.msk.f32.gmra.mxu3 %vm666_vm5, %v2198_v52 }
 0x18e   :  { %v313_v28 = vpop.permute.xlu0 %312  ;;  %v461_v4 = vpop.permute.xlu1 %460 }
 0x18f   :  { %v353_v48 = vsel %vm80_vm3, %v240_v26, %v313_v28  ;;  %v407_v53 = vld [vmem:[#allocation2 + $0x71] sm:$0xff]  ;;  %v600_v6 = vsel %vm29_vm2, %v380_v3, %v461_v4 }
 0x190   :  { %370 = vst.msk [vmem:[#allocation2 + $0x81] sm:$0xff] %vm29_vm2, %v353_v48  ;;  %v425_v50 = vld [vmem:[#allocation2 + $0x52] sm:$0xff]  ;;  %318 = vrot.lane.b32.xlu2 %v276_v49, %s1796_s28  ;;  %v621_v22 = vsel %vm620_vm4, %v600_v6, %v541_v5  ;;  %v386_v5 = vld [vmem:[#allocation2 + $0x60] sm:$0xff] }
 0x191   :  { %v405_v51 = vld [vmem:[#allocation2 + $0x51] sm:$0xff]  ;;  %550 = vrot.lane.b32.xlu1 %v425_v50, %s1798_s3  ;;  %1655 = vmatmul.msk.f32.vlgmr.msra.gmra.mxu2 %vm666_vm5, %v621_v22 }
 0x192   :  { %470 = vrot.lane.b32.xlu0 %v405_v51, %s1799_s27  ;;  %1669 = vmatmul.msk.f32.gmra.mxu3 %vm666_vm5, %v2214_v62  ;;  %v427_v55 = vld [vmem:[#allocation2 + $0x72] sm:$0xff] }
 0x193   :  { %v385_v60 = vld [vmem:[#allocation2 + $0x50] sm:$0xff] }
 0x194   :  { %v387_v10 = vld [vmem:[#allocation2 + $0x70] sm:$0xff] }
 0x197   :  { %v428_v56 = vld [vmem:[#allocation2 + $0x82] sm:$0xff] }
 0x198   :  { %472 = vrot.lane.b32.xlu2 %v406_v29, %s1799_s27  ;;  %v408_v57 = vld [vmem:[#allocation2 + $0x81] sm:$0xff] }
 0x199   :  { %474 = vrot.lane.b32.xlu1 %v407_v53, %s1799_s27  ;;  %v384_v53 = vld [vmem:[#allocation2 + $0x40] sm:$0xff] }
 0x19a   :  { %552 = vrot.lane.b32.xlu0 %v426_v54, %s1798_s3  ;;  %1670 = vmatmul.msk.f32.gmra.mxu3 %vm666_vm5, %v2230_v9 }
 0x1a0   :  { %554 = vrot.lane.b32.xlu2 %v427_v55, %s1798_s3 }
 0x1a1   :  { %556 = vrot.lane.b32.xlu1 %v428_v56, %s1798_s3 }
 0x1a2   :  { %476 = vrot.lane.b32.xlu0 %v408_v57, %s1799_s27 }
 0x1a8   :  { %478 = vrot.lane.b32.xlu2 %v409_v58, %s1799_s27 }
 0x1a9   :  { %480 = vrot.lane.b32.xlu1 %v410_v13, %s1799_s27 }
 0x1aa   :  { %558 = vrot.lane.b32.xlu0 %v429_v59, %s1798_s3 }
 0x1b0   :  { %560 = vrot.lane.b32.xlu2 %v430_v15, %s1798_s3 }
 0x1ca   :  { %v545_v12 = vpop.permute.xlu2 %544 }
 0x1da   :  { %v467_v14 = vpop.permute.xlu2 %466 }
 0x1db   :  { %v603_v47 = vsel %vm29_vm2, %v383_v33, %v467_v14 }
 0x1e2   :  { %v469_v21 = vpop.permute.xlu2 %468 }
 0x1e3   :  { %v465_v17 = vpop.permute.xlu1 %464  ;;  %v2342_v19 = vpop.f32.mrf.mxu3  ;;  %v604_v54 = vsel %vm29_vm2, %v384_v53, %v469_v21 }
 0x1e4   :  { %v602_v18 = vsel %vm29_vm2, %v382_v24, %v465_v17  ;;  %v388_v24 = vld [vmem:[#allocation2 + $0x80] sm:$0xff] }
 0x1e5   :  { %v623_v20 = vsel %vm620_vm4, %v602_v18, %v545_v12 }
 0x1e6   :  { %1683 = vmatmul.msk.f32.vlgmr.msra.gmra.mxu3 %vm666_vm5, %v623_v20 }
 0x1ea   :  { %v319_v41 = vpop.permute.xlu2 %318 }
 0x1eb   :  { %v543_v35 = vpop.permute.xlu1 %542  ;;  %v463_v37 = vpop.permute.xlu0 %462  ;;  %v356_v43 = vsel %vm80_vm3, %v249_v25, %v319_v41 }
 0x1ec   :  { %v601_v39 = vsel %vm29_vm2, %v381_v38, %v463_v37  ;;  %v2350_v42 = vpop.f32.mrf.mxu3  ;;  %373 = vst.msk [vmem:[#allocation2 + $0xd1] sm:$0xff] %vm29_vm2, %v356_v43 }
 0x1ed   :  { %v622_v40 = vsel %vm620_vm4, %v601_v39, %v543_v35  ;;  %v389_v35 = vld [vmem:[#allocation2 + $0x90] sm:$0xff] }
 0x1ee   :  { %1639 = vmatmul.msk.f32.vlgmr.msra.gmra.mxu1 %vm666_vm5, %v622_v40  ;;  %1656 = vmatmul.msk.f32.gmra.mxu2 %vm666_vm5, %v622_v40  ;;  %v390_v40 = vld [vmem:[#allocation2 + $0xa0] sm:$0xff] }
 0x1f2   :  { %v473_v3 = vpop.permute.xlu2 %472 }
 0x1f3   :  { %v317_v45 = vpop.permute.xlu1 %316  ;;  %v547_v26 = vpop.permute.xlu0 %546  ;;  %v413_v56 = vld [vmem:[#allocation2 + $0xd1] sm:$0xff]  ;;  %v606_v6 = vsel %vm29_vm2, %v386_v5, %v473_v3 }
 0x1f4   :  { %v355_v46 = vsel %vm80_vm3, %v246_v44, %v317_v45  ;;  %v624_v28 = vsel %vm620_vm4, %v603_v47, %v547_v26  ;;  %v774_v48 = vpop.f32.mrf.mxu3  ;;  %v433_v4 = vld [vmem:[#allocation2 + $0xd2] sm:$0xff]  ;;  %v1024_v47 = vld [vmem:[#allocation3 + $0x1] sm:$0xff] }
 0x1f5   :  { %372 = vst.msk [vmem:[#allocation2 + $0xc1] sm:$0xff] %vm29_vm2, %v355_v46  ;;  %1684 = vmatmul.msk.f32.gmra.mxu3 %vm666_vm5, %v624_v28 }
 0x1f6   :  { %1640 = vmatmul.msk.f32.gmra.mxu1 %vm666_vm5, %v623_v20  ;;  %1657 = vmatmul.msk.f32.gmra.mxu2 %vm666_vm5, %v623_v20 }
 0x1fa   :  { %v555_v12 = vpop.permute.xlu2 %554 }
 0x1fb   :  { %v315_v49 = vpop.permute.xlu1 %314  ;;  %v549_v55 = vpop.permute.xlu0 %548 }
 0x1fc   :  { %v354_v50 = vsel %vm80_vm3, %v243_v32, %v315_v49  ;;  %v432_v51 = vld [vmem:[#allocation2 + $0xc2] sm:$0xff]  ;;  %v625_v31 = vsel %vm620_vm4, %v604_v54, %v549_v55 }
 0x1fd   :  { %v412_v29 = vld [vmem:[#allocation2 + $0xc1] sm:$0xff]  ;;  %371 = vst.msk [vmem:[#allocation2 + $0xb1] sm:$0xff] %vm29_vm2, %v354_v50  ;;  %564 = vrot.lane.b32.xlu1 %v432_v51, %s1798_s3  ;;  %v2375_v34 = vpop.f32.mrf.mxu3  ;;  %1685 = vmatmul.msk.f32.gmra.mxu3 %vm666_vm5, %v625_v31 }
 0x1fe   :  { %484 = vrot.lane.b32.xlu0 %v412_v29, %s1799_s27  ;;  %1641 = vmatmul.msk.f32.gmra.mxu1 %vm666_vm5, %v624_v28  ;;  %v392_v29 = vld [vmem:[#allocation2 + $0xc0] sm:$0xff] }
 0x1ff   :  { %1658 = vmatmul.msk.f32.gmra.mxu2 %vm666_vm5, %v624_v28 }
 0x202   :  { %v479_v37 = vpop.permute.xlu2 %478 }
 0x203   :  { %v551_v59 = vpop.permute.xlu1 %550  ;;  %v609_v38 = vsel %vm29_vm2, %v389_v35, %v479_v37 }
 0x204   :  { %v411_v57 = vld [vmem:[#allocation2 + $0xb1] sm:$0xff]  ;;  %v471_v61 = vpop.permute.xlu0 %470 }
 0x205   :  { %v431_v58 = vld [vmem:[#allocation2 + $0xb2] sm:$0xff]  ;;  %486 = vrot.lane.b32.xlu1 %v413_v56, %s1799_s27  ;;  %482 = vrot.lane.b32.xlu2 %v411_v57, %s1799_s27  ;;  %v605_v63 = vsel %vm29_vm2, %v385_v60, %v471_v61  ;;  %v2384_v23 = vpop.f32.mrf.mxu3 }
 0x206   :  { %562 = vrot.lane.b32.xlu0 %v431_v58, %s1798_s3  ;;  %1642 = vmatmul.msk.f32.gmra.mxu1 %vm666_vm5, %v625_v31  ;;  %v626_v0 = vsel %vm620_vm4, %v605_v63, %v551_v59  ;;  %v391_v59 = vld [vmem:[#allocation2 + $0xb0] sm:$0xff] }
 0x207   :  { %1659 = vmatmul.msk.f32.gmra.mxu2 %vm666_vm5, %v625_v31  ;;  %1686 = vmatmul.msk.f32.gmra.mxu3 %vm666_vm5, %v626_v0  ;;  %v393_v60 = vld [vmem:[#allocation2 + $0xd0] sm:$0xff] }
 0x20a   :  { %v561_v44 = vpop.permute.xlu2 %560 }
 0x20b   :  { %v475_v27 = vpop.permute.xlu1 %474 }
 0x20c   :  { %v553_v7 = vpop.permute.xlu0 %552  ;;  %v607_v11 = vsel %vm29_vm2, %v387_v10, %v475_v27 }
 0x20d   :  { %566 = vrot.lane.b32.xlu2 %v433_v4, %s1798_s3  ;;  %578 = vrot.lane.b32.xlu1 %v439_v1, %s1798_s3  ;;  %v2394_v8 = vpop.f32.mrf.mxu3  ;;  %v627_v22 = vsel %vm620_vm4, %v606_v6, %v553_v7  ;;  %v628_v15 = vsel %vm620_vm4, %v607_v11, %v555_v12 }
 0x20e   :  { %1643 = vmatmul.msk.f32.gmra.mxu1 %vm666_vm5, %v626_v0  ;;  %498 = vrot.lane.b32.xlu0 %v419_v2, %s1799_s27 }
 0x20f   :  { %1660 = vmatmul.msk.f32.gmra.mxu2 %vm666_vm5, %v626_v0  ;;  %1687 = vmatmul.msk.f32.gmra.mxu3 %vm666_vm5, %v627_v22 }
 0x213   :  { %v557_v18 = vpop.permute.xlu1 %556 }
 0x214   :  { %v477_v17 = vpop.permute.xlu0 %476  ;;  %v803_v33 = vpop.f32.mrf.mxu2 }
 0x215   :  { %v845_v13 = vpop.f32.mrf.mxu3  ;;  %v608_v20 = vsel %vm29_vm2, %v388_v24, %v477_v17  ;;  %1084 = vrot.lane.b32.xlu1 %v1024_v47, %s1796_s28 }
 0x216   :  { %1644 = vmatmul.msk.f32.gmra.mxu1 %vm666_vm5, %v627_v22  ;;  %v2401_v14 = vadd.f32 %v845_v13, %v774_v48  ;;  %v629_v21 = vsel %vm620_vm4, %v608_v20, %v557_v18  ;;  %v2461_v48 = vld [vmem:[%s2844_s5] ss:$0 sm:$0xff] }
 0x217   :  { %1661 = vmatmul.msk.f32.gmra.mxu2 %vm666_vm5, %v627_v22  ;;  %1688 = vmatmul.msk.f32.gmra.mxu3 %vm666_vm5, %v628_v15 }
 0x21b   :  { %v481_v41 = vpop.permute.xlu1 %480 }
 0x21c   :  { %v559_v39 = vpop.permute.xlu0 %558  ;;  %v610_v43 = vsel %vm29_vm2, %v390_v40, %v481_v41  ;;  %v1044_v40 = vld [vmem:[#allocation3 + $0x2] sm:$0xff] }
 0x21d   :  { %v630_v25 = vsel %vm620_vm4, %v609_v38, %v559_v39  ;;  %v631_v45 = vsel %vm620_vm4, %v610_v43, %v561_v44  ;;  %v2441_v46 = vpop.f32.mrf.mxu3 }
 0x21e   :  { %1645 = vmatmul.msk.f32.gmra.mxu1 %vm666_vm5, %v628_v15 }
 0x21f   :  { %1662 = vmatmul.msk.f32.gmra.mxu2 %vm666_vm5, %v628_v15  ;;  %1689 = vmatmul.msk.f32.gmra.mxu3 %vm666_vm5, %v629_v21 }
 0x226   :  { %1646 = vmatmul.msk.f32.gmra.mxu1 %vm666_vm5, %v629_v21 }
 0x227   :  { %1690 = vmatmul.msk.f32.gmra.mxu3 %vm666_vm5, %v630_v25  ;;  %1663 = vmatmul.msk.f32.gmra.mxu2 %vm666_vm5, %v631_v45 }
 0x25f   :  { %v483_v49 = vpop.permute.xlu2 %482 }
 0x260   :  { %v611_v63 = vsel %vm29_vm2, %v391_v59, %v483_v49 }
 0x267   :  { %v567_v0 = vpop.permute.xlu2 %566 }
 0x269   :  { %v887_v32 = vpop.f32.mrf.mxu3 }
 0x26b   :  { %v732_v26 = vpop.f32.mrf.mxu1 }
 0x26c   :  { %v804_v28 = vadd.f32 %v803_v33, %v732_v26 }
 0x26e   :  { %v935_v50 = vadd.f32 %v887_v32, %v804_v28 }
 0x26f   :  { %v565_v51 = vpop.permute.xlu1 %564 }
 0x270   :  { %v485_v53 = vpop.permute.xlu0 %484  ;;  %v954_v54 = vadd.f32 %v2461_v48, %v935_v50 }
 0x271   :  { %v612_v55 = vsel %vm29_vm2, %v392_v29, %v485_v53  ;;  %v806_v31 = vpop.f32.mrf.mxu2 }
 0x272   :  { %v633_v56 = vsel %vm620_vm4, %v612_v55, %v565_v51  ;;  %v970_v57 = vmax.f32 %v954_v54, 0.0 }
 0x273   :  { %1691 = vmatmul.msk.f32.gmra.mxu3 %vm666_vm5, %v633_v56  ;;  %v735_v58 = vpop.f32.mrf.mxu1 }
 0x274   :  { %987 = vst.msk [vmem:[#allocation3 + $0x11] sm:$0xff] %vm80_vm3, %v970_v57  ;;  %v807_v6 = vadd.f32 %v806_v31, %v735_v58 }
 0x277   :  { %v487_v61 = vpop.permute.xlu1 %486 }
 0x278   :  { %v613_v1 = vsel %vm29_vm2, %v393_v60, %v487_v61  ;;  %v563_v2 = vpop.permute.xlu0 %562  ;;  %v890_v7 = vpop.f32.mrf.mxu3 }
 0x279   :  { %v632_v3 = vsel %vm620_vm4, %v611_v63, %v563_v2  ;;  %v809_v4 = vpop.f32.mrf.mxu2  ;;  %v634_v5 = vsel %vm620_vm4, %v613_v1, %v567_v0  ;;  %v936_v27 = vadd.f32 %v890_v7, %v807_v6  ;;  %v1704_v63 = vld [vmem:[%s2845_s6 + $0x58] sm:$0xff] }
 0x27a   :  { %1647 = vmatmul.msk.f32.gmra.mxu1 %vm666_vm5, %v632_v3  ;;  %1664 = vmatmul.msk.f32.gmra.mxu2 %vm666_vm5, %v632_v3 }
 0x27b   :  { %1692 = vmatmul.msk.f32.gmra.mxu3 %vm666_vm5, %v634_v5  ;;  %v738_v22 = vpop.f32.mrf.mxu1  ;;  %v955_v10 = vadd.f32 %v2461_v48, %v936_v27  ;;  %v1025_v49 = vld [vmem:[#allocation3 + $0x11] sm:$0xff]  ;;  %1336 = vmatpush.msrb.mxu0 %v1704_v63 }
 0x27c   :  { %v810_v12 = vadd.f32 %v809_v4, %v738_v22  ;;  %v1045_v51 = vld [vmem:[#allocation3 + $0x12] sm:$0xff]  ;;  %1783 = vmatpush.msrb.mxu3 %v1704_v63 }
 0x27d   :  { %v971_v11 = vmax.f32 %v955_v10, 0.0 }
 0x27f   :  { %988 = vst.msk [vmem:[#allocation3 + $0x21] sm:$0xff] %vm80_vm3, %v971_v11  ;;  %v579_v3 = vpop.permute.xlu1 %578 }
 0x280   :  { %v893_v15 = vpop.f32.mrf.mxu3  ;;  %v499_v61 = vpop.permute.xlu0 %498 }
 0x281   :  { %v937_v24 = vadd.f32 %v893_v15, %v810_v12 }
 0x282   :  { %1648 = vmatmul.msk.f32.gmra.mxu1 %vm666_vm5, %v633_v56  ;;  %v812_v13 = vpop.f32.mrf.mxu2  ;;  %1665 = vmatmul.msk.f32.gmra.mxu2 %vm666_vm5, %v633_v56 }
 0x283   :  { %1693 = vmatmul.msk.f32.gmra.mxu3 %vm666_vm5, %v2254_v36  ;;  %v741_v17 = vpop.f32.mrf.mxu1  ;;  %v956_v18 = vadd.f32 %v2461_v48, %v937_v24 }
 0x284   :  { %v813_v37 = vadd.f32 %v812_v13, %v741_v17 }
 0x285   :  { %v972_v20 = vmax.f32 %v956_v18, 0.0 }
 0x286   :  { %v1046_v21 = vld [vmem:[#allocation3 + $0x22] sm:$0xff] }
 0x287   :  { %v1026_v35 = vld [vmem:[#allocation3 + $0x21] sm:$0xff]  ;;  %989 = vst.msk [vmem:[#allocation3 + $0x31] sm:$0xff] %vm80_vm3, %v972_v20  ;;  %1168 = vrot.lane.b32.xlu0 %v1046_v21, %s1799_s27  ;;  %v1053_v21 = vld [vmem:[#allocation3 + $0x92] sm:$0xff] }
 0x288   :  { %1088 = vrot.lane.b32.xlu2 %v1026_v35, %s1796_s28  ;;  %v1033_v35 = vld [vmem:[#allocation3 + $0x91] sm:$0xff] }
 0x28a   :  { %1649 = vmatmul.msk.f32.gmra.mxu1 %vm666_vm5, %v634_v5  ;;  %1666 = vmatmul.msk.f32.gmra.mxu2 %vm666_vm5, %v634_v5  ;;  %v815_v38 = vpop.f32.mrf.mxu2  ;;  %v896_v39 = vpop.f32.mrf.mxu3 }
 0x28b   :  { %v744_v30 = vpop.f32.mrf.mxu1  ;;  %1694 = vmatmul.msk.f32.gmra.mxu3 %vm666_vm5, %v2198_v52  ;;  %v938_v25 = vadd.f32 %v896_v39, %v813_v37  ;;  %v1269_v37 = vld [vmem:[%s2845_s6 + $0x28] sm:$0xff]  ;;  %v1740_v39 = vld [vmem:[%s2845_s6 + $0x78] sm:$0xff] }
 0x28c   :  { %v816_v52 = vadd.f32 %v815_v38, %v744_v30  ;;  %v1742_v30 = vld [vmem:[%s2845_s6 + $0x88] sm:$0xff]  ;;  %1407 = vmatpush.msrb.mxu1 %v1269_v37  ;;  %v1741_v38 = vld [vmem:[%s2845_s6 + $0x80] sm:$0xff] }
 0x28d   :  { %v957_v41 = vadd.f32 %v2461_v48, %v938_v25  ;;  %1485 = vmatpush.msrb.mxu2 %v1742_v30  ;;  %v1703_v25 = vld [vmem:[%s2845_s6 + $0x50] sm:$0xff] }
 0x28e   :  { %v1047_v43 = vld [vmem:[#allocation3 + $0x32] sm:$0xff]  ;;  %1337 = vmatpush.msrb.mxu0 %v1703_v25  ;;  %1784 = vmatpush.msrb.mxu3 %v1703_v25 }
 0x28f   :  { %v1027_v44 = vld [vmem:[#allocation3 + $0x31] sm:$0xff]  ;;  %v973_v45 = vmax.f32 %v957_v41, 0.0  ;;  %1170 = vrot.lane.b32.xlu1 %v1047_v43, %s1799_s27  ;;  %1486 = vmatpush.msrb.mxu2 %v1741_v38  ;;  %v1738_v41 = vld [vmem:[%s2845_s6 + $0x68] sm:$0xff]  ;;  %v1268_v43 = vld [vmem:[%s2845_s6 + $0x20] sm:$0xff] }
 0x290   :  { %1164 = vrot.lane.b32.xlu2 %v1044_v40, %s1799_s27  ;;  %1090 = vrot.lane.b32.xlu0 %v1027_v44, %s1796_s28  ;;  %v1739_v40 = vld [vmem:[%s2845_s6 + $0x70] sm:$0xff]  ;;  %v1737_v44 = vld [vmem:[%s2845_s6 + $0x60] sm:$0xff] }
 0x291   :  { %990 = vst.msk [vmem:[#allocation3 + $0x41] sm:$0xff] %vm80_vm3, %v973_v45  ;;  %1487 = vmatpush.msrb.mxu2 %v1740_v39  ;;  %1408 = vmatpush.msrb.mxu1 %v1268_v43  ;;  %v1267_v45 = vld [vmem:[%s2845_s6 + $0x18] sm:$0xff] }
 0x292   :  { %1650 = vmatmul.msk.f32.gmra.mxu1 %vm666_vm5, %v2254_v36  ;;  %v899_v33 = vpop.f32.mrf.mxu3  ;;  %v818_v28 = vpop.f32.mrf.mxu2 }
 0x293   :  { %1695 = vmatmul.msk.f32.gmra.mxu3 %vm666_vm5, %v2214_v62  ;;  %v747_v47 = vpop.f32.mrf.mxu1  ;;  %v939_v26 = vadd.f32 %v899_v33, %v816_v52  ;;  %1488 = vmatpush.msrb.mxu2 %v1739_v40  ;;  %v1266_v52 = vld [vmem:[%s2845_s6 + $0x10] sm:$0xff] }
 0x294   :  { %v819_v29 = vadd.f32 %v818_v28, %v747_v47  ;;  %1409 = vmatpush.msrb.mxu1 %v1267_v45  ;;  %v1265_v47 = vld [vmem:[%s2845_s6 + $0x8] sm:$0xff]  ;;  %v1004_v28 = vld [vmem:[#allocation3] sm:$0xff] }
 0x295   :  { %v958_v32 = vadd.f32 %v2461_v48, %v939_v26  ;;  %1489 = vmatpush.msrb.mxu2 %v1738_v41  ;;  %v1264_v26 = vld [vmem:[%s2845_s6] sm:$0xff] }
 0x296   :  { %1410 = vmatpush.msrb.mxu1 %v1266_v52 }
 0x297   :  { %v974_v50 = vmax.f32 %v958_v32, 0.0  ;;  %1490 = vmatpush.msrb.mxu2 %v1737_v44  ;;  %v1702_v32 = vld [vmem:[%s2845_s6 + $0x48] sm:$0xff] }
 0x298   :  { %1086 = vrot.lane.b32.xlu2 %v1025_v49, %s1796_s28  ;;  %1166 = vrot.lane.b32.xlu0 %v1045_v51, %s1799_s27  ;;  %v1028_v36 = vld [vmem:[#allocation3 + $0x41] sm:$0xff]  ;;  %v1085_v49 = vpop.permute.xlu1 %1084 }
 0x299   :  { %991 = vst.msk [vmem:[#allocation3 + $0x51] sm:$0xff] %vm80_vm3, %v974_v50  ;;  %1092 = vrot.lane.b32.xlu1 %v1028_v36, %s1796_s28  ;;  %v1048_v56 = vld [vmem:[#allocation3 + $0x42] sm:$0xff]  ;;  %1411 = vmatpush.msrb.mxu1 %v1265_v47  ;;  %v1224_v50 = vsel %vm80_vm3, %v1004_v28, %v1085_v49 }
 0x29a   :  { %v902_v62 = vpop.f32.mrf.mxu3  ;;  %v821_v31 = vpop.f32.mrf.mxu2  ;;  %1338 = vmatpush.msrb.mxu0 %v1702_v32  ;;  %1785 = vmatpush.msrb.mxu3 %v1702_v32  ;;  %v1701_v51 = vld [vmem:[%s2845_s6 + $0x40] sm:$0xff] }
 0x29b   :  { %1696 = vmatmul.msk.f32.gmra.mxu3 %vm666_vm5, %v2230_v9  ;;  %v940_v53 = vadd.f32 %v902_v62, %v819_v29  ;;  %v750_v54 = vpop.f32.mrf.mxu1  ;;  %v399_v9 = vld [vmem:[#allocation2 + $0x130] sm:$0xff]  ;;  %1412 = vmatpush.msrb.mxu1 %v1264_v26  ;;  %v1700_v29 = vld [vmem:[%s2845_s6 + $0x38] sm:$0xff]  ;;  %v1008_v39 = vld [vmem:[#allocation3 + $0x40] sm:$0xff] }
 0x29c   :  { %v822_v60 = vadd.f32 %v821_v31, %v750_v54  ;;  %v619_v2 = vsel %vm29_vm2, %v399_v9, %v499_v61  ;;  %1339 = vmatpush.msrb.mxu0 %v1701_v51  ;;  %1786 = vmatpush.msrb.mxu3 %v1701_v51  ;;  %v1034_v54 = vld [vmem:[#allocation3 + $0xa1] sm:$0xff] }
 0x29d   :  { %v959_v55 = vadd.f32 %v2461_v48, %v940_v53  ;;  %v640_v7 = vsel %vm620_vm4, %v619_v2, %v579_v3  ;;  %v1699_v53 = vld [vmem:[%s2845_s6 + $0x30] sm:$0xff]  ;;  %v1054_v49 = vld [vmem:[#allocation3 + $0xa2] sm:$0xff] }
 0x29e   :  { %1340 = vmatpush.msrb.mxu0 %v1700_v29  ;;  %1787 = vmatpush.msrb.mxu3 %v1700_v29 }
 0x29f   :  { %v975_v57 = vmax.f32 %v959_v55, 0.0 }
 0x2a0   :  { %1172 = vrot.lane.b32.xlu2 %v1048_v56, %s1799_s27  ;;  %v1049_v58 = vld [vmem:[#allocation3 + $0x52] sm:$0xff]  ;;  %1341 = vmatpush.msrb.mxu0 %v1699_v53 }
 0x2a1   :  { %v1029_v59 = vld [vmem:[#allocation3 + $0x51] sm:$0xff]  ;;  %992 = vst.msk [vmem:[#allocation3 + $0x61] sm:$0xff] %vm80_vm3, %v975_v57  ;;  %1174 = vrot.lane.b32.xlu1 %v1049_v58, %s1799_s27  ;;  %1788 = vmatpush.msrb.mxu3 %v1699_v53 }
 0x2a2   :  { %1094 = vrot.lane.b32.xlu0 %v1029_v59, %s1796_s28  ;;  %v905_v0 = vpop.f32.mrf.mxu3  ;;  %v824_v22 = vpop.f32.mrf.mxu2  ;;  %v1006_v59 = vld [vmem:[#allocation3 + $0x20] sm:$0xff]  ;;  %v1009_v29 = vld [vmem:[#allocation3 + $0x50] sm:$0xff] }
 0x2a3   :  { %1697 = vmatmul.msk.f32.gmra.mxu3 %vm666_vm5, %v2240_v16  ;;  %v941_v1 = vadd.f32 %v905_v0, %v822_v60  ;;  %v753_v5 = vpop.f32.mrf.mxu1 }
 0x2a4   :  { %v825_v11 = vadd.f32 %v824_v22, %v753_v5 }
 0x2a5   :  { %v960_v4 = vadd.f32 %v2461_v48, %v941_v1 }
 0x2a7   :  { %v976_v6 = vmax.f32 %v960_v4, 0.0 }
 0x2a8   :  { %v1050_v27 = vld [vmem:[#allocation3 + $0x62] sm:$0xff] }
 0x2a9   :  { %v1030_v10 = vld [vmem:[#allocation3 + $0x61] sm:$0xff]  ;;  %993 = vst.msk [vmem:[#allocation3 + $0x71] sm:$0xff] %vm80_vm3, %v976_v6 }
 0x2aa   :  { %1176 = vrot.lane.b32.xlu0 %v1050_v27, %s1799_s27  ;;  %1096 = vrot.lane.b32.xlu2 %v1030_v10, %s1796_s28  ;;  %v908_v16 = vpop.f32.mrf.mxu3  ;;  %v827_v55 = vpop.f32.mrf.mxu2  ;;  %v1007_v10 = vld [vmem:[#allocation3 + $0x30] sm:$0xff] }
 0x2ab   :  { %1698 = vmatmul.msk.f32.gmra.mxu3 %vm666_vm5, %v640_v7  ;;  %v942_v12 = vadd.f32 %v908_v16, %v825_v11 }
 0x2ad   :  { %v961_v13 = vadd.f32 %v2461_v48, %v942_v12 }
 0x2af   :  { %v977_v15 = vmax.f32 %v961_v13, 0.0 }
 0x2b0   :  { %v1051_v17 = vld [vmem:[#allocation3 + $0x72] sm:$0xff] }
 0x2b1   :  { %v1031_v24 = vld [vmem:[#allocation3 + $0x71] sm:$0xff]  ;;  %994 = vst.msk [vmem:[#allocation3 + $0x81] sm:$0xff] %vm80_vm3, %v977_v15 }
 0x2b2   :  { %1178 = vrot.lane.b32.xlu2 %v1051_v17, %s1799_s27  ;;  %1098 = vrot.lane.b32.xlu1 %v1031_v24, %s1796_s28 }
 0x2b8   :  { %v1052_v18 = vld [vmem:[#allocation3 + $0x82] sm:$0xff] }
 0x2b9   :  { %v1032_v20 = vld [vmem:[#allocation3 + $0x81] sm:$0xff] }
 0x2ba   :  { %1180 = vrot.lane.b32.xlu1 %v1052_v18, %s1799_s27  ;;  %1100 = vrot.lane.b32.xlu0 %v1032_v20, %s1796_s28  ;;  %v1005_v20 = vld [vmem:[#allocation3 + $0x10] sm:$0xff] }
 0x2bb   :  { %1102 = vrot.lane.b32.xlu2 %v1033_v35, %s1796_s28 }
 0x2c2   :  { %1182 = vrot.lane.b32.xlu0 %v1053_v21, %s1799_s27 }
 0x2ca   :  { %1104 = vrot.lane.b32.xlu0 %v1034_v54, %s1796_s28 }
 0x2e2   :  { %v1089_v33 = vpop.permute.xlu2 %1088 }
 0x2e3   :  { %v1226_v60 = vsel %vm80_vm3, %v1006_v59, %v1089_v33  ;;  %v1010_v59 = vld [vmem:[#allocation3 + $0x60] sm:$0xff] }
 0x2ea   :  { %v1165_v36 = vpop.permute.xlu2 %1164 }
 0x2eb   :  { %v1244_v62 = vsel %vm29_vm2, %v1224_v50, %v1165_v36  ;;  %v840_v50 = vadd.f32 %v2384_v23, %v2342_v19 }
 0x2ec   :  { %1721 = vmatmul.msk.f32.vlgmr.msrb.gmra.mxu1 %vm1277_vm7, %v1244_v62 }
 0x2f2   :  { %v1087_v22 = vpop.permute.xlu2 %1086 }
 0x2f3   :  { %v1225_v21 = vsel %vm80_vm3, %v1005_v20, %v1087_v22  ;;  %v1012_v20 = vld [vmem:[#allocation3 + $0x80] sm:$0xff] }
 0x2f6   :  { %v911_v31 = vpop.f32.mrf.mxu3 }
 0x2f7   :  { %v756_v56 = vpop.f32.mrf.mxu1 }
 0x2f8   :  { %v828_v57 = vadd.f32 %v827_v55, %v756_v56 }
 0x2f9   :  { %v1169_v61 = vpop.permute.xlu0 %1168 }
 0x2fa   :  { %v943_v58 = vadd.f32 %v911_v31, %v828_v57  ;;  %v1246_v63 = vsel %vm29_vm2, %v1226_v60, %v1169_v61  ;;  %v1173_v25 = vpop.permute.xlu2 %1172  ;;  %v843_v60 = vadd.f32 %v2394_v8, %v2350_v42 }
 0x2fb   :  { %1743 = vmatmul.msk.f32.vlgmr.msrb.gmra.mxu2 %vm1277_vm7, %v1246_v63 }
 0x2fc   :  { %v962_v9 = vadd.f32 %v2461_v48, %v943_v58 }
 0x2fd   :  { %v830_v0 = vpop.f32.mrf.mxu2 }
 0x2fe   :  { %v978_v1 = vmax.f32 %v962_v9, 0.0  ;;  %v914_v2 = vpop.f32.mrf.mxu3 }
 0x2ff   :  { %v759_v3 = vpop.f32.mrf.mxu1 }
 0x300   :  { %995 = vst.msk [vmem:[#allocation3 + $0xb1] sm:$0xff] %vm80_vm3, %v978_v1  ;;  %v831_v4 = vadd.f32 %v830_v0, %v759_v3 }
 0x301   :  { %v1171_v7 = vpop.permute.xlu1 %1170 }
 0x302   :  { %v944_v5 = vadd.f32 %v914_v2, %v831_v4  ;;  %v1091_v27 = vpop.permute.xlu0 %1090 }
 0x303   :  { %v1227_v16 = vsel %vm80_vm3, %v1007_v10, %v1091_v27 }
 0x304   :  { %v963_v6 = vadd.f32 %v2461_v48, %v944_v5  ;;  %v1247_v15 = vsel %vm29_vm2, %v1227_v16, %v1171_v7  ;;  %v1097_v23 = vpop.permute.xlu2 %1096 }
 0x305   :  { %v833_v12 = vpop.f32.mrf.mxu2  ;;  %1744 = vmatmul.msk.f32.gmra.mxu2 %vm1277_vm7, %v1247_v15  ;;  %v1230_v9 = vsel %vm80_vm3, %v1010_v59, %v1097_v23 }
 0x306   :  { %v979_v11 = vmax.f32 %v963_v6, 0.0  ;;  %v917_v13 = vpop.f32.mrf.mxu3  ;;  %v1011_v6 = vld [vmem:[#allocation3 + $0x70] sm:$0xff] }
 0x307   :  { %v762_v17 = vpop.f32.mrf.mxu1  ;;  %v1035_v1 = vld [vmem:[#allocation3 + $0xb1] sm:$0xff] }
 0x308   :  { %996 = vst.msk [vmem:[#allocation3 + $0xc1] sm:$0xff] %vm80_vm3, %v979_v11  ;;  %v834_v24 = vadd.f32 %v833_v12, %v762_v17  ;;  %v1055_v42 = vld [vmem:[#allocation3 + $0xb2] sm:$0xff] }
 0x30a   :  { %v945_v18 = vadd.f32 %v917_v13, %v834_v24  ;;  %v1167_v30 = vpop.permute.xlu0 %1166 }
 0x30b   :  { %v1245_v37 = vsel %vm29_vm2, %v1225_v21, %v1167_v30  ;;  %v1093_v38 = vpop.permute.xlu1 %1092  ;;  %v849_v21 = vadd.f32 %v2441_v46, %v2375_v34 }
 0x30c   :  { %v964_v35 = vadd.f32 %v2461_v48, %v945_v18  ;;  %v1228_v41 = vsel %vm80_vm3, %v1008_v39, %v1093_v38  ;;  %1705 = vmatmul.msk.f32.vlgmr.msrb.gmra.mxu0 %vm1277_vm7, %v1245_v37  ;;  %1722 = vmatmul.msk.f32.gmra.mxu1 %vm1277_vm7, %v1245_v37  ;;  %v1179_v7 = vpop.permute.xlu2 %1178 }
 0x30d   :  { %v836_v52 = vpop.f32.mrf.mxu2  ;;  %v1248_v33 = vsel %vm29_vm2, %v1228_v41, %v1173_v25  ;;  %v1013_v25 = vld [vmem:[#allocation3 + $0x90] sm:$0xff] }
 0x30e   :  { %v980_v40 = vmax.f32 %v964_v35, 0.0  ;;  %v920_v43 = vpop.f32.mrf.mxu3  ;;  %1745 = vmatmul.msk.f32.gmra.mxu2 %vm1277_vm7, %v1248_v33 }
 0x30f   :  { %v1056_v44 = vld [vmem:[#allocation3 + $0xc2] sm:$0xff]  ;;  %v765_v47 = vpop.f32.mrf.mxu1 }
 0x310   :  { %v1036_v45 = vld [vmem:[#allocation3 + $0xc1] sm:$0xff]  ;;  %1188 = vrot.lane.b32.xlu2 %v1056_v44, %s1799_s27  ;;  %997 = vst.msk [vmem:[#allocation3 + $0xd1] sm:$0xff] %vm80_vm3, %v980_v40  ;;  %v837_v26 = vadd.f32 %v836_v52, %v765_v47  ;;  %v1043_v47 = vld [vmem:[#allocation3 + $0x131] sm:$0xff] }
 0x311   :  { %1108 = vrot.lane.b32.xlu1 %v1036_v45, %s1796_s28 }
 0x312   :  { %v946_v28 = vadd.f32 %v920_v43, %v837_v26  ;;  %v1063_v26 = vld [vmem:[#allocation3 + $0x132] sm:$0xff] }
 0x313   :  { %v1175_v51 = vpop.permute.xlu1 %1174 }
 0x314   :  { %v965_v32 = vadd.f32 %v2461_v48, %v946_v28  ;;  %v1095_v36 = vpop.permute.xlu0 %1094  ;;  %1706 = vmatmul.msk.f32.gmra.mxu0 %vm1277_vm7, %v1246_v63  ;;  %1723 = vmatmul.msk.f32.gmra.mxu1 %vm1277_vm7, %v1246_v63 }
 0x315   :  { %v1229_v53 = vsel %vm80_vm3, %v1009_v29, %v1095_v36  ;;  %v1103_v34 = vpop.permute.xlu2 %1102  ;;  %v1016_v36 = vld [vmem:[#allocation3 + $0xc0] sm:$0xff] }
 0x316   :  { %v981_v62 = vmax.f32 %v965_v32, 0.0  ;;  %v923_v54 = vpop.f32.mrf.mxu3  ;;  %v1249_v31 = vsel %vm29_vm2, %v1229_v53, %v1175_v51  ;;  %v1233_v40 = vsel %vm80_vm3, %v1013_v25, %v1103_v34  ;;  %v1014_v53 = vld [vmem:[#allocation3 + $0xa0] sm:$0xff] }
 0x317   :  { %v947_v55 = vadd.f32 %v923_v54, %v840_v50  ;;  %v1057_v56 = vld [vmem:[#allocation3 + $0xd2] sm:$0xff]  ;;  %1746 = vmatmul.msk.f32.gmra.mxu2 %vm1277_vm7, %v1249_v31 }
 0x318   :  { %v1037_v57 = vld [vmem:[#allocation3 + $0xd1] sm:$0xff]  ;;  %998 = vst.msk [vmem:[#allocation3 + $0xe1] sm:$0xff] %vm80_vm3, %v981_v62  ;;  %1190 = vrot.lane.b32.xlu0 %v1057_v56, %s1799_s27 }
 0x319   :  { %1184 = vrot.lane.b32.xlu1 %v1054_v49, %s1799_s27  ;;  %v966_v19 = vadd.f32 %v2461_v48, %v947_v55  ;;  %1110 = vrot.lane.b32.xlu2 %v1037_v57, %s1796_s28 }
 0x31b   :  { %v982_v58 = vmax.f32 %v966_v19, 0.0 }
 0x31c   :  { %v1177_v61 = vpop.permute.xlu0 %1176  ;;  %1707 = vmatmul.msk.f32.gmra.mxu0 %vm1277_vm7, %v1247_v15  ;;  %1724 = vmatmul.msk.f32.gmra.mxu1 %vm1277_vm7, %v1247_v15 }
 0x31d   :  { %999 = vst.msk [vmem:[#allocation3 + $0xf1] sm:$0xff] %vm80_vm3, %v982_v58  ;;  %v1250_v0 = vsel %vm29_vm2, %v1230_v9, %v1177_v61 }
 0x31e   :  { %v926_v63 = vpop.f32.mrf.mxu3 }
 0x31f   :  { %v948_v2 = vadd.f32 %v926_v63, %v843_v60  ;;  %v1038_v3 = vld [vmem:[#allocation3 + $0xe1] sm:$0xff]  ;;  %1747 = vmatmul.msk.f32.gmra.mxu2 %vm1277_vm7, %v1250_v0  ;;  %v2721_v63 = vld [vmem:[%s2846_s7] ss:$0 sm:$0xff] }
 0x320   :  { %1112 = vrot.lane.b32.xlu0 %v1038_v3, %s1796_s28  ;;  %v1058_v27 = vld [vmem:[#allocation3 + $0xe2] sm:$0xff] }
 0x321   :  { %1106 = vrot.lane.b32.xlu1 %v1035_v1, %s1796_s28  ;;  %v967_v8 = vadd.f32 %v2461_v48, %v948_v2  ;;  %1186 = vrot.lane.b32.xlu2 %v1055_v42, %s1799_s27  ;;  %v1015_v2 = vld [vmem:[#allocation3 + $0xb0] sm:$0xff] }
 0x323   :  { %v983_v4 = vmax.f32 %v967_v8, 0.0 }
 0x324   :  { %v1099_v5 = vpop.permute.xlu1 %1098  ;;  %1708 = vmatmul.msk.f32.gmra.mxu0 %vm1277_vm7, %v1248_v33  ;;  %1725 = vmatmul.msk.f32.gmra.mxu1 %vm1277_vm7, %v1248_v33  ;;  %v1059_v16 = vld [vmem:[#allocation3 + $0xf2] sm:$0xff] }
 0x325   :  { %1000 = vst.msk [vmem:[#allocation3 + $0x101] sm:$0xff] %vm80_vm3, %v983_v4  ;;  %v1231_v22 = vsel %vm80_vm3, %v1011_v6, %v1099_v5  ;;  %v1039_v13 = vld [vmem:[#allocation3 + $0xf1] sm:$0xff] }
 0x326   :  { %v929_v10 = vpop.f32.mrf.mxu3  ;;  %v1251_v11 = vsel %vm29_vm2, %v1231_v22, %v1179_v7 }
 0x327   :  { %v949_v12 = vadd.f32 %v929_v10, %v2401_v14  ;;  %1748 = vmatmul.msk.f32.gmra.mxu2 %vm1277_vm7, %v1251_v11 }
 0x328   :  { %1194 = vrot.lane.b32.xlu0 %v1059_v16, %s1799_s27 }
 0x329   :  { %1192 = vrot.lane.b32.xlu1 %v1058_v27, %s1799_s27  ;;  %1114 = vrot.lane.b32.xlu2 %v1039_v13, %s1796_s28  ;;  %v968_v15 = vadd.f32 %v2461_v48, %v949_v12  ;;  %v1018_v12 = vld [vmem:[#allocation3 + $0xe0] sm:$0xff] }
 0x32b   :  { %v984_v17 = vmax.f32 %v968_v15, 0.0 }
 0x32c   :  { %v1181_v24 = vpop.permute.xlu1 %1180  ;;  %v1101_v18 = vpop.permute.xlu0 %1100  ;;  %1709 = vmatmul.msk.f32.gmra.mxu0 %vm1277_vm7, %v1249_v31  ;;  %1726 = vmatmul.msk.f32.gmra.mxu1 %vm1277_vm7, %v1249_v31  ;;  %v1040_v35 = vld [vmem:[#allocation3 + $0x101] sm:$0xff]  ;;  %v1017_v31 = vld [vmem:[#allocation3 + $0xd0] sm:$0xff] }
 0x32d   :  { %1001 = vst.msk [vmem:[#allocation3 + $0x111] sm:$0xff] %vm80_vm3, %v984_v17  ;;  %v1232_v14 = vsel %vm80_vm3, %v1012_v20, %v1101_v18  ;;  %v1060_v39 = vld [vmem:[#allocation3 + $0x102] sm:$0xff] }
 0x32e   :  { %v932_v30 = vpop.f32.mrf.mxu3  ;;  %v1252_v37 = vsel %vm29_vm2, %v1232_v14, %v1181_v24 }
 0x32f   :  { %v950_v38 = vadd.f32 %v932_v30, %v849_v21  ;;  %1749 = vmatmul.msk.f32.gmra.mxu2 %vm1277_vm7, %v1252_v37 }
 0x331   :  { %1116 = vrot.lane.b32.xlu1 %v1040_v35, %s1796_s28  ;;  %1196 = vrot.lane.b32.xlu2 %v1060_v39, %s1799_s27  ;;  %v969_v46 = vadd.f32 %v2461_v48, %v950_v38  ;;  %v1019_v38 = vld [vmem:[#allocation3 + $0xf0] sm:$0xff] }
 0x333   :  { %v985_v41 = vmax.f32 %v969_v46, 0.0 }
 0x334   :  { %v1041_v43 = vld [vmem:[#allocation3 + $0x111] sm:$0xff]  ;;  %v1183_v44 = vpop.permute.xlu0 %1182  ;;  %1710 = vmatmul.msk.f32.gmra.mxu0 %vm1277_vm7, %v1250_v0  ;;  %1727 = vmatmul.msk.f32.gmra.mxu1 %vm1277_vm7, %v1250_v0 }
 0x335   :  { %1002 = vst.msk [vmem:[#allocation3 + $0x121] sm:$0xff] %vm80_vm3, %v985_v41  ;;  %v1061_v45 = vld [vmem:[#allocation3 + $0x112] sm:$0xff]  ;;  %v1253_v52 = vsel %vm29_vm2, %v1233_v40, %v1183_v44  ;;  %1118 = vrot.lane.b32.xlu0 %v1041_v43, %s1796_s28 }
 0x337   :  { %1750 = vmatmul.msk.f32.gmra.mxu2 %vm1277_vm7, %v1253_v52  ;;  %v1020_v52 = vld [vmem:[#allocation3 + $0x100] sm:$0xff] }
 0x339   :  { %1198 = vrot.lane.b32.xlu1 %v1061_v45, %s1799_s27 }
 0x33c   :  { %v1042_v48 = vld [vmem:[#allocation3 + $0x121] sm:$0xff]  ;;  %1711 = vmatmul.msk.f32.gmra.mxu0 %vm1277_vm7, %v1251_v11  ;;  %1728 = vmatmul.msk.f32.gmra.mxu1 %vm1277_vm7, %v1251_v11  ;;  %v1105_v49 = vpop.permute.xlu0 %1104 }
 0x33d   :  { %v1062_v33 = vld [vmem:[#allocation3 + $0x122] sm:$0xff]  ;;  %1120 = vrot.lane.b32.xlu2 %v1042_v48, %s1796_s28  ;;  %v1234_v55 = vsel %vm80_vm3, %v1014_v53, %v1105_v49 }
 0x33e   :  { %1200 = vrot.lane.b32.xlu0 %v1062_v33, %s1799_s27 }
 0x341   :  { %1122 = vrot.lane.b32.xlu1 %v1043_v47, %s1796_s28 }
 0x344   :  { %1712 = vmatmul.msk.f32.gmra.mxu0 %vm1277_vm7, %v1252_v37 }
 0x345   :  { %1202 = vrot.lane.b32.xlu2 %v1063_v26, %s1799_s27 }
 0x369   :  { %v1414_v50 = vpop.f32.mrf.mxu1 }
 0x36a   :  { %v1189_v28 = vpop.permute.xlu2 %1188 }
 0x373   :  { %v1111_v54 = vpop.permute.xlu2 %1110 }
 0x374   :  { %v1237_v57 = vsel %vm80_vm3, %v1017_v31, %v1111_v54 }
 0x37b   :  { %v1187_v42 = vpop.permute.xlu2 %1186 }
 0x37e   :  { %v1492_v32 = vpop.f32.mrf.mxu2 }
 0x383   :  { %v1109_v51 = vpop.permute.xlu1 %1108  ;;  %v1115_v14 = vpop.permute.xlu2 %1114 }
 0x384   :  { %v1236_v29 = vsel %vm80_vm3, %v1016_v36, %v1109_v51  ;;  %v1239_v25 = vsel %vm80_vm3, %v1019_v38, %v1115_v14 }
 0x385   :  { %v1256_v62 = vsel %vm29_vm2, %v1236_v29, %v1189_v28  ;;  %v1021_v28 = vld [vmem:[#allocation3 + $0x110] sm:$0xff] }
 0x386   :  { %1751 = vmatmul.msk.f32.gmra.mxu2 %vm1277_vm7, %v1256_v62 }
 0x388   :  { %v1495_v19 = vpop.f32.mrf.mxu2 }
 0x389   :  { %v1343_v59 = vpop.f32.mrf.mxu0  ;;  %v1417_v60 = vpop.f32.mrf.mxu1 }
 0x38a   :  { %v1191_v23 = vpop.permute.xlu0 %1190  ;;  %v1415_v61 = vadd.f32 %v1414_v50, %v1343_v59 }
 0x38b   :  { %v1185_v56 = vpop.permute.xlu1 %1184  ;;  %v1257_v9 = vsel %vm29_vm2, %v1237_v57, %v1191_v23  ;;  %v1197_v48 = vpop.permute.xlu2 %1196  ;;  %v1022_v57 = vld [vmem:[#allocation3 + $0x120] sm:$0xff] }
 0x38c   :  { %v1254_v58 = vsel %vm29_vm2, %v1234_v55, %v1185_v56  ;;  %v1540_v0 = vadd.f32 %v1492_v32, %v1415_v61 }
 0x38d   :  { %1729 = vmatmul.msk.f32.gmra.mxu1 %vm1277_vm7, %v1254_v58 }
 0x38e   :  { %1752 = vmatmul.msk.f32.gmra.mxu2 %vm1277_vm7, %v1257_v9  ;;  %v1559_v1 = vadd.f32 %v2721_v63, %v1540_v0 }
 0x390   :  { %v1575_v8 = vmax.f32 %v1559_v1, 0.0 }
 0x391   :  { %v1346_v5 = vpop.f32.mrf.mxu0  ;;  %v1420_v6 = vpop.f32.mrf.mxu1 }
 0x392   :  { %1591 = vst.msk [vmem:[%s2847_s8] sm:$0xff] %vm80_vm3, %v1575_v8  ;;  %v1418_v22 = vadd.f32 %v1417_v60, %v1346_v5  ;;  %v1498_v27 = vpop.f32.mrf.mxu2  ;;  %v1113_v10 = vpop.permute.xlu0 %1112 }
 0x393   :  { %v1107_v3 = vpop.permute.xlu1 %1106  ;;  %v1238_v13 = vsel %vm80_vm3, %v1018_v12, %v1113_v10 }
 0x394   :  { %v1235_v4 = vsel %vm80_vm3, %v1015_v2, %v1107_v3  ;;  %v1541_v11 = vadd.f32 %v1495_v19, %v1418_v22 }
 0x395   :  { %v1255_v7 = vsel %vm29_vm2, %v1235_v4, %v1187_v42  ;;  %v1023_v42 = vld [vmem:[#allocation3 + $0x130] sm:$0xff] }
 0x396   :  { %1713 = vmatmul.msk.f32.gmra.mxu0 %vm1277_vm7, %v1255_v7  ;;  %1730 = vmatmul.msk.f32.gmra.mxu1 %vm1277_vm7, %v1255_v7  ;;  %v1560_v16 = vadd.f32 %v2721_v63, %v1541_v11 }
 0x397   :  { %v1121_v31 = vpop.permute.xlu2 %1120 }
 0x398   :  { %v1576_v17 = vmax.f32 %v1560_v16, 0.0  ;;  %v1242_v58 = vsel %vm80_vm3, %v1022_v57, %v1121_v31 }
 0x399   :  { %v1349_v18 = vpop.f32.mrf.mxu0  ;;  %v1423_v20 = vpop.f32.mrf.mxu1 }
 0x39a   :  { %1592 = vst.msk [vmem:[%s2847_s8 + $0x8] sm:$0xff] %vm80_vm3, %v1576_v17  ;;  %v1421_v21 = vadd.f32 %v1420_v6, %v1349_v18  ;;  %v1501_v35 = vpop.f32.mrf.mxu2  ;;  %v1195_v37 = vpop.permute.xlu0 %1194 }
 0x39b   :  { %v1193_v15 = vpop.permute.xlu1 %1192  ;;  %v1259_v40 = vsel %vm29_vm2, %v1239_v25, %v1195_v37 }
 0x39c   :  { %v1258_v24 = vsel %vm29_vm2, %v1238_v13, %v1193_v15  ;;  %v1542_v30 = vadd.f32 %v1498_v27, %v1421_v21 }
 0x39d   :  { %1753 = vmatmul.msk.f32.gmra.mxu2 %vm1277_vm7, %v1258_v24 }
 0x39e   :  { %1714 = vmatmul.msk.f32.gmra.mxu0 %vm1277_vm7, %v1256_v62  ;;  %1731 = vmatmul.msk.f32.gmra.mxu1 %vm1277_vm7, %v1256_v62  ;;  %v1561_v39 = vadd.f32 %v2721_v63, %v1542_v30 }
 0x39f   :  { %v1203_v22 = vpop.permute.xlu2 %1202 }
 0x3a0   :  { %v1577_v46 = vmax.f32 %v1561_v39, 0.0 }
 0x3a1   :  { %v1352_v41 = vpop.f32.mrf.mxu0  ;;  %v1426_v44 = vpop.f32.mrf.mxu1 }
 0x3a2   :  { %1593 = vst.msk [vmem:[%s2847_s8 + $0x10] sm:$0xff] %vm80_vm3, %v1577_v46  ;;  %v1424_v43 = vadd.f32 %v1423_v20, %v1352_v41  ;;  %v1504_v33 = vpop.f32.mrf.mxu2 }
 0x3a3   :  { %v1117_v34 = vpop.permute.xlu1 %1116 }
 0x3a4   :  { %v1543_v45 = vadd.f32 %v1501_v35, %v1424_v43  ;;  %v1240_v47 = vsel %vm80_vm3, %v1020_v52, %v1117_v34 }
 0x3a5   :  { %1754 = vmatmul.msk.f32.gmra.mxu2 %vm1277_vm7, %v1259_v40  ;;  %v1260_v36 = vsel %vm29_vm2, %v1240_v47, %v1197_v48 }
 0x3a6   :  { %1715 = vmatmul.msk.f32.gmra.mxu0 %vm1277_vm7, %v1257_v9  ;;  %1732 = vmatmul.msk.f32.gmra.mxu1 %vm1277_vm7, %v1257_v9  ;;  %v1562_v26 = vadd.f32 %v2721_v63, %v1543_v45 }
 0x3a7   :  { %v1119_v32 = vpop.permute.xlu0 %1118 }
 0x3a8   :  { %v1578_v50 = vmax.f32 %v1562_v26, 0.0  ;;  %v1241_v51 = vsel %vm80_vm3, %v1021_v28, %v1119_v32 }
 0x3a9   :  { %v1355_v29 = vpop.f32.mrf.mxu0  ;;  %v1429_v55 = vpop.f32.mrf.mxu1 }
 0x3aa   :  { %1594 = vst.msk [vmem:[%s2847_s8 + $0x18] sm:$0xff] %vm80_vm3, %v1578_v50  ;;  %v1427_v53 = vadd.f32 %v1426_v44, %v1355_v29  ;;  %v1507_v19 = vpop.f32.mrf.mxu2 }
 0x3ab   :  { %v1199_v49 = vpop.permute.xlu1 %1198 }
 0x3ac   :  { %v1261_v62 = vsel %vm29_vm2, %v1241_v51, %v1199_v49  ;;  %v1544_v54 = vadd.f32 %v1504_v33, %v1427_v53 }
 0x3ad   :  { %1755 = vmatmul.msk.f32.gmra.mxu2 %vm1277_vm7, %v1260_v36  ;;  %1719 = vmatmul.msk.f32.vlgmr.msrb.gmra.mxu3 %vm1277_vm7, %v1261_v62 }
 0x3ae   :  { %1716 = vmatmul.msk.f32.gmra.mxu0 %vm1277_vm7, %v1258_v24  ;;  %1733 = vmatmul.msk.f32.gmra.mxu1 %vm1277_vm7, %v1258_v24  ;;  %v1563_v56 = vadd.f32 %v2721_v63, %v1544_v54 }
 0x3b0   :  { %v1201_v23 = vpop.permute.xlu0 %1200  ;;  %v1579_v59 = vmax.f32 %v1563_v56, 0.0 }
 0x3b1   :  { %v1262_v60 = vsel %vm29_vm2, %v1242_v58, %v1201_v23  ;;  %v1358_v9 = vpop.f32.mrf.mxu0  ;;  %v1432_v2 = vpop.f32.mrf.mxu1 }
 0x3b2   :  { %1595 = vst.msk [vmem:[%s2847_s8 + $0x20] sm:$0xff] %vm80_vm3, %v1579_v59  ;;  %v1430_v61 = vadd.f32 %v1429_v55, %v1358_v9  ;;  %v1510_v4 = vpop.f32.mrf.mxu2 }
 0x3b3   :  { %v1123_v8 = vpop.permute.xlu1 %1122 }
 0x3b4   :  { %v1545_v0 = vadd.f32 %v1507_v19, %v1430_v61  ;;  %v1243_v7 = vsel %vm80_vm3, %v1023_v42, %v1123_v8 }
 0x3b5   :  { %1756 = vmatmul.msk.f32.gmra.mxu2 %vm1277_vm7, %v1261_v62  ;;  %1720 = vmatmul.msk.f32.gmra.mxu3 %vm1277_vm7, %v1262_v60  ;;  %v1263_v11 = vsel %vm29_vm2, %v1243_v7, %v1203_v22 }
 0x3b6   :  { %1717 = vmatmul.msk.f32.gmra.mxu0 %vm1277_vm7, %v1259_v40  ;;  %1734 = vmatmul.msk.f32.gmra.mxu1 %vm1277_vm7, %v1259_v40  ;;  %v1564_v1 = vadd.f32 %v2721_v63, %v1545_v0 }
 0x3b8   :  { %v1580_v3 = vmax.f32 %v1564_v1, 0.0 }
 0x3b9   :  { %v1361_v5 = vpop.f32.mrf.mxu0  ;;  %v1435_v12 = vpop.f32.mrf.mxu1 }
 0x3ba   :  { %1596 = vst.msk [vmem:[%s2847_s8 + $0x28] sm:$0xff] %vm80_vm3, %v1580_v3  ;;  %v1433_v6 = vadd.f32 %v1432_v2, %v1361_v5  ;;  %v1513_v15 = vpop.f32.mrf.mxu2 }
 0x3bc   :  { %v1546_v27 = vadd.f32 %v1510_v4, %v1433_v6 }
 0x3bd   :  { %1757 = vmatmul.msk.f32.gmra.mxu2 %vm1277_vm7, %v1262_v60 }
 0x3be   :  { %1718 = vmatmul.msk.f32.gmra.mxu0 %vm1277_vm7, %v1260_v36  ;;  %1735 = vmatmul.msk.f32.gmra.mxu1 %vm1277_vm7, %v1260_v36  ;;  %v1565_v10 = vadd.f32 %v2721_v63, %v1546_v27 }
 0x3c0   :  { %v1581_v16 = vmax.f32 %v1565_v10, 0.0 }
 0x3c1   :  { %v1364_v13 = vpop.f32.mrf.mxu0 }
 0x3c2   :  { %1597 = vst.msk [vmem:[%s2847_s8 + $0x30] sm:$0xff] %vm80_vm3, %v1581_v16  ;;  %v1436_v17 = vadd.f32 %v1435_v12, %v1364_v13 }
 0x3c4   :  { %v1547_v24 = vadd.f32 %v1513_v15, %v1436_v17 }
 0x3c5   :  { %1758 = vmatmul.msk.f32.gmra.mxu2 %vm1277_vm7, %v1263_v11 }
 0x3c6   :  { %1736 = vmatmul.msk.f32.gmra.mxu1 %vm1277_vm7, %v1261_v62  ;;  %v1566_v18 = vadd.f32 %v2721_v63, %v1547_v24 }
 0x3c8   :  { %v1582_v20 = vmax.f32 %v1566_v18, 0.0 }
 0x3ca   :  { %1598 = vst.msk [vmem:[%s2847_s8 + $0x38] sm:$0xff] %vm80_vm3, %v1582_v20 }
 0x409   :  { %v1516_v14 = vpop.f32.mrf.mxu2 }
 0x40a   :  { %v1438_v21 = vpop.f32.mrf.mxu1 }
 0x411   :  { %v1519_v39 = vpop.f32.mrf.mxu2 }
 0x413   :  { %v1367_v35 = vpop.f32.mrf.mxu0  ;;  %v1441_v30 = vpop.f32.mrf.mxu1 }
 0x414   :  { %v1439_v37 = vadd.f32 %v1438_v21, %v1367_v35 }
 0x416   :  { %v1548_v38 = vadd.f32 %v1516_v14, %v1439_v37 }
 0x418   :  { %v1567_v25 = vadd.f32 %v2721_v63, %v1548_v38 }
 0x41a   :  { %v1583_v34 = vmax.f32 %v1567_v25, 0.0 }
 0x41b   :  { %v1370_v46 = vpop.f32.mrf.mxu0  ;;  %v1444_v40 = vpop.f32.mrf.mxu1 }
 0x41c   :  { %1599 = vst.msk [vmem:[%s2847_s8 + $0x40] sm:$0xff] %vm80_vm3, %v1583_v34  ;;  %v1442_v41 = vadd.f32 %v1441_v30, %v1370_v46 }
 0x41e   :  { %v1549_v43 = vadd.f32 %v1519_v39, %v1442_v41 }
 0x420   :  { %v1568_v44 = vadd.f32 %v2721_v63, %v1549_v43  ;;  %v1522_v45 = vpop.f32.mrf.mxu2 }
 0x422   :  { %v1584_v52 = vmax.f32 %v1568_v44, 0.0 }
 0x423   :  { %v1373_v48 = vpop.f32.mrf.mxu0  ;;  %v1447_v33 = vpop.f32.mrf.mxu1 }
 0x424   :  { %1600 = vst.msk [vmem:[%s2847_s8 + $0x48] sm:$0xff] %vm80_vm3, %v1584_v52  ;;  %v1445_v47 = vadd.f32 %v1444_v40, %v1373_v48 }
 0x426   :  { %v1550_v26 = vadd.f32 %v1522_v45, %v1445_v47 }
 0x428   :  { %v1569_v28 = vadd.f32 %v2721_v63, %v1550_v26  ;;  %v1525_v32 = vpop.f32.mrf.mxu2 }
 0x42a   :  { %v1585_v49 = vmax.f32 %v1569_v28, 0.0 }
 0x42b   :  { %v1376_v50 = vpop.f32.mrf.mxu0  ;;  %v1450_v36 = vpop.f32.mrf.mxu1 }
 0x42c   :  { %1601 = vst.msk [vmem:[%s2847_s8 + $0x50] sm:$0xff] %vm80_vm3, %v1585_v49  ;;  %v1448_v51 = vadd.f32 %v1447_v33, %v1376_v50 }
 0x42e   :  { %v1551_v29 = vadd.f32 %v1525_v32, %v1448_v51 }
 0x430   :  { %v1570_v62 = vadd.f32 %v2721_v63, %v1551_v29  ;;  %v1528_v53 = vpop.f32.mrf.mxu2  ;;  %v1385_v60 = vpop.f32.mrf.mxu3 }
 0x432   :  { %v1586_v54 = vmax.f32 %v1570_v62, 0.0 }
 0x433   :  { %v1379_v55 = vpop.f32.mrf.mxu0  ;;  %v1453_v56 = vpop.f32.mrf.mxu1 }
 0x434   :  { %1602 = vst.msk [vmem:[%s2847_s8 + $0x58] sm:$0xff] %vm80_vm3, %v1586_v54  ;;  %v1451_v31 = vadd.f32 %v1450_v36, %v1379_v55 }
 0x436   :  { %v1552_v57 = vadd.f32 %v1528_v53, %v1451_v31 }
 0x438   :  { %v1571_v19 = vadd.f32 %v2721_v63, %v1552_v57  ;;  %v1531_v23 = vpop.f32.mrf.mxu2  ;;  %v1388_v7 = vpop.f32.mrf.mxu3 }
 0x43a   :  { %v1587_v58 = vmax.f32 %v1571_v19, 0.0 }
 0x43b   :  { %v1382_v59 = vpop.f32.mrf.mxu0  ;;  %v1456_v61 = vpop.f32.mrf.mxu1 }
 0x43c   :  { %1603 = vst.msk [vmem:[%s2847_s8 + $0x60] sm:$0xff] %vm80_vm3, %v1587_v58  ;;  %v1454_v9 = vadd.f32 %v1453_v56, %v1382_v59  ;;  %v1457_v1 = vadd.f32 %v1456_v61, %v1385_v60 }
 0x43e   :  { %v1553_v0 = vadd.f32 %v1531_v23, %v1454_v9 }
 0x440   :  { %v1572_v2 = vadd.f32 %v2721_v63, %v1553_v0  ;;  %v1534_v3 = vpop.f32.mrf.mxu2 }
 0x441   :  { %v1554_v42 = vadd.f32 %v1534_v3, %v1457_v1 }
 0x442   :  { %v1588_v8 = vmax.f32 %v1572_v2, 0.0 }
 0x443   :  { %v1573_v4 = vadd.f32 %v2721_v63, %v1554_v42  ;;  %v1459_v5 = vpop.f32.mrf.mxu1 }
 0x444   :  { %1604 = vst.msk [vmem:[%s2847_s8 + $0x68] sm:$0xff] %vm80_vm3, %v1588_v8  ;;  %v1460_v22 = vadd.f32 %v1459_v5, %v1388_v7 }
 0x445   :  { %v1589_v6 = vmax.f32 %v1573_v4, 0.0 }
 0x447   :  { %1605 = vst.msk [vmem:[%s2847_s8 + $0x70] sm:$0xff] %vm80_vm3, %v1589_v6 }
 0x448   :  { %v1537_v27 = vpop.f32.mrf.mxu2 }
 0x449   :  { %v1555_v10 = vadd.f32 %v1537_v27, %v1460_v22 }
 0x44b   :  { %v1574_v11 = vadd.f32 %v2721_v63, %v1555_v10 }
 0x44d   :  { %v1590_v16 = vmax.f32 %v1574_v11, 0.0 }
 0x44f   :  { %1606 = vst.msk [vmem:[%s2847_s8 + $0x78] sm:$0xff] %vm80_vm3, %v1590_v16 }

</bundles_post_ra>
